<compile_context>
chip_gen: v5e
topology: v5e:2x2
jax: 0.10.0
libtpu: 0.0.40
codegen_flags: <defaults>
</compile_context>

<pallas_src>
import functools

import jax
import jax.numpy as jnp
from jax.experimental import pallas as pl
from jax.experimental.pallas import tpu as pltpu

_LANES = 128
_SUBLANES = 8


def _resblock_kernel(x_hbm, w1_ref, w2_ref, sh_ref, o_ref, buf, sem, *,
                     use_im2col=True):
    # x_hbm  : (B, H+2, Wp+2, CP) f32 padded activation, left in HBM (pl.ANY)
    # w1_ref : (9*CP, CP)         bf16 3x3 conv weights, BN1 scale folded
    # w2_ref : (CP, CP)           bf16 1x1 conv weights, BN2 scale folded
    # sh_ref : (2, CP)            f32  folded shifts [conv1+BN1, conv2+BN2]
    # o_ref  : (1, TH*Wp, CP)     f32  collapsed output tile (lane/sublane dense)
    # buf    : (2, TH+2, Wp+2, CP) f32 manual double buffer for the input window
    # sem    : DMA semaphores (2,)
    b = pl.program_id(0)
    t = pl.program_id(1)
    nt = pl.num_programs(1)
    _, hp, wp, cp = buf.shape
    th, w = hp - 2, wp - 2

    def window(tile_idx, slot_idx):
        return pltpu.make_async_copy(
            x_hbm.at[b, pl.ds(tile_idx * th, th + 2), :, :],
            buf.at[slot_idx],
            sem.at[slot_idx])

    slot = t % 2

    @pl.when(t == 0)                     # prime the first tile of this image
    def _():
        window(0, 0).start()

    window(t, slot).wait()               # current window now resident in VMEM

    @pl.when(t + 1 < nt)                 # prefetch next tile of the same image
    def _():
        window(t + 1, 1 - slot).start()

    xp = buf[slot]                                   # (TH+2, Wp+2, CP) f32
    xr = jnp.maximum(xp, 0.0).astype(jnp.bfloat16)   # ReLU (zero pad invariant)

    if use_im2col:
        # One MXU matmul with K = 9*CP: lane-concat of the 9 shifted views.
        taps = [xr[dy:dy + th, dx:dx + w, :].reshape(th * w, cp)
                for dy in range(3) for dx in range(3)]
        patches = jnp.concatenate(taps, axis=-1)     # (TH*Wp, 9*CP) bf16
        y = jnp.dot(patches, w1_ref[...], preferred_element_type=jnp.float32)
    else:
        # v5e path: 128-wide MXU -> K=CP dots already run at full rate; skip
        # the concat (and its VMEM/relayout cost), accumulate 9 partial dots.
        y = None
        for k in range(9):
            dy, dx = divmod(k, 3)
            tap = xr[dy:dy + th, dx:dx + w, :].reshape(th * w, cp)
            part = jnp.dot(tap, w1_ref[k * cp:(k + 1) * cp, :],
                           preferred_element_type=jnp.float32)
            y = part if y is None else y + part

    y = jnp.maximum(y + sh_ref[0:1, :], 0.0)         # conv1 bias + BN1, ReLU
    y = jnp.dot(y.astype(jnp.bfloat16), w2_ref[...],
                preferred_element_type=jnp.float32)  # conv 1x1
    y = y + sh_ref[1:2, :]                           # conv2 bias + BN2

    # Residual: interior of the padded window is exactly x (pre-ReLU, f32).
    res = xp[1:th + 1, 1:w + 1, :].reshape(th * w, cp)
    o_ref[0] = res + y                               # unmasked, lane-dense store


def _device_info():
    """Best-effort TPU generation detection; conservative fallbacks."""
    kind = ""
    try:
        kind = jax.devices()[0].device_kind.lower()
    except Exception:
        pass
    is_v5e = ("v5 lite" in kind) or ("v5e" in kind) or ("v5litepod" in kind)
    is_v7 = "v7" in kind
    big_vmem = (not is_v7) and any(tag in kind for tag in ("v4", "v5", "v6"))
    vmem_limit = (64 if big_vmem else 32) * 1024 * 1024
    return is_v5e, is_v7, vmem_limit


def _choose_tile_h(H, Wp, CP, budget_bytes, min_tiles=1):
    """Largest divisor of H whose honest per-step VMEM working set fits."""
    weights = 2 * (9 * CP * CP * 2 + CP * CP * 2 + 2 * CP * 4)  # double-buffered

    def est(th):
        rows = th * Wp
        in_buf = 2 * (th + 2) * (Wp + 2) * CP * 4   # manual input double buffer (f32)
        relu = (th + 2) * (Wp + 2) * CP * 2         # bf16 ReLU'd copy
        patch = rows * 9 * CP * 2                   # bf16 im2col patch
        inter = 2 * rows * CP * 4                   # f32 matmul outputs (2 live)
        resid = rows * CP * 4                       # f32 residual view
        out_buf = 2 * rows * CP * 4                 # pipelined output double buffer
        return weights + in_buf + relu + patch + inter + resid + out_buf

    divisors = [d for d in range(1, H + 1) if H % d == 0]
    cands = [d for d in divisors if H // d >= min_tiles] or divisors
    best = 1
    for th in sorted(cands):
        if est(th) <= budget_bytes:
            best = th
    return best


def resblock_forward_nhwc(x_nhwc, params, eps=1e-5):
    """x_nhwc: (B, H, W, C) float32.  Returns (B, H, W, C).  Eval-mode BN."""
    (w1, b1, g1, be1, m1, v1, w2, b2, g2, be2, m2, v2) = params
    B, H, W, C = x_nhwc.shape
    CP = -(-C // _LANES) * _LANES           # lane-dense channels
    Wp = -(-W // _SUBLANES) * _SUBLANES     # sublane-dense width
    is_v5e, is_v7, vmem_limit = _device_info()

    def padc(a, axis):
        pads = [(0, 0)] * a.ndim
        pads[axis] = (0, CP - C)
        return jnp.pad(a, pads)

    # ---- fold inference BatchNorm into the conv weights ---------------------
    s1 = g1 / jnp.sqrt(v1 + eps)
    s2 = g2 / jnp.sqrt(v2 + eps)
    w1_k = jnp.transpose(w1, (2, 3, 1, 0)) * s1          # (3,3,Cin,Cout)*scale_out
    w2_k = jnp.transpose(w2[:, :, 0, 0], (1, 0)) * s2    # (Cin,Cout)*scale_out
    shift1 = (b1 - m1) * s1 + be1
    shift2 = (b2 - m2) * s2 + be2

    w1_p = padc(padc(w1_k, 2), 3).reshape(9 * CP, CP).astype(jnp.bfloat16)
    w2_p = padc(padc(w2_k, 0), 1).astype(jnp.bfloat16)
    shifts = jnp.stack([padc(shift1, 0), padc(shift2, 0)]).astype(jnp.float32)

    # ---- lane/sublane-dense activation with a 1-px zero halo ----------------
    x = padc(x_nhwc.astype(jnp.float32), 3)
    x = jnp.pad(x, ((0, 0), (0, 0), (0, Wp - W), (0, 0)))
    xp = jnp.pad(x, ((0, 0), (1, 1), (1, 1), (0, 0)))     # (B, H+2, Wp+2, CP)

    min_tiles = 2 if (is_v7 and B == 1 and H > 1) else 1
    TH = _choose_tile_h(H, Wp, CP, vmem_limit - (2 << 20), min_tiles)
    NT = H // TH

    kernel = functools.partial(_resblock_kernel, use_im2col=not is_v5e)
    flops = 2 * B * H * Wp * (9 * CP * CP + CP * CP)
    bytes_accessed = (B * (H + 2) * (Wp + 2) * CP * 4 + B * H * Wp * CP * 4
                      + (9 * CP * CP + CP * CP) * 2 + 2 * CP * 4)

    out = pl.pallas_call(
        kernel,
        out_shape=jax.ShapeDtypeStruct((B, H * Wp, CP), jnp.float32),
        grid_spec=pltpu.PrefetchScalarGridSpec(
            num_scalar_prefetch=0,
            grid=(B, NT),
            in_specs=[
                pl.BlockSpec(memory_space=pl.ANY),                 # activation (HBM)
                pl.BlockSpec((9 * CP, CP), lambda b, t: (0, 0)),   # conv1+BN1 weights
                pl.BlockSpec((CP, CP), lambda b, t: (0, 0)),       # conv2+BN2 weights
                pl.BlockSpec((2, CP), lambda b, t: (0, 0)),        # folded shifts
            ],
            out_specs=pl.BlockSpec((1, TH * Wp, CP), lambda b, t: (b, t, 0)),
            scratch_shapes=[
                pltpu.VMEM((2, TH + 2, Wp + 2, CP), jnp.float32),  # input dbl buffer
                pltpu.SemaphoreType.DMA((2,)),
            ]),
        compiler_params=pltpu.CompilerParams(
            dimension_semantics=("parallel", "arbitrary"),
            vmem_limit_bytes=vmem_limit),
        cost_estimate=pl.CostEstimate(flops=flops, transcendentals=0,
                                      bytes_accessed=bytes_accessed),
    )(xp, w1_p, w2_p, shifts)

    out = out.reshape(B, H, Wp, CP)
    return out[:, :, :W, :C]


def resblock_forward(x_nchw, params, eps=1e-5):
    """NCHW wrapper matching the PyTorch module interface.

    NOTE: in a full network keep activations NHWC / channel-padded across
    blocks and call resblock_forward_nhwc directly; the transposes here only
    exist to match the NCHW interface of a single standalone block.
    """
    x_nhwc = jnp.transpose(x_nchw, (0, 2, 3, 1))
    out = resblock_forward_nhwc(x_nhwc, params, eps)
    return jnp.transpose(out, (0, 3, 1, 2))


def _ref_forward(x, params, eps=1e-5):
    """Pure-JAX NCHW reference matching the PyTorch module (eval-mode BN)."""
    (w1, b1, g1, be1, m1, v1, w2, b2, g2, be2, m2, v2) = params
    bn = lambda y, g, be, m, v: ((y - m[None, :, None, None]) /
                                 jnp.sqrt(v + eps)[None, :, None, None] *
                                 g[None, :, None, None] + be[None, :, None, None])
    r = jnp.maximum(x, 0.0)
    y = jax.lax.conv_general_dilated(r, w1, (1, 1), ((1, 1), (1, 1)),
                                     dimension_numbers=('NCHW', 'OIHW', 'NCHW'))
    y = bn(y + b1[None, :, None, None], g1, be1, m1, v1)
    y = jnp.maximum(y, 0.0)
    y = jax.lax.conv_general_dilated(y, w2, (1, 1), ((0, 0), (0, 0)),
                                     dimension_numbers=('NCHW', 'OIHW', 'NCHW'))
    y = bn(y + b2[None, :, None, None], g2, be2, m2, v2)
    return x + y


def _init_params(key, dim):
    ks = jax.random.split(key, 12)
    w1 = jax.random.normal(ks[0], (dim, dim, 3, 3), jnp.float32) * 0.1   # Conv2d(dim,dim,3)
    b1 = jax.random.normal(ks[1], (dim,), jnp.float32) * 0.1
    g1 = 1.0 + 0.1 * jax.random.normal(ks[2], (dim,), jnp.float32)       # BN1 weight
    be1 = 0.1 * jax.random.normal(ks[3], (dim,), jnp.float32)            # BN1 bias
    m1 = 0.1 * jax.random.normal(ks[4], (dim,), jnp.float32)             # BN1 running_mean
    v1 = jax.random.uniform(ks[5], (dim,), jnp.float32, 0.5, 1.5)        # BN1 running_var
    w2 = jax.random.normal(ks[6], (dim, dim, 1, 1), jnp.float32) * 0.1   # Conv2d(dim,dim,1)
    b2 = jax.random.normal(ks[7], (dim,), jnp.float32) * 0.1
    g2 = 1.0 + 0.1 * jax.random.normal(ks[8], (dim,), jnp.float32)
    be2 = 0.1 * jax.random.normal(ks[9], (dim,), jnp.float32)
    m2 = 0.1 * jax.random.normal(ks[10], (dim,), jnp.float32)
    v2 = jax.random.uniform(ks[11], (dim,), jnp.float32, 0.5, 1.5)
    return (w1, b1, g1, be1, m1, v1, w2, b2, g2, be2, m2, v2)


if __name__ == "__main__":
    key = jax.random.PRNGKey(0)
    kx, kp = jax.random.split(key)

    B, C, H, W = 2, 4, 16, 16
    x = jax.random.normal(kx, (B, C, H, W), jnp.float32)
    params = _init_params(kp, C)

    out = jax.block_until_ready(jax.jit(resblock_forward)(x, params))
    ref = jax.block_until_ready(_ref_forward(x, params))

    assert out.shape == (B, C, H, W)
    err = float(jnp.max(jnp.abs(out - ref)))
    # bf16 matmuls (f32 accumulation) -> loosened tolerance vs. pure-f32 reference
    assert jnp.allclose(out, ref, atol=3e-2, rtol=3e-2), f"max abs err {err}"
    print("KERNEL_OK")
</pallas_src>

<mosaic_0001>
module attributes {stable_mosaic.version = 11 : i64} {
  func.func @_resblock_kernel(%arg0: i32, %arg1: i32, %arg2: memref<2x18x18x128xf32, #tpu.memory_space<any>>, %arg3: memref<1152x128xbf16, #tpu.memory_space<vmem>>, %arg4: memref<128x128xbf16, #tpu.memory_space<vmem>>, %arg5: memref<2x128xf32, #tpu.memory_space<vmem>>, %arg6: memref<1x256x128xf32, #tpu.memory_space<vmem>>, %arg7: memref<2x18x18x128xf32, #tpu.memory_space<vmem>>, %arg8: memref<2x!tpu.dma_semaphore, #tpu.memory_space<semaphore_mem>>) attributes {dimension_semantics = [#tpu.dimension_semantics<parallel>, #tpu.dimension_semantics<arbitrary>], iteration_bounds = array<i64: 2, 1>, scalar_prefetch = 0 : i64, scratch_operands = 2 : i64, tpu.core_type = #tpu.core_type<tc>, window_params = [{}, {pipeline_mode = #tpu.pipeline_mode<synchronous>, transform_indices = @transform_1, window_bounds = array<i64: 1152, 128>}, {pipeline_mode = #tpu.pipeline_mode<synchronous>, transform_indices = @transform_2, window_bounds = array<i64: 128, 128>}, {pipeline_mode = #tpu.pipeline_mode<synchronous>, transform_indices = @transform_3, window_bounds = array<i64: 2, 128>}, {transform_indices = @transform_4, window_bounds = array<i64: 1, 256, 128>}]} {
    %c2_i32 = arith.constant 2 : i32
    %c0_i32 = arith.constant 0 : i32
    %0 = arith.cmpi eq, %c2_i32, %c0_i32 : i32
    %c1_i32 = arith.constant 1 : i32
    %1 = arith.select %0, %c1_i32, %c2_i32 : i32
    %2 = arith.remsi %arg1, %1 : i32
    %c0_i32_0 = arith.constant 0 : i32
    %3 = arith.cmpi ne, %2, %c0_i32_0 : i32
    %c0_i32_1 = arith.constant 0 : i32
    %4 = arith.cmpi slt, %2, %c0_i32_1 : i32
    %c0_i32_2 = arith.constant 0 : i32
    %5 = arith.cmpi slt, %1, %c0_i32_2 : i32
    %6 = arith.xori %4, %5 : i1
    %7 = arith.andi %6, %3 : i1
    %8 = arith.addi %2, %1 : i32
    %9 = arith.select %7, %8, %2 : i32
    %c0_i32_3 = arith.constant 0 : i32
    %10 = arith.cmpi eq, %arg1, %c0_i32_3 : i32
    %11 = arith.extui %10 : i1 to i32
    %c0_i32_4 = arith.constant 0 : i32
    %12 = arith.cmpi ne, %11, %c0_i32_4 : i32
    scf.if %12 {
      %c0_i32_28 = arith.constant 0 : i32
      %c0_i32_29 = arith.constant 0 : i32
      %c0_i32_30 = arith.constant 0 : i32
      %c0_i32_31 = arith.constant 0 : i32
      %c0_i32_32 = arith.constant 0 : i32
      %68 = tpu.memref_slice %arg2[%arg0, %c0_i32_30, %c0_i32_31, %c0_i32_32] : memref<2x18x18x128xf32, #tpu.memory_space<any>> -> memref<1x18x18x128xf32, #tpu.memory_space<any>>
      %69 = tpu.memref_squeeze %68 : memref<1x18x18x128xf32, #tpu.memory_space<any>> -> memref<18x18x128xf32, #tpu.memory_space<any>>
      %c0_i32_33 = arith.constant 0 : i32
      %c0_i32_34 = arith.constant 0 : i32
      %c0_i32_35 = arith.constant 0 : i32
      %70 = tpu.memref_slice %arg7[%c0_i32_28, %c0_i32_33, %c0_i32_34, %c0_i32_35] : memref<2x18x18x128xf32, #tpu.memory_space<vmem>> -> memref<1x18x18x128xf32, #tpu.memory_space<vmem>>
      %71 = tpu.memref_squeeze %70 : memref<1x18x18x128xf32, #tpu.memory_space<vmem>> -> memref<18x18x128xf32, #tpu.memory_space<vmem>>
      %72 = tpu.memref_slice %arg8[%c0_i32_29] : memref<2x!tpu.dma_semaphore, #tpu.memory_space<semaphore_mem>> -> memref<1x!tpu.dma_semaphore, #tpu.memory_space<semaphore_mem>>
      %73 = tpu.memref_squeeze %72 : memref<1x!tpu.dma_semaphore, #tpu.memory_space<semaphore_mem>> -> memref<!tpu.dma_semaphore, #tpu.memory_space<semaphore_mem>>
      tpu.enqueue_dma source(%69 : memref<18x18x128xf32, #tpu.memory_space<any>>) target(%71 : memref<18x18x128xf32, #tpu.memory_space<vmem>>) target_semaphore(%73 : memref<!tpu.dma_semaphore, #tpu.memory_space<semaphore_mem>>)
    } else {
    }
    %c16_i32 = arith.constant 16 : i32
    %13 = arith.muli %arg1, %c16_i32 : i32
    %c0_i32_5 = arith.constant 0 : i32
    %c0_i32_6 = arith.constant 0 : i32
    %14 = tpu.memref_slice %arg2[%arg0, %13, %c0_i32_5, %c0_i32_6] : memref<2x18x18x128xf32, #tpu.memory_space<any>> -> memref<1x18x18x128xf32, #tpu.memory_space<any>>
    %15 = tpu.memref_squeeze %14 : memref<1x18x18x128xf32, #tpu.memory_space<any>> -> memref<18x18x128xf32, #tpu.memory_space<any>>
    %c0_i32_7 = arith.constant 0 : i32
    %c0_i32_8 = arith.constant 0 : i32
    %c0_i32_9 = arith.constant 0 : i32
    %16 = tpu.memref_slice %arg7[%9, %c0_i32_7, %c0_i32_8, %c0_i32_9] : memref<2x18x18x128xf32, #tpu.memory_space<vmem>> -> memref<1x18x18x128xf32, #tpu.memory_space<vmem>>
    %17 = tpu.memref_squeeze %16 : memref<1x18x18x128xf32, #tpu.memory_space<vmem>> -> memref<18x18x128xf32, #tpu.memory_space<vmem>>
    %18 = tpu.memref_slice %arg8[%9] : memref<2x!tpu.dma_semaphore, #tpu.memory_space<semaphore_mem>> -> memref<1x!tpu.dma_semaphore, #tpu.memory_space<semaphore_mem>>
    %19 = tpu.memref_squeeze %18 : memref<1x!tpu.dma_semaphore, #tpu.memory_space<semaphore_mem>> -> memref<!tpu.dma_semaphore, #tpu.memory_space<semaphore_mem>>
    tpu.wait_dma2 semaphore(%19 : memref<!tpu.dma_semaphore, #tpu.memory_space<semaphore_mem>>) src(%15 : memref<18x18x128xf32, #tpu.memory_space<any>>) dst(%17 : memref<18x18x128xf32, #tpu.memory_space<vmem>>)
    %c1_i32_10 = arith.constant 1 : i32
    %20 = arith.addi %arg1, %c1_i32_10 : i32
    %c1_i32_11 = arith.constant 1 : i32
    %21 = arith.cmpi slt, %20, %c1_i32_11 : i32
    %22 = arith.extui %21 : i1 to i32
    %c0_i32_12 = arith.constant 0 : i32
    %23 = arith.cmpi ne, %22, %c0_i32_12 : i32
    scf.if %23 {
      %c1_i32_28 = arith.constant 1 : i32
      %68 = arith.addi %arg1, %c1_i32_28 : i32
      %c1_i32_29 = arith.constant 1 : i32
      %69 = arith.subi %c1_i32_29, %9 : i32
      %c16_i32_30 = arith.constant 16 : i32
      %70 = arith.muli %68, %c16_i32_30 : i32
      %c0_i32_31 = arith.constant 0 : i32
      %c0_i32_32 = arith.constant 0 : i32
      %71 = tpu.memref_slice %arg2[%arg0, %70, %c0_i32_31, %c0_i32_32] : memref<2x18x18x128xf32, #tpu.memory_space<any>> -> memref<1x18x18x128xf32, #tpu.memory_space<any>>
      %72 = tpu.memref_squeeze %71 : memref<1x18x18x128xf32, #tpu.memory_space<any>> -> memref<18x18x128xf32, #tpu.memory_space<any>>
      %c0_i32_33 = arith.constant 0 : i32
      %c0_i32_34 = arith.constant 0 : i32
      %c0_i32_35 = arith.constant 0 : i32
      %73 = tpu.memref_slice %arg7[%69, %c0_i32_33, %c0_i32_34, %c0_i32_35] : memref<2x18x18x128xf32, #tpu.memory_space<vmem>> -> memref<1x18x18x128xf32, #tpu.memory_space<vmem>>
      %74 = tpu.memref_squeeze %73 : memref<1x18x18x128xf32, #tpu.memory_space<vmem>> -> memref<18x18x128xf32, #tpu.memory_space<vmem>>
      %75 = tpu.memref_slice %arg8[%69] : memref<2x!tpu.dma_semaphore, #tpu.memory_space<semaphore_mem>> -> memref<1x!tpu.dma_semaphore, #tpu.memory_space<semaphore_mem>>
      %76 = tpu.memref_squeeze %75 : memref<1x!tpu.dma_semaphore, #tpu.memory_space<semaphore_mem>> -> memref<!tpu.dma_semaphore, #tpu.memory_space<semaphore_mem>>
      tpu.enqueue_dma source(%72 : memref<18x18x128xf32, #tpu.memory_space<any>>) target(%74 : memref<18x18x128xf32, #tpu.memory_space<vmem>>) target_semaphore(%76 : memref<!tpu.dma_semaphore, #tpu.memory_space<semaphore_mem>>)
    } else {
    }
    %24 = arith.index_cast %9 : i32 to index
    %c0 = arith.constant 0 : index
    %c0_13 = arith.constant 0 : index
    %c0_14 = arith.constant 0 : index
    %25 = vector.load %arg7[%24, %c0, %c0_13, %c0_14] : memref<2x18x18x128xf32, #tpu.memory_space<vmem>>, vector<1x18x18x128xf32>
    %26 = vector.shape_cast %25 : vector<1x18x18x128xf32> to vector<18x18x128xf32>
    %cst = arith.constant 0.000000e+00 : f32
    %27 = vector.broadcast %cst : f32 to vector<18x18x128xf32>
    %28 = arith.maximumf %26, %27 : vector<18x18x128xf32>
    %29 = arith.truncf %28 : vector<18x18x128xf32> to vector<18x18x128xbf16>
    %30 = vector.extract_strided_slice %29 {offsets = [0, 0, 0], sizes = [16, 16, 128], strides = [1, 1, 1]} : vector<18x18x128xbf16> to vector<16x16x128xbf16>
    %31 = vector.shape_cast %30 : vector<16x16x128xbf16> to vector<256x128xbf16>
    %32 = vector.extract_strided_slice %29 {offsets = [0, 1, 0], sizes = [16, 16, 128], strides = [1, 1, 1]} : vector<18x18x128xbf16> to vector<16x16x128xbf16>
    %33 = vector.shape_cast %32 : vector<16x16x128xbf16> to vector<256x128xbf16>
    %34 = vector.extract_strided_slice %29 {offsets = [0, 2, 0], sizes = [16, 16, 128], strides = [1, 1, 1]} : vector<18x18x128xbf16> to vector<16x16x128xbf16>
    %35 = vector.shape_cast %34 : vector<16x16x128xbf16> to vector<256x128xbf16>
    %36 = vector.extract_strided_slice %29 {offsets = [1, 0, 0], sizes = [16, 16, 128], strides = [1, 1, 1]} : vector<18x18x128xbf16> to vector<16x16x128xbf16>
    %37 = vector.shape_cast %36 : vector<16x16x128xbf16> to vector<256x128xbf16>
    %38 = vector.extract_strided_slice %29 {offsets = [1, 1, 0], sizes = [16, 16, 128], strides = [1, 1, 1]} : vector<18x18x128xbf16> to vector<16x16x128xbf16>
    %39 = vector.shape_cast %38 : vector<16x16x128xbf16> to vector<256x128xbf16>
    %40 = vector.extract_strided_slice %29 {offsets = [1, 2, 0], sizes = [16, 16, 128], strides = [1, 1, 1]} : vector<18x18x128xbf16> to vector<16x16x128xbf16>
    %41 = vector.shape_cast %40 : vector<16x16x128xbf16> to vector<256x128xbf16>
    %42 = vector.extract_strided_slice %29 {offsets = [2, 0, 0], sizes = [16, 16, 128], strides = [1, 1, 1]} : vector<18x18x128xbf16> to vector<16x16x128xbf16>
    %43 = vector.shape_cast %42 : vector<16x16x128xbf16> to vector<256x128xbf16>
    %44 = vector.extract_strided_slice %29 {offsets = [2, 1, 0], sizes = [16, 16, 128], strides = [1, 1, 1]} : vector<18x18x128xbf16> to vector<16x16x128xbf16>
    %45 = vector.shape_cast %44 : vector<16x16x128xbf16> to vector<256x128xbf16>
    %46 = vector.extract_strided_slice %29 {offsets = [2, 2, 0], sizes = [16, 16, 128], strides = [1, 1, 1]} : vector<18x18x128xbf16> to vector<16x16x128xbf16>
    %47 = vector.shape_cast %46 : vector<16x16x128xbf16> to vector<256x128xbf16>
    %48 = tpu.concatenate %31, %33, %35, %37, %39, %41, %43, %45, %47 in 1 : vector<256x128xbf16>, vector<256x128xbf16>, vector<256x128xbf16>, vector<256x128xbf16>, vector<256x128xbf16>, vector<256x128xbf16>, vector<256x128xbf16>, vector<256x128xbf16>, vector<256x128xbf16> -> vector<256x1152xbf16>
    %c0_15 = arith.constant 0 : index
    %c0_16 = arith.constant 0 : index
    %49 = vector.load %arg3[%c0_15, %c0_16] : memref<1152x128xbf16, #tpu.memory_space<vmem>>, vector<1152x128xbf16>
    %cst_17 = arith.constant dense<0.000000e+00> : vector<256x128xf32>
    %50 = tpu.matmul %48, %49, %cst_17 {dimension_numbers = #tpu.dot_dimension_numbers<[1], [0], [0], [1], [0, 0, 1, 1], [], []>} : vector<256x1152xbf16>, vector<1152x128xbf16>, vector<256x128xf32> -> vector<256x128xf32>
    %c0_18 = arith.constant 0 : index
    %c0_19 = arith.constant 0 : index
    %51 = vector.load %arg5[%c0_18, %c0_19] : memref<2x128xf32, #tpu.memory_space<vmem>>, vector<1x128xf32>
    %52 = vector.broadcast %51 : vector<1x128xf32> to vector<256x128xf32>
    %53 = arith.addf %50, %52 : vector<256x128xf32>
    %cst_20 = arith.constant 0.000000e+00 : f32
    %54 = vector.broadcast %cst_20 : f32 to vector<256x128xf32>
    %55 = arith.maximumf %53, %54 : vector<256x128xf32>
    %56 = arith.truncf %55 : vector<256x128xf32> to vector<256x128xbf16>
    %c0_21 = arith.constant 0 : index
    %c0_22 = arith.constant 0 : index
    %57 = vector.load %arg4[%c0_21, %c0_22] : memref<128x128xbf16, #tpu.memory_space<vmem>>, vector<128x128xbf16>
    %cst_23 = arith.constant dense<0.000000e+00> : vector<256x128xf32>
    %58 = tpu.matmul %56, %57, %cst_23 {dimension_numbers = #tpu.dot_dimension_numbers<[1], [0], [0], [1], [0, 0, 1, 1], [], []>} : vector<256x128xbf16>, vector<128x128xbf16>, vector<256x128xf32> -> vector<256x128xf32>
    %c1 = arith.constant 1 : index
    %c0_24 = arith.constant 0 : index
    %59 = vector.load %arg5[%c1, %c0_24] : memref<2x128xf32, #tpu.memory_space<vmem>>, vector<1x128xf32>
    %60 = vector.broadcast %59 : vector<1x128xf32> to vector<256x128xf32>
    %61 = arith.addf %58, %60 : vector<256x128xf32>
    %62 = vector.extract_strided_slice %26 {offsets = [1, 1, 0], sizes = [16, 16, 128], strides = [1, 1, 1]} : vector<18x18x128xf32> to vector<16x16x128xf32>
    %63 = vector.shape_cast %62 : vector<16x16x128xf32> to vector<256x128xf32>
    %64 = arith.addf %63, %61 : vector<256x128xf32>
    %c0_25 = arith.constant 0 : index
    %c0_26 = arith.constant 0 : index
    %c0_27 = arith.constant 0 : index
    %65 = vector.load %arg6[%c0_25, %c0_26, %c0_27] : memref<1x256x128xf32, #tpu.memory_space<vmem>>, vector<1x256x128xf32>
    %66 = vector.shape_cast %65 : vector<1x256x128xf32> to vector<256x128xf32>
    %67 = vector.shape_cast %64 : vector<256x128xf32> to vector<1x256x128xf32>
    tpu.vector_store %arg6[%c0_25, %c0_26, %c0_27], %67 {strides = array<i32>} : memref<1x256x128xf32, #tpu.memory_space<vmem>>, vector<1x256x128xf32>,
    return
  }
  func.func @transform_1(%arg0: i32, %arg1: i32) -> (i32, i32) {
    %c0_i32 = arith.constant 0 : i32
    %c0_i32_0 = arith.constant 0 : i32
    %c0_i32_1 = arith.constant 0 : i32
    return %c0_i32, %c0_i32_0 : i32, i32
  }
  func.func @transform_2(%arg0: i32, %arg1: i32) -> (i32, i32) {
    %c0_i32 = arith.constant 0 : i32
    %c0_i32_0 = arith.constant 0 : i32
    %c0_i32_1 = arith.constant 0 : i32
    return %c0_i32, %c0_i32_0 : i32, i32
  }
  func.func @transform_3(%arg0: i32, %arg1: i32) -> (i32, i32) {
    %c0_i32 = arith.constant 0 : i32
    %c0_i32_0 = arith.constant 0 : i32
    %c0_i32_1 = arith.constant 0 : i32
    return %c0_i32, %c0_i32_0 : i32, i32
  }
  func.func @transform_4(%arg0: i32, %arg1: i32) -> (i32, i32, i32) {
    %c0_i32 = arith.constant 0 : i32
    %c0_i32_0 = arith.constant 0 : i32
    return %arg0, %arg1, %c0_i32 : i32, i32, i32
  }
}

</mosaic_0001>

<bundles_post_ra>
// kernel: resblock_forward.1
= control target key start
LH: loop header
LB: loop body
LE: loop exit
PB: predicated region body
PF: predicated region fallthrough
CT: control target
= control target key end

     0   :  { %s4094_s15 = smov 0   ;;  %s4096_s16 = smov 0   ;;  %s5495_s0 = inlined_call_operand.vmem [shape: f32[2,18,18,128], index: 0, kind: input, shape index: {}]   ;;  %s5496_s1 = inlined_call_operand.vmem [shape: bf16[1152,128], index: 1, kind: input, shape index: {}]   ;;  %s5497_s2 = inlined_call_operand.vmem [shape: bf16[128,128], index: 2, kind: input, shape index: {}]   ;;  %s5498_s3 = inlined_call_operand.vmem [shape: f32[2,128], index: 3, kind: input, shape index: {}]   ;;  %s5499_s4 = inlined_call_operand.vmem [shape: f32[2,256,128], index: 4, kind: output, shape index: {}]  }
   0x1   :  { %s4098_s17 = smov 0  }
   0x2 LB: > { %s26_s18 = sadd.s32 1, %s4063_s16  ;;  %p3400_p0 = scmp.ge.s32.totalorder %s4067_s17, 1  ;;  %s4067_s17 = sphi %s4098_s17, %s14_s17   ;;  %s4063_s16 = sphi %s4096_s16, %s5722_s16   ;;  %s4059_s15 = sphi %s4094_s15, %s5721_s15  }
   0x3   : > { %p28_p1 = scmp.ge.s32.totalorder %s26_s18, 2  ;;  %p142_p2 = scmp.lt.s32.totalorder %s4067_s17, 3 }
   0x5   : > { %s5724_s18 = smov (%p28_p1, %s26_s18), 0  ;;  %p143_p3 = pnand %p3400_p0, %p142_p2 }
   0x7   : > { %146 = sbr.rel (%p143_p3) target bundleno = 1017 (0x3f9), region = 32 }
   0xc   : > { %p166_p4 = scmp.lt.s32.totalorder %s4059_s15, 1  ;;  %s191_s19 = smul.u32 432, %s4059_s15 }
   0xe   : > { %s5726_s15 = smov (!%p166_p4, %s4059_s15), 1  ;;  %s4115_s22 = scalar_lea.vmem %s5495_s0, %s191_s19 }
   0xf   : > { %s3872_s23 = sshll.u32 %s5726_s15, 8  ;;  %v205_v0 = vld [vmem:[%s4115_s22] sm:$0xff]  ;;  %v207_v1 = vld [vmem:[%s4115_s22 + $0x8] sm:$0xff]  ;;  %v209_v2 = vld [vmem:[%s4115_s22 + $0x18] sm:$0xff] }
  0x10   : > { %s4123_s26 = scalar_lea.vmem %s5499_s4, %s3872_s23  ;;  %206 = vst [vmem:[#allocation2 + $0x108] sm:$0xff] %v205_v0  ;;  %v211_v3 = vld [vmem:[%s4115_s22 + $0x20] sm:$0xff]  ;;  %v213_v4 = vld [vmem:[%s4115_s22 + $0x30] sm:$0xff]  ;;  %v215_v5 = vld [vmem:[%s4115_s22 + $0x38] sm:$0xff] }
  0x11   : > { %208 = vst [vmem:[#allocation2 + $0x138] sm:$0xff] %v207_v1  ;;  %v217_v6 = vld [vmem:[%s4115_s22 + $0x48] sm:$0xff]  ;;  %v219_v7 = vld [vmem:[%s4115_s22 + $0x50] sm:$0xff]  ;;  %v221_v8 = vld [vmem:[%s4115_s22 + $0x60] sm:$0xff] }
  0x12   : > { %210 = vst [vmem:[#allocation2 + $0x18] sm:$0xff] %v209_v2  ;;  %v223_v9 = vld [vmem:[%s4115_s22 + $0x68] sm:$0xff]  ;;  %v225_v10 = vld [vmem:[%s4115_s22 + $0x78] sm:$0xff]  ;;  %v227_v11 = vld [vmem:[%s4115_s22 + $0x80] sm:$0xff] }
  0x13   : > { %212 = vst [vmem:[#allocation2 + $0x68] sm:$0xff] %v211_v3  ;;  %v229_v12 = vld [vmem:[%s4115_s22 + $0x90] sm:$0xff]  ;;  %v231_v13 = vld [vmem:[%s4115_s22 + $0x98] sm:$0xff]  ;;  %v233_v14 = vld [vmem:[%s4115_s22 + $0xa8] sm:$0xff] }
  0x14   : > { %214 = vst [vmem:[#allocation2 + $0xd0] sm:$0xff] %v213_v4  ;;  %v235_v15 = vld [vmem:[%s4115_s22 + $0xb0] sm:$0xff]  ;;  %v237_v16 = vld [vmem:[%s4115_s22 + $0xc0] sm:$0xff]  ;;  %v239_v17 = vld [vmem:[%s4115_s22 + $0xc8] sm:$0xff] }
  0x15   : > { %216 = vst [vmem:[#allocation2 + $0x28] sm:$0xff] %v215_v5  ;;  %v241_v18 = vld [vmem:[%s4115_s22 + $0xd8] sm:$0xff]  ;;  %v243_v19 = vld [vmem:[%s4115_s22 + $0xe0] sm:$0xff]  ;;  %v245_v20 = vld [vmem:[%s4115_s22 + $0xf0] sm:$0xff] }
  0x16   : > { %218 = vst [vmem:[#allocation2 + $0x60] sm:$0xff] %v217_v6  ;;  %v247_v21 = vld [vmem:[%s4115_s22 + $0xf8] sm:$0xff]  ;;  %v249_v22 = vld [vmem:[%s4115_s22 + $0x108] sm:$0xff]  ;;  %v251_v23 = vld [vmem:[%s4115_s22 + $0x110] sm:$0xff] }
  0x17   : > { %220 = vst [vmem:[#allocation2 + $0x118] sm:$0xff] %v219_v7  ;;  %v253_v24 = vld [vmem:[%s4115_s22 + $0x120] sm:$0xff]  ;;  %v255_v25 = vld [vmem:[%s4115_s22 + $0x128] sm:$0xff]  ;;  %v257_v26 = vld [vmem:[%s4115_s22 + $0x138] sm:$0xff] }
  0x18   : > { %222 = vst [vmem:[#allocation2 + $0x188] sm:$0xff] %v221_v8  ;;  %v259_v27 = vld [vmem:[%s4115_s22 + $0x140] sm:$0xff]  ;;  %v261_v28 = vld [vmem:[%s4115_s22 + $0x150] sm:$0xff]  ;;  %v263_v29 = vld [vmem:[%s4115_s22 + $0x158] sm:$0xff] }
  0x19   : > { %224 = vst [vmem:[#allocation2 + $0x198] sm:$0xff] %v223_v9  ;;  %v265_v30 = vld [vmem:[%s4115_s22 + $0x168] sm:$0xff]  ;;  %v267_v31 = vld [vmem:[%s4115_s22 + $0x170] sm:$0xff]  ;;  %v269_v32 = vld [vmem:[%s4115_s22 + $0x180] sm:$0xff] }
  0x1a   : > { %226 = vst [vmem:[#allocation2 + $0xd8] sm:$0xff] %v225_v10  ;;  %v271_v33 = vld [vmem:[%s4115_s22 + $0x188] sm:$0xff]  ;;  %v273_v34 = vld [vmem:[%s4115_s22 + $0x198] sm:$0xff]  ;;  %v275_v35 = vld [vmem:[%s4115_s22 + $0x1a0] sm:$0xff] }
  0x1b   : > { %228 = vst [vmem:[#allocation2 + $0x1a0] sm:$0xff] %v227_v11  ;;  %v3403_v36 = vld [vmem:[%s4115_s22 + $0x10] sm:$0x3]  ;;  %v3404_v37 = vld [vmem:[%s4115_s22 + $0x28] sm:$0x3] }
  0x1c   : > { %230 = vst [vmem:[#allocation2 + $0x88] sm:$0xff] %v229_v12  ;;  %v3405_v38 = vld [vmem:[%s4115_s22 + $0x40] sm:$0x3]  ;;  %v3406_v39 = vld [vmem:[%s4115_s22 + $0x58] sm:$0x3] }
  0x1d   : > { %232 = vst [vmem:[#allocation2 + $0x180] sm:$0xff] %v231_v13  ;;  %v3407_v40 = vld [vmem:[%s4115_s22 + $0x70] sm:$0x3]  ;;  %v3408_v41 = vld [vmem:[%s4115_s22 + $0x88] sm:$0x3] }
  0x1e   : > { %234 = vst [vmem:[#allocation2 + $0x80] sm:$0xff] %v233_v14  ;;  %v3409_v42 = vld [vmem:[%s4115_s22 + $0xa0] sm:$0x3]  ;;  %v3410_v43 = vld [vmem:[%s4115_s22 + $0xb8] sm:$0x3] }
  0x1f   : > { %236 = vst [vmem:[#allocation2 + $0x140] sm:$0xff] %v235_v15  ;;  %v3411_v44 = vld [vmem:[%s4115_s22 + $0xd0] sm:$0x3]  ;;  %v3412_v45 = vld [vmem:[%s4115_s22 + $0xe8] sm:$0x3] }
  0x20   : > { %238 = vst [vmem:[#allocation2 + $0x130] sm:$0xff] %v237_v16  ;;  %v3413_v46 = vld [vmem:[%s4115_s22 + $0x100] sm:$0x3]  ;;  %v3414_v47 = vld [vmem:[%s4115_s22 + $0x118] sm:$0x3] }
  0x21   : > { %240 = vst [vmem:[#allocation2 + $0x40] sm:$0xff] %v239_v17  ;;  %v3415_v48 = vld [vmem:[%s4115_s22 + $0x130] sm:$0x3]  ;;  %v3416_v49 = vld [vmem:[%s4115_s22 + $0x148] sm:$0x3] }
  0x22   : > { %242 = vst [vmem:[#allocation2 + $0x58] sm:$0xff] %v241_v18  ;;  %v3417_v50 = vld [vmem:[%s4115_s22 + $0x160] sm:$0x3]  ;;  %v3418_v51 = vld [vmem:[%s4115_s22 + $0x178] sm:$0x3] }
  0x23   : > { %244 = vst [vmem:[#allocation2 + $0xb0] sm:$0xff] %v243_v19  ;;  %v3419_v52 = vld [vmem:[%s4115_s22 + $0x190] sm:$0x3]  ;;  %v3420_v53 = vld [vmem:[%s4115_s22 + $0x1a8] sm:$0x3] }
  0x24   : > { %246 = vst [vmem:[#allocation2 + $0x190] sm:$0xff] %v245_v20 }
  0x25   : > { %248 = vst [vmem:[#allocation2 + $0xb8] sm:$0xff] %v247_v21 }
  0x26   : > { %250 = vst [vmem:[#allocation2 + $0xe0] sm:$0xff] %v249_v22 }
  0x27   : > { %252 = vst [vmem:[#allocation2 + $0x158] sm:$0xff] %v251_v23 }
  0x28   : > { %254 = vst [vmem:[#allocation2 + $0xc0] sm:$0xff] %v253_v24 }
  0x29   : > { %256 = vst [vmem:[#allocation2 + $0xf8] sm:$0xff] %v255_v25 }
  0x2a   : > { %258 = vst [vmem:[#allocation2 + $0x38] sm:$0xff] %v257_v26 }
  0x2b   : > { %260 = vst [vmem:[#allocation2] sm:$0xff] %v259_v27 }
  0x2c   : > { %262 = vst [vmem:[#allocation2 + $0xe8] sm:$0xff] %v261_v28 }
  0x2d   : > { %264 = vst [vmem:[#allocation2 + $0x110] sm:$0xff] %v263_v29 }
  0x2e   : > { %266 = vst [vmem:[#allocation2 + $0x1a8] sm:$0xff] %v265_v30 }
  0x2f   : > { %268 = vst [vmem:[#allocation2 + $0x70] sm:$0xff] %v267_v31 }
  0x30   : > { %270 = vst [vmem:[#allocation2 + $0x78] sm:$0xff] %v269_v32 }
  0x31   : > { %272 = vst [vmem:[#allocation2 + $0xf0] sm:$0xff] %v271_v33 }
  0x32   : > { %274 = vst [vmem:[#allocation2 + $0x100] sm:$0xff] %v273_v34 }
  0x33   : > { %276 = vst [vmem:[#allocation2 + $0x178] sm:$0xff] %v275_v35 }
  0x34   : > { %288 = vst [vmem:[#allocation2 + $0x120] sm:$0x3] %v3403_v36 }
  0x35   : > { %290 = vst [vmem:[#allocation2 + $0x160] sm:$0x3] %v3404_v37 }
  0x36   : > { %292 = vst [vmem:[#allocation2 + $0x128] sm:$0x3] %v3405_v38 }
  0x37   : > { %294 = vst [vmem:[#allocation2 + $0x168] sm:$0x3] %v3406_v39 }
  0x38   : > { %296 = vst [vmem:[#allocation2 + $0xa0] sm:$0x3] %v3407_v40 }
  0x39   : > { %298 = vst [vmem:[#allocation2 + $0x48] sm:$0x3] %v3408_v41 }
  0x3a   : > { %300 = vst [vmem:[#allocation2 + $0x170] sm:$0x3] %v3409_v42 }
  0x3b   : > { %302 = vst [vmem:[#allocation2 + $0x20] sm:$0x3] %v3410_v43 }
  0x3c   : > { %304 = vst [vmem:[#allocation2 + $0x8] sm:$0x3] %v3411_v44 }
  0x3d   : > { %306 = vst [vmem:[#allocation2 + $0x90] sm:$0x3] %v3412_v45 }
  0x3e   : > { %308 = vst [vmem:[#allocation2 + $0xa8] sm:$0x3] %v3413_v46 }
  0x3f   : > { %310 = vst [vmem:[#allocation2 + $0x98] sm:$0x3] %v3414_v47 }
  0x40   : > { %312 = vst [vmem:[#allocation2 + $0x50] sm:$0x3] %v3415_v48 }
  0x41   : > { %314 = vst [vmem:[#allocation2 + $0x30] sm:$0x3] %v3416_v49 }
  0x42   : > { %316 = vst [vmem:[#allocation2 + $0xc8] sm:$0x3] %v3417_v50 }
  0x43   : > { %318 = vst [vmem:[#allocation2 + $0x150] sm:$0x3] %v3418_v51 }
  0x44   : > { %320 = vst [vmem:[#allocation2 + $0x10] sm:$0x3] %v3419_v52 }
  0x45   : > { %322 = vst [vmem:[#allocation2 + $0x148] sm:$0x3] %v3420_v53 }
  0x46   : > { %326 = vsyncadd [#allocation3], 5184 }
  0x47   : > { %4055 = dma.done.wait [#allocation3], 5184 }
  0x48   : > { %4056 = vsyncadd [#allocation3], 4294962112  ;;  %v3880_v54 = vld [vmem:[%s5496_s1 + $0x38] sm:$0xff]  ;;  %v3879_v56 = vld [vmem:[%s5496_s1 + $0x30] sm:$0xff]  ;;  %vm644_vm0 = vsmask.f32 3328 }
  0x49   : > { %v3888_v55 = vld [vmem:[%s5496_s1 + $0x78] sm:$0xff]  ;;  %3953 = vmatpush.bf16.msra.mxu2 %v3880_v54  ;;  %v3887_v57 = vld [vmem:[%s5496_s1 + $0x70] sm:$0xff]  ;;  %2056 = vmatpush.bf16.msra.mxu0 %v3880_v54  ;;  %v3878_v58 = vld [vmem:[%s5496_s1 + $0x28] sm:$0xff]  ;;  %vm645_vm1 = vsmask.f32 7440  ;;  %vm1079_vm3 = vcmask 1042432  }
  0x4a   : > { %3961 = vmatpush.bf16.msra.mxu3 %v3888_v55  ;;  %2145 = vmatpush.bf16.msra.mxu1 %v3888_v55  ;;  %v506_v59 = vld [vmem:[#allocation2 + $0x130] sm:$0xff]  ;;  %v507_v60 = vld [vmem:[#allocation2 + $0x40] sm:$0xff]  ;;  %v3886_v61 = vld [vmem:[%s5496_s1 + $0x68] sm:$0xff]  ;;  %vm1080_vm4 = vcmask 1046532   ;;  %vm3108_vm6 = vcmask 1046528  }
  0x4b   : > { %v560_v62 = vmax.f32 %v506_v59, 0.0  ;;  %v561_v63 = vmax.f32 %v507_v60, 0.0  ;;  %v508_v0 = vld [vmem:[#allocation2 + $0x8] sm:$0x3]  ;;  %v483_v3 = vld [vmem:[#allocation2 + $0x138] sm:$0xff]  ;;  %v3877_v9 = vld [vmem:[%s5496_s1 + $0x20] sm:$0xff] }
  0x4c   : > { %v482_v1 = vld [vmem:[#allocation2 + $0x108] sm:$0xff]  ;;  %v562_v2 = vmax.f32 %v508_v0, 0.0  ;;  %v484_v5 = vld [vmem:[#allocation2 + $0x120] sm:$0x3]  ;;  %v537_v8 = vmax.f32 %v483_v3, 0.0  ;;  %v509_v16 = vld [vmem:[#allocation2 + $0x58] sm:$0xff] }
  0x4d   : > { %3954 = vmatpush.bf16.msra.mxu2 %v3879_v56  ;;  %2057 = vmatpush.bf16.msra.mxu0 %v3879_v56  ;;  %v536_v4 = vmax.f32 %v482_v1, 0.0  ;;  %v4194_v6 = vpack.c.bf16 %v560_v62, %v560_v62  ;;  %v4196_v7 = vpack.c.bf16 %v561_v63, %v561_v63  ;;  %v3885_v10 = vld [vmem:[%s5496_s1 + $0x60] sm:$0xff]  ;;  %v538_v12 = vmax.f32 %v484_v5, 0.0  ;;  %v510_v17 = vld [vmem:[#allocation2 + $0xb0] sm:$0xff]  ;;  %v3876_v28 = vld [vmem:[%s5496_s1 + $0x18] sm:$0xff] }
  0x4e   : > { %3962 = vmatpush.bf16.msra.mxu3 %v3887_v57  ;;  %2146 = vmatpush.bf16.msra.mxu1 %v3887_v57  ;;  %v4204_v11 = vpack.c.bf16 %v562_v2, %v562_v2  ;;  %v4213_v21 = vpack.c.bf16 %v537_v8, %v537_v8  ;;  %v563_v26 = vmax.f32 %v509_v16, 0.0  ;;  %v564_v27 = vmax.f32 %v510_v17, 0.0  ;;  %v3884_v29 = vld [vmem:[%s5496_s1 + $0x58] sm:$0xff]  ;;  %vm4229_vm2 = vmor %vm644_vm0, %vm645_vm1  ;;  %v511_v47 = vld [vmem:[#allocation2 + $0x90] sm:$0x3] }
  0x4f   : > { %5564 = vst [vmem:[#allocation7_spill] sm:$0xff] %v4194_v6  ;;  %v840_v13 = vshrl.u32 %v4194_v6, 16  ;;  %v843_v14 = vshll.u32 %v4194_v6, 16  ;;  %v4208_v15 = vpack.c.bf16 %v536_v4, %v536_v4  ;;  %v849_v18 = vshll.u32 %v4196_v7, 16  ;;  %v3875_v48 = vld [vmem:[%s5496_s1 + $0x10] sm:$0xff]  ;;  %v3874_v59 = vld [vmem:[%s5496_s1 + $0x8] sm:$0xff]  ;;  %vm4741_vm5 = vmor %vm1079_vm3, %vm1080_vm4 }
  0x50   : > { %5565 = vst [vmem:[#allocation8_spill] sm:$0xff] %v4196_v7  ;;  %v853_v19 = vshrl.u32 %v4196_v7, 16  ;;  %v859_v20 = vshll.u32 %v4204_v11, 16  ;;  %v4221_v31 = vpack.c.bf16 %v538_v12, %v538_v12  ;;  %v657_v36 = vshll.u32 %v4213_v21, 16  ;;  %v3883_v49 = vld [vmem:[%s5496_s1 + $0x50] sm:$0xff]  ;;  %v3882_v60 = vld [vmem:[%s5496_s1 + $0x48] sm:$0xff] }
  0x51   : > { %5566 = vst [vmem:[#allocation9_spill] sm:$0xff] %v4204_v11  ;;  %3955 = vmatpush.bf16.msra.mxu2 %v3878_v58  ;;  %2058 = vmatpush.bf16.msra.mxu0 %v3878_v58  ;;  %v842_v22 = vrot.slane %v840_v13, 4  ;;  %v845_v23 = vrot.slane %v843_v14, 5  ;;  %v851_v24 = vrot.slane %v849_v18, 5  ;;  %v648_v32 = vshrl.u32 %v4208_v15, 16  ;;  %v485_v5 = vld [vmem:[#allocation2 + $0x18] sm:$0xff] }
  0x52   : > { %3963 = vmatpush.bf16.msra.mxu3 %v3886_v61  ;;  %2147 = vmatpush.bf16.msra.mxu1 %v3886_v61  ;;  %v855_v25 = vrot.slane %v853_v19, 4  ;;  %v651_v33 = vshll.u32 %v4208_v15, 16  ;;  %v861_v35 = vrot.slane %v859_v20, 5  ;;  %v661_v37 = vshrl.u32 %v4213_v21, 16  ;;  %v486_v8 = vld [vmem:[#allocation2 + $0x68] sm:$0xff]  ;;  %v512_v16 = vld [vmem:[#allocation2 + $0x190] sm:$0xff] }
  0x53   : > { %v846_v30 = vor.u32 %v845_v23, %v842_v22  ;;  %v650_v40 = vrot.slane %v648_v32, 4  ;;  %v667_v42 = vshll.u32 %v4221_v31, 16  ;;  %v659_v44 = vrot.slane %v657_v36, 5  ;;  %v513_v32 = vld [vmem:[#allocation2 + $0xb8] sm:$0xff] }
  0x54   : > { %v856_v34 = vor.u32 %v855_v25, %v851_v24  ;;  %v653_v41 = vrot.slane %v651_v33, 5  ;;  %v663_v45 = vrot.slane %v661_v37, 4  ;;  %v4234_v46 = vpack.c.bf16 %v563_v26, %v563_v26  ;;  %v3873_v26 = vld [vmem:[%s5496_s1] sm:$0xff] }
  0x55   : > { %3956 = vmatpush.bf16.msra.mxu2 %v3877_v9  ;;  %2059 = vmatpush.bf16.msra.mxu0 %v3877_v9  ;;  %v847_v39 = vrot.slane %v846_v30, 4  ;;  %v4242_v51 = vpack.c.bf16 %v564_v27, %v564_v27  ;;  %v669_v54 = vrot.slane %v667_v42, 5  ;;  %v1278_v55 = vunpack.c.l.b16 %v4194_v6  ;;  %v487_v9 = vld [vmem:[#allocation2 + $0x160] sm:$0x3]  ;;  %v3904_v42 = vld [vmem:[%s5496_s1 + $0xf8] sm:$0xff]  ;;  %v528_v6 = vld [vmem:[#allocation2 + $0x70] sm:$0xff] }
  0x56   : > { %3964 = vmatpush.bf16.msra.mxu3 %v3885_v10  ;;  %2148 = vmatpush.bf16.msra.mxu1 %v3885_v10  ;;  %v857_v43 = vrot.slane %v856_v34, 4  ;;  %5569 = vst [vmem:[#allocation10_spill] sm:$0xff] %v4234_v46  ;;  %v654_v50 = vor.u32 %v653_v41, %v650_v40  ;;  %v664_v53 = vor.u32 %v663_v45, %v659_v44  ;;  %v565_v58 = vmax.f32 %v511_v47, 0.0  ;;  %v3881_v27 = vld [vmem:[%s5496_s1 + $0x40] sm:$0xff]  ;;  %v3896_v34 = vld [vmem:[%s5496_s1 + $0xb8] sm:$0xff] }
  0x57   : > { %5570 = vst [vmem:[#allocation11_spill] sm:$0xff] %v4242_v51  ;;  %v852_v52 = vsel %vm4229_vm2, %v847_v39, %v851_v24  ;;  %v864_v62 = vshrl.u32 %v4234_v46, 16  ;;  %v867_v63 = vshll.u32 %v4234_v46, 16  ;;  %v873_v0 = vshll.u32 %v4242_v51, 16 }
  0x58   : > { %v862_v56 = vsel %vm4229_vm2, %v857_v43, %v861_v35  ;;  %v655_v57 = vrot.slane %v654_v50, 4  ;;  %v665_v61 = vrot.slane %v664_v53, 4  ;;  %v1279_v1 = vunpack.c.l.b16 %v4196_v7 }
  0x59   : > { %3957 = vmatpush.bf16.msra.mxu2 %v3876_v28  ;;  %2060 = vmatpush.bf16.msra.mxu0 %v3876_v28  ;;  %v1342_v2 = vunpack.c.l.b16 %v852_v52  ;;  %v1262_v3 = vunpack.c.l.b16 %v4208_v15  ;;  %v877_v4 = vshrl.u32 %v4242_v51, 16  ;;  %v4265_v13 = vpack.c.bf16 %v565_v58, %v565_v58 }
  0x5a   : > { %3965 = vmatpush.bf16.msra.mxu3 %v3884_v29  ;;  %2149 = vmatpush.bf16.msra.mxu1 %v3884_v29  ;;  %v660_v10 = vsel %vm4229_vm2, %v655_v57, %v659_v44  ;;  %v670_v12 = vsel %vm4229_vm2, %v665_v61, %v669_v54  ;;  %v866_v14 = vrot.slane %v864_v62, 4  ;;  %v1343_v17 = vunpack.c.l.b16 %v862_v56  ;;  %v3903_v61 = vld [vmem:[%s5496_s1 + $0xf0] sm:$0xff] }
  0x5b   : > { %5571 = vst [vmem:[#allocation12_spill] sm:$0xff] %v4265_v13  ;;  %v869_v18 = vrot.slane %v867_v63, 5  ;;  %v4267_v19 = vrot.slane %v873_v0, 5  ;;  %v879_v20 = vrot.slane %v877_v4, 4  ;;  %v1263_v22 = vunpack.c.l.b16 %v4213_v21 }
  0x5c   : > { %v539_v23 = vmax.f32 %v485_v5, 0.0  ;;  %v540_v24 = vmax.f32 %v486_v8, 0.0  ;;  %v541_v25 = vmax.f32 %v487_v9, 0.0  ;;  %v1326_v28 = vunpack.c.l.b16 %v660_v10 }
  0x5d   : > { %3958 = vmatpush.bf16.msra.mxu2 %v3875_v48  ;;  %2061 = vmatpush.bf16.msra.mxu0 %v3875_v48  ;;  %v1327_v29 = vunpack.c.l.b16 %v670_v12  ;;  %v870_v30 = vor.u32 %v869_v18, %v866_v14  ;;  %v566_v33 = vmax.f32 %v512_v16, 0.0  ;;  %v880_v35 = vor.u32 %v879_v20, %v4267_v19  ;;  %v3911_v14 = vld [vmem:[%s5496_s1 + $0x130] sm:$0xff] }
  0x5e   : > { %3966 = vmatpush.bf16.msra.mxu3 %v3883_v49  ;;  %2150 = vmatpush.bf16.msra.mxu1 %v3883_v49  ;;  %v883_v36 = vshll.u32 %v4265_v13, 16  ;;  %v4281_v37 = vpack.c.bf16 %v539_v23, %v539_v23  ;;  %v4283_v39 = vpack.c.bf16 %v540_v24, %v540_v24  ;;  %v4285_v40 = vpack.c.b16 %v1279_v1, %v1278_v55  ;;  %v3912_v55 = vld [vmem:[%s5496_s1 + $0x138] sm:$0xff]  ;;  %v488_v18 = vld [vmem:[#allocation2 + $0xd0] sm:$0xff]  ;;  %v3894_v23 = vld [vmem:[%s5496_s1 + $0xa8] sm:$0xff] }
  0x5f   : > { %v4287_v41 = vpack.c.b16 %v1343_v17, %v1342_v2  ;;  %v4292_v43 = vpack.c.bf16 %v541_v25, %v541_v25  ;;  %v871_v44 = vrot.slane %v870_v30, 4  ;;  %v567_v48 = vmax.f32 %v513_v32, 0.0  ;;  %v3902_v24 = vld [vmem:[%s5496_s1 + $0xe8] sm:$0xff] }
  0x60   : > { %5572 = vst [vmem:[#allocation13_spill] sm:$0xff] %v4285_v40  ;;  %v672_v45 = vshrl.u32 %v4281_v37, 16  ;;  %v675_v47 = vshll.u32 %v4281_v37, 16  ;;  %v1294_v49 = vpack.c.b16 %v1263_v22, %v1262_v3  ;;  %v681_v50 = vshll.u32 %v4283_v39, 16 }
  0x61   : > { %3959 = vmatpush.bf16.msra.mxu2 %v3874_v59  ;;  %2062 = vmatpush.bf16.msra.mxu0 %v3874_v59  ;;  %5573 = vst [vmem:[#allocation14_spill] sm:$0xff] %v4287_v41  ;;  %v685_v52 = vshrl.u32 %v4283_v39, 16  ;;  %v4298_v53 = vpack.c.bf16 %v566_v33, %v566_v33  ;;  %v1358_v54 = vpack.c.b16 %v1327_v29, %v1326_v28  ;;  %v881_v56 = vrot.slane %v880_v35, 4  ;;  %v514_v59 = vld [vmem:[#allocation2 + $0xa8] sm:$0x3]  ;;  %v515_v35 = vld [vmem:[#allocation2 + $0xe0] sm:$0xff] }
  0x62   : > { %3967 = vmatpush.bf16.msra.mxu3 %v3882_v60  ;;  %2151 = vmatpush.bf16.msra.mxu1 %v3882_v60  ;;  %v885_v57 = vrot.slane %v883_v36, 5  ;;  %v674_v58 = vrot.slane %v672_v45, 4  ;;  %v3895_v60 = vld [vmem:[%s5496_s1 + $0xb0] sm:$0xff]  ;;  %v677_v62 = vrot.slane %v675_v47, 5  ;;  %v683_v63 = vrot.slane %v681_v50, 5  ;;  %v489_v28 = vld [vmem:[#allocation2 + $0x28] sm:$0xff] }
  0x63   : > { %5574 = vst [vmem:[#allocation15_spill] sm:$0xff] %v4298_v53  ;;  %v687_v0 = vrot.slane %v685_v52, 4  ;;  %v691_v1 = vshll.u32 %v4292_v43, 16  ;;  %v876_v2 = vsel %vm4229_vm2, %v871_v44, %v4267_v19  ;;  %v4315_v3 = vpack.c.bf16 %v567_v48, %v567_v48  ;;  %v490_v29 = vld [vmem:[#allocation2 + $0x128] sm:$0x3]  ;;  %v516_v48 = vld [vmem:[#allocation2 + $0x158] sm:$0xff] }
  0x64   : > { %v678_v4 = vor.u32 %v677_v62, %v674_v58  ;;  %v568_v8 = vmax.f32 %v514_v59, 0.0  ;;  %v888_v9 = vshrl.u32 %v4298_v53, 16  ;;  %v886_v10 = vsel %vm4229_vm2, %v881_v56, %v885_v57  ;;  %v3910_v47 = vld [vmem:[%s5496_s1 + $0x128] sm:$0xff] }
  0x65   : > { %3960 = vmatpush.bf16.msra.mxu2 %v3873_v26  ;;  %2063 = vmatpush.bf16.msra.mxu0 %v3873_v26  ;;  %5575 = vst [vmem:[#allocation16_spill] sm:$0xff] %v4315_v3  ;;  %v688_v5 = vor.u32 %v687_v0, %v683_v63  ;;  %v693_v12 = vrot.slane %v691_v1, 5  ;;  %v891_v16 = vshll.u32 %v4298_v53, 16  ;;  %v897_v17 = vshll.u32 %v4315_v3, 16 }
  0x66   : > { %3968 = vmatpush.bf16.msra.mxu3 %v3881_v27  ;;  %2152 = vmatpush.bf16.msra.mxu1 %v3881_v27  ;;  %v679_v19 = vrot.slane %v678_v4, 4  ;;  %v901_v22 = vshrl.u32 %v4315_v3, 16  ;;  %v1280_v25 = vunpack.c.l.b16 %v4234_v46  ;;  %v1281_v26 = vunpack.c.l.b16 %v4242_v51 }
  0x67   : > { %v689_v20 = vrot.slane %v688_v5, 4  ;;  %v1344_v27 = vunpack.c.l.b16 %v876_v2  ;;  %v1345_v30 = vunpack.c.l.b16 %v886_v10  ;;  %v4334_v32 = vpack.c.bf16 %v568_v8, %v568_v8 }
  0x68   : > { %2104 = vmatmul.bf16.vlgmr.msra.gmra.mxu2 %v4285_v40  ;;  %2064 = vmatmul.bf16.vlgmr.msra.gmra.mxu0 %v1294_v49  ;;  %v890_v33 = vrot.slane %v888_v9, 4  ;;  %v684_v36 = vsel %vm4229_vm2, %v679_v19, %v683_v63  ;;  %v893_v44 = vrot.slane %v891_v16, 5  ;;  %v4340_v45 = vrot.slane %v897_v17, 5 }
  0x69   : > { %2234 = vmatpush.bf16.msrb.mxu2 %v3896_v34  ;;  %2193 = vmatmul.bf16.vlgmr.msra.gmra.mxu3 %v4287_v41  ;;  %5576 = vst [vmem:[#allocation17_spill] sm:$0xff] %v4334_v32  ;;  %v542_v34 = vmax.f32 %v488_v18, 0.0  ;;  %v903_v49 = vrot.slane %v901_v22, 4  ;;  %v543_v50 = vmax.f32 %v489_v28, 0.0  ;;  %v1264_v56 = vunpack.c.l.b16 %v4281_v37 }
  0x6a   : > { %2323 = vmatpush.bf16.msrb.mxu3 %v3904_v42  ;;  %2153 = vmatmul.bf16.vlgmr.msra.gmra.mxu1 %v1358_v54  ;;  %v694_v42 = vsel %vm4229_vm2, %v689_v20, %v693_v12  ;;  %v544_v54 = vmax.f32 %v490_v29, 0.0  ;;  %v1265_v57 = vunpack.c.l.b16 %v4283_v39  ;;  %v569_v58 = vmax.f32 %v515_v35, 0.0  ;;  %v517_v20 = vld [vmem:[#allocation2 + $0x98] sm:$0x3]  ;;  %v491_v35 = vld [vmem:[#allocation2 + $0x60] sm:$0xff] }
  0x6b   : > { %2412 = vmatpush.bf16.msrb.mxu0 %v3912_v55  ;;  %v4345_v52 = vpack.c.bf16 %v542_v34, %v542_v34  ;;  %v4347_v55 = vpack.c.b16 %v1281_v26, %v1280_v25  ;;  %v4351_v59 = vpack.c.b16 %v1345_v30, %v1344_v27  ;;  %v570_v62 = vmax.f32 %v516_v48, 0.0  ;;  %v3893_v34 = vld [vmem:[%s5496_s1 + $0xa0] sm:$0xff] }
  0x6c   : > { %v1329_v63 = vunpack.c.l.b16 %v694_v42  ;;  %v4355_v0 = vpack.c.bf16 %v544_v54, %v544_v54  ;;  %v894_v4 = vor.u32 %v893_v44, %v890_v33  ;;  %v904_v5 = vor.u32 %v903_v49, %v4340_v45  ;;  %v3901_v48 = vld [vmem:[%s5496_s1 + $0xe0] sm:$0xff] }
  0x6d   : > { %2235 = vmatpush.bf16.msrb.mxu2 %v3895_v60  ;;  %5577 = vst [vmem:[#allocation18_spill] sm:$0xff] %v4347_v55  ;;  %v1328_v60 = vunpack.c.l.b16 %v684_v36  ;;  %v696_v1 = vshrl.u32 %v4345_v52, 16  ;;  %v699_v2 = vshll.u32 %v4345_v52, 16  ;;  %v907_v8 = vshll.u32 %v4334_v32, 16 }
  0x6e   : > { %2324 = vmatpush.bf16.msrb.mxu3 %v3903_v61  ;;  %5578 = vst [vmem:[#allocation19_spill] sm:$0xff] %v4351_v59  ;;  %v4353_v61 = vpack.c.bf16 %v543_v50, %v543_v50  ;;  %v4363_v16 = vpack.c.bf16 %v569_v58, %v569_v58  ;;  %v4365_v17 = vpack.c.b16 %v1265_v57, %v1264_v56  ;;  %v715_v25 = vshll.u32 %v4355_v0, 16  ;;  %v3909_v56 = vld [vmem:[%s5496_s1 + $0x120] sm:$0xff] }
  0x6f   : > { %2413 = vmatpush.bf16.msrb.mxu0 %v3911_v14  ;;  %v698_v10 = vrot.slane %v696_v1, 4  ;;  %v701_v12 = vrot.slane %v699_v2, 5  ;;  %v4367_v19 = vpack.c.bf16 %v570_v62, %v570_v62  ;;  %v4369_v22 = vpack.c.b16 %v1329_v63, %v1328_v60  ;;  %v493_v63 = vld [vmem:[#allocation2 + $0x168] sm:$0x3] }
  0x70   : > { %v705_v9 = vshll.u32 %v4353_v61, 16  ;;  %v709_v14 = vshrl.u32 %v4353_v61, 16  ;;  %5579 = vst [vmem:[#allocation20_spill] sm:$0xff] %v4363_v16  ;;  %v895_v26 = vrot.slane %v894_v4, 4  ;;  %v909_v27 = vrot.slane %v907_v8, 5 }
  0x71   : > { %2236 = vmatpush.bf16.msrb.mxu2 %v3894_v23  ;;  %5580 = vst [vmem:[#allocation21_spill] sm:$0xff] %v4367_v19  ;;  %v702_v23 = vor.u32 %v701_v12, %v698_v10  ;;  %v905_v28 = vrot.slane %v904_v5, 4  ;;  %v571_v30 = vmax.f32 %v517_v20, 0.0  ;;  %v912_v33 = vshrl.u32 %v4363_v16, 16 }
  0x72   : > { %2325 = vmatpush.bf16.msrb.mxu3 %v3902_v24  ;;  %v707_v18 = vrot.slane %v705_v9, 5  ;;  %v711_v24 = vrot.slane %v709_v14, 4  ;;  %v915_v42 = vshll.u32 %v4363_v16, 16  ;;  %v921_v44 = vshll.u32 %v4367_v19, 16 }
  0x73   : > { %2414 = vmatpush.bf16.msrb.mxu0 %v3910_v47  ;;  %v703_v36 = vrot.slane %v702_v23, 4  ;;  %v492_v47 = vld [vmem:[#allocation2 + $0x118] sm:$0xff]  ;;  %v717_v50 = vrot.slane %v715_v25, 5  ;;  %v925_v54 = vshrl.u32 %v4367_v19, 16  ;;  %v1282_v57 = vunpack.c.l.b16 %v4298_v53 }
  0x74   : > { %v712_v29 = vor.u32 %v711_v24, %v707_v18  ;;  %v1283_v58 = vunpack.c.l.b16 %v4315_v3  ;;  %v900_v60 = vsel %vm4229_vm2, %v895_v26, %v4340_v45  ;;  %v545_v62 = vmax.f32 %v491_v35, 0.0 }
  0x75   : > { %2237 = vmatpush.bf16.msrb.mxu2 %v3893_v34  ;;  %v910_v1 = vsel %vm4229_vm2, %v905_v28, %v909_v27  ;;  %v4396_v2 = vpack.c.bf16 %v571_v30, %v571_v30  ;;  %v914_v4 = vrot.slane %v912_v33, 4  ;;  %v546_v5 = vmax.f32 %v492_v47, 0.0  ;;  %v518_v33 = vld [vmem:[#allocation2 + $0xc0] sm:$0xff] }
  0x76   : > { %v713_v49 = vrot.slane %v712_v29, 4  ;;  %2326 = vmatpush.bf16.msrb.mxu3 %v3901_v48  ;;  %v708_v8 = vsel %vm4229_vm2, %v703_v36, %v707_v18  ;;  %v917_v9 = vrot.slane %v915_v42, 5  ;;  %v4400_v10 = vrot.slane %v921_v44, 5  ;;  %v519_v44 = vld [vmem:[#allocation2 + $0xf8] sm:$0xff] }
  0x77   : > { %5581 = vst [vmem:[#allocation22_spill] sm:$0xff] %v4396_v2  ;;  %2415 = vmatpush.bf16.msrb.mxu0 %v3909_v56  ;;  %v4402_v12 = vpack.c.bf16 %v545_v62, %v545_v62  ;;  %v927_v14 = vrot.slane %v925_v54, 4  ;;  %v4406_v20 = vpack.c.bf16 %v546_v5, %v546_v5  ;;  %v547_v23 = vmax.f32 %v493_v63, 0.0 }
  0x78   : > { %2109 = vmatmul.bf16.gmra.mxu2 %v4347_v55  ;;  %2069 = vmatmul.bf16.gmra.mxu0 %v4365_v17  ;;  %v718_v45 = vsel %vm4229_vm2, %v713_v49, %v717_v50  ;;  %v1346_v24 = vunpack.c.l.b16 %v900_v60  ;;  %v1266_v25 = vunpack.c.l.b16 %v4345_v52  ;;  %v1267_v26 = vunpack.c.l.b16 %v4353_v61 }
  0x79   : > { %2198 = vmatmul.bf16.gmra.mxu3 %v4351_v59  ;;  %v720_v27 = vshrl.u32 %v4402_v12, 16  ;;  %v1347_v18 = vunpack.c.l.b16 %v910_v1  ;;  %v1330_v28 = vunpack.c.l.b16 %v708_v8  ;;  %v723_v29 = vshll.u32 %v4402_v12, 16 }
  0x7a   : > { %2158 = vmatmul.bf16.gmra.mxu1 %v4369_v22  ;;  %v729_v30 = vshll.u32 %v4406_v20, 16  ;;  %v1331_v34 = vunpack.c.l.b16 %v718_v45  ;;  %v918_v35 = vor.u32 %v917_v9, %v914_v4  ;;  %v931_v36 = vshll.u32 %v4396_v2, 16  ;;  %v494_v4 = vld [vmem:[#allocation2 + $0x188] sm:$0xff] }
  0x7b   : > { %v733_v42 = vshrl.u32 %v4406_v20, 16  ;;  %v928_v47 = vor.u32 %v927_v14, %v4400_v10  ;;  %v4416_v48 = vpack.c.bf16 %v547_v23, %v547_v23  ;;  %v722_v49 = vrot.slane %v720_v27, 4 }
  0x7c   : > { %v725_v50 = vrot.slane %v723_v29, 5  ;;  %v4418_v54 = vrot.slane %v729_v30, 5  ;;  %v572_v60 = vmax.f32 %v518_v33, 0.0  ;;  %v4420_v62 = vpack.c.b16 %v1283_v58, %v1282_v57  ;;  %v520_v57 = vld [vmem:[#allocation2 + $0x50] sm:$0x3] }
  0x7d   : > { %v735_v56 = vrot.slane %v733_v42, 4  ;;  %v4422_v63 = vpack.c.b16 %v1347_v18, %v1346_v24  ;;  %v573_v1 = vmax.f32 %v519_v44, 0.0  ;;  %v4424_v5 = vpack.c.b16 %v1267_v26, %v1266_v25  ;;  %v3892_v25 = vld [vmem:[%s5496_s1 + $0x98] sm:$0xff]  ;;  %v496_v42 = vld [vmem:[#allocation2 + $0xa0] sm:$0x3] }
  0x7e   : > { %5582 = vst [vmem:[#allocation23_spill] sm:$0xff] %v4420_v62  ;;  %v919_v8 = vrot.slane %v918_v35, 4  ;;  %v933_v9 = vrot.slane %v931_v36, 5  ;;  %v4426_v45 = vpack.c.b16 %v1331_v34, %v1330_v28  ;;  %v929_v14 = vrot.slane %v928_v47, 4  ;;  %v495_v26 = vld [vmem:[#allocation2 + $0x198] sm:$0xff]  ;;  %2238 = vmatpush.bf16.msrb.mxu2 %v3892_v25 }
  0x7f   : > { %5583 = vst [vmem:[#allocation24_spill] sm:$0xff] %v4422_v63  ;;  %v726_v23 = vor.u32 %v725_v50, %v722_v49  ;;  %v739_v27 = vshll.u32 %v4416_v48, 16  ;;  %v736_v29 = vor.u32 %v735_v56, %v4418_v54  ;;  %v4430_v30 = vpack.c.bf16 %v572_v60, %v572_v60  ;;  %v3900_v28 = vld [vmem:[%s5496_s1 + $0xd8] sm:$0xff] }
  0x80   : > { %v548_v58 = vmax.f32 %v494_v4, 0.0  ;;  %v4434_v24 = vpack.c.bf16 %v573_v1, %v573_v1  ;;  %v924_v18 = vsel %vm4229_vm2, %v919_v8, %v4400_v10  ;;  %v934_v33 = vsel %vm4229_vm2, %v929_v14, %v933_v9  ;;  %v3908_v44 = vld [vmem:[%s5496_s1 + $0x118] sm:$0xff]  ;;  %2327 = vmatpush.bf16.msrb.mxu3 %v3900_v28 }
  0x81   : > { %5584 = vst [vmem:[#allocation25_spill] sm:$0xff] %v4430_v30  ;;  %v727_v34 = vrot.slane %v726_v23, 4  ;;  %v741_v35 = vrot.slane %v739_v27, 5  ;;  %v574_v36 = vmax.f32 %v520_v57, 0.0  ;;  %v737_v47 = vrot.slane %v736_v29, 4  ;;  %2416 = vmatpush.bf16.msrb.mxu0 %v3908_v44  ;;  %v521_v44 = vld [vmem:[#allocation2 + $0x38] sm:$0xff] }
  0x82   : > { %5585 = vst [vmem:[#allocation26_spill] sm:$0xff] %v4434_v24  ;;  %v936_v10 = vshrl.u32 %v4430_v30, 16  ;;  %v549_v49 = vmax.f32 %v495_v26, 0.0  ;;  %v4453_v50 = vpack.c.bf16 %v548_v58, %v548_v58  ;;  %v1284_v56 = vunpack.c.l.b16 %v4363_v16 }
  0x83   : > { %v939_v60 = vshll.u32 %v4430_v30, 16  ;;  %v945_v1 = vshll.u32 %v4434_v24, 16  ;;  %v949_v4 = vshrl.u32 %v4434_v24, 16  ;;  %v1285_v8 = vunpack.c.l.b16 %v4367_v19 }
  0x84   : > { %v1348_v9 = vunpack.c.l.b16 %v924_v18  ;;  %v4460_v14 = vpack.c.bf16 %v549_v49, %v549_v49  ;;  %v550_v23 = vmax.f32 %v496_v42, 0.0  ;;  %v1349_v27 = vunpack.c.l.b16 %v934_v33 }
  0x85   : > { %v732_v29 = vsel %vm4229_vm2, %v727_v34, %v4418_v54  ;;  %v744_v57 = vshrl.u32 %v4453_v50, 16  ;;  %v747_v58 = vshll.u32 %v4453_v50, 16  ;;  %v742_v25 = vsel %vm4229_vm2, %v737_v47, %v741_v35  ;;  %v522_v54 = vld [vmem:[#allocation2] sm:$0xff] }
  0x86   : > { %v4469_v26 = vpack.c.bf16 %v574_v36, %v574_v36  ;;  %v938_v28 = vrot.slane %v936_v10, 4  ;;  %v753_v18 = vshll.u32 %v4460_v14, 16  ;;  %v941_v49 = vrot.slane %v939_v60, 5 }
  0x87   : > { %v4472_v42 = vrot.slane %v945_v1, 5  ;;  %v951_v33 = vrot.slane %v949_v4, 4  ;;  %v757_v2 = vshrl.u32 %v4460_v14, 16  ;;  %v1268_v34 = vunpack.c.l.b16 %v4402_v12 }
  0x88   : > { %2114 = vmatmul.bf16.gmra.mxu2 %v4420_v62  ;;  %2074 = vmatmul.bf16.gmra.mxu0 %v4424_v5  ;;  %5586 = vst [vmem:[#allocation27_spill] sm:$0xff] %v4469_v26  ;;  %v1269_v16 = vunpack.c.l.b16 %v4406_v20  ;;  %v4477_v62 = vpack.c.bf16 %v550_v23, %v550_v23  ;;  %v1333_v35 = vunpack.c.l.b16 %v742_v25  ;;  %v746_v36 = vrot.slane %v744_v57, 4 }
  0x89   : > { %2203 = vmatmul.bf16.gmra.mxu3 %v4422_v63  ;;  %v1332_v63 = vunpack.c.l.b16 %v732_v29  ;;  %v749_v47 = vrot.slane %v747_v58, 5  ;;  %v575_v10 = vmax.f32 %v521_v44, 0.0  ;;  %v4479_v19 = vpack.c.b16 %v1285_v8, %v1284_v56  ;;  %v497_v29 = vld [vmem:[#allocation2 + $0xd8] sm:$0xff]  ;;  %v498_v58 = vld [vmem:[#allocation2 + $0x1a0] sm:$0xff] }
  0x8a   : > { %2163 = vmatmul.bf16.gmra.mxu1 %v4426_v45  ;;  %v4481_v60 = vrot.slane %v753_v18, 5  ;;  %v759_v1 = vrot.slane %v757_v2, 4  ;;  %v576_v4 = vmax.f32 %v522_v54, 0.0  ;;  %v4483_v32 = vpack.c.b16 %v1349_v27, %v1348_v9  ;;  %v523_v27 = vld [vmem:[#allocation2 + $0x30] sm:$0x3] }
  0x8b   : > { %5587 = vst [vmem:[#allocation28_spill] sm:$0xff] %v4479_v19  ;;  %v942_v53 = vor.u32 %v941_v49, %v938_v28  ;;  %v952_v59 = vor.u32 %v951_v33, %v4472_v42  ;;  %v955_v55 = vshll.u32 %v4469_v26, 16  ;;  %v4487_v23 = vpack.c.b16 %v1269_v16, %v1268_v34 }
  0x8c   : > { %5588 = vst [vmem:[#allocation29_spill] sm:$0xff] %v4483_v32  ;;  %v763_v57 = vshll.u32 %v4477_v62, 16  ;;  %v4490_v25 = vpack.c.b16 %v1333_v35, %v1332_v63  ;;  %v750_v56 = vor.u32 %v749_v47, %v746_v36  ;;  %v4492_v8 = vpack.c.bf16 %v575_v10, %v575_v10  ;;  %v3891_v63 = vld [vmem:[%s5496_s1 + $0x90] sm:$0xff]  ;;  %v499_v36 = vld [vmem:[#allocation2 + $0x48] sm:$0x3] }
  0x8d   : > { %v760_v2 = vor.u32 %v759_v1, %v4481_v60  ;;  %v4495_v9 = vpack.c.bf16 %v576_v4, %v576_v4  ;;  %v551_v28 = vmax.f32 %v497_v29, 0.0  ;;  %v943_v16 = vrot.slane %v942_v53, 4  ;;  %v3899_v35 = vld [vmem:[%s5496_s1 + $0xd0] sm:$0xff]  ;;  %2239 = vmatpush.bf16.msrb.mxu2 %v3891_v63 }
  0x8e   : > { %5589 = vst [vmem:[#allocation30_spill] sm:$0xff] %v4492_v8  ;;  %v953_v18 = vrot.slane %v952_v59, 4  ;;  %v957_v44 = vrot.slane %v955_v55, 5  ;;  %v552_v49 = vmax.f32 %v498_v58, 0.0  ;;  %v1286_v33 = vunpack.c.l.b16 %v4430_v30  ;;  %v3907_v10 = vld [vmem:[%s5496_s1 + $0x110] sm:$0xff]  ;;  %2328 = vmatpush.bf16.msrb.mxu3 %v3899_v35 }
  0x8f   : > { %5590 = vst [vmem:[#allocation31_spill] sm:$0xff] %v4495_v9  ;;  %v765_v54 = vrot.slane %v763_v57, 5  ;;  %v4504_v34 = vpack.c.bf16 %v551_v28, %v551_v28  ;;  %v751_v53 = vrot.slane %v750_v56, 4  ;;  %v577_v55 = vmax.f32 %v523_v27, 0.0  ;;  %2417 = vmatpush.bf16.msrb.mxu0 %v3907_v10 }
  0x90   : > { %v960_v59 = vshrl.u32 %v4492_v8, 16  ;;  %v4511_v47 = vpack.c.bf16 %v552_v49, %v552_v49  ;;  %v761_v1 = vrot.slane %v760_v2, 4  ;;  %v963_v4 = vshll.u32 %v4492_v8, 16 }
  0x91   : > { %v969_v29 = vshll.u32 %v4495_v9, 16  ;;  %v973_v57 = vshrl.u32 %v4495_v9, 16  ;;  %v1287_v58 = vunpack.c.l.b16 %v4434_v24  ;;  %v948_v56 = vsel %vm4229_vm2, %v943_v16, %v4472_v42 }
  0x92   : > { %v958_v27 = vsel %vm4229_vm2, %v953_v18, %v957_v44  ;;  %v553_v28 = vmax.f32 %v499_v36, 0.0  ;;  %v768_v2 = vshrl.u32 %v4504_v34, 16  ;;  %v771_v63 = vshll.u32 %v4504_v34, 16 }
  0x93   : > { %v777_v49 = vshll.u32 %v4511_v47, 16  ;;  %v781_v26 = vshrl.u32 %v4511_v47, 16  ;;  %v1270_v35 = vunpack.c.l.b16 %v4453_v50  ;;  %v756_v30 = vsel %vm4229_vm2, %v751_v53, %v4481_v60  ;;  %v524_v53 = vld [vmem:[#allocation2 + $0xe8] sm:$0xff] }
  0x94   : > { %v4533_v42 = vpack.c.bf16 %v577_v55, %v577_v55  ;;  %v962_v16 = vrot.slane %v960_v59, 4  ;;  %v766_v18 = vsel %vm4229_vm2, %v761_v1, %v765_v54  ;;  %v965_v44 = vrot.slane %v963_v4, 5  ;;  %v525_v55 = vld [vmem:[#allocation2 + $0x110] sm:$0xff] }
  0x95   : > { %v4537_v36 = vrot.slane %v969_v29, 5  ;;  %v975_v10 = vrot.slane %v973_v57, 4  ;;  %v1271_v24 = vunpack.c.l.b16 %v4460_v14  ;;  %v4540_v3 = vpack.c.bf16 %v553_v28, %v553_v28  ;;  %v500_v29 = vld [vmem:[#allocation2 + $0x88] sm:$0xff] }
  0x96   : > { %5591 = vst [vmem:[#allocation32_spill] sm:$0xff] %v4533_v42  ;;  %v770_v13 = vrot.slane %v768_v2, 4  ;;  %v773_v46 = vrot.slane %v771_v63, 5  ;;  %v4542_v41 = vrot.slane %v777_v49, 5  ;;  %v783_v60 = vrot.slane %v781_v26, 4  ;;  %v501_v2 = vld [vmem:[#allocation2 + $0x180] sm:$0xff] }
  0x97   : > { %v1334_v59 = vunpack.c.l.b16 %v756_v30  ;;  %v1335_v40 = vunpack.c.l.b16 %v766_v18  ;;  %v966_v54 = vor.u32 %v965_v44, %v962_v16  ;;  %v976_v1 = vor.u32 %v975_v10, %v4537_v36 }
  0x98   : > { %2119 = vmatmul.bf16.gmra.mxu2 %v4479_v19  ;;  %2079 = vmatmul.bf16.gmra.mxu0 %v4487_v23  ;;  %v1351_v19 = vunpack.c.l.b16 %v958_v27  ;;  %v979_v4 = vshll.u32 %v4533_v42, 16  ;;  %v4546_v57 = vpack.c.b16 %v1287_v58, %v1286_v33  ;;  %v578_v27 = vmax.f32 %v524_v53, 0.0 }
  0x99   : > { %2208 = vmatmul.bf16.gmra.mxu3 %v4483_v32  ;;  %v1350_v32 = vunpack.c.l.b16 %v948_v56  ;;  %v579_v28 = vmax.f32 %v525_v55, 0.0  ;;  %v4550_v63 = vpack.c.b16 %v1271_v24, %v1270_v35  ;;  %v774_v26 = vor.u32 %v773_v46, %v770_v13  ;;  %v526_v46 = vld [vmem:[#allocation2 + $0xc8] sm:$0x3]  ;;  %v502_v55 = vld [vmem:[#allocation2 + $0x170] sm:$0x3] }
  0x9a   : > { %2168 = vmatmul.bf16.gmra.mxu1 %v4490_v25  ;;  %5592 = vst [vmem:[#allocation33_spill] sm:$0xff] %v4546_v57  ;;  %v784_v49 = vor.u32 %v783_v60, %v4542_v41  ;;  %v787_v30 = vshll.u32 %v4540_v3, 16  ;;  %v4554_v16 = vpack.c.b16 %v1335_v40, %v1334_v59  ;;  %v554_v18 = vmax.f32 %v500_v29, 0.0  ;;  %v3890_v13 = vld [vmem:[%s5496_s1 + $0x88] sm:$0xff] }
  0x9b   : > { %v4548_v56 = vpack.c.b16 %v1351_v19, %v1350_v32  ;;  %v967_v44 = vrot.slane %v966_v54, 4  ;;  %v977_v10 = vrot.slane %v976_v1, 4  ;;  %v981_v42 = vrot.slane %v979_v4, 5  ;;  %v3898_v35 = vld [vmem:[%s5496_s1 + $0xc8] sm:$0xff]  ;;  %2240 = vmatpush.bf16.msrb.mxu2 %v3890_v13  ;;  %v3920_v54 = vld [vmem:[%s5496_s1 + $0x178] sm:$0xff] }
  0x9c   : > { %v555_v33 = vmax.f32 %v501_v2, 0.0  ;;  %v4558_v32 = vpack.c.bf16 %v578_v27, %v578_v27  ;;  %v4560_v19 = vpack.c.bf16 %v579_v28, %v579_v28  ;;  %v775_v40 = vrot.slane %v774_v26, 4  ;;  %v3906_v59 = vld [vmem:[%s5496_s1 + $0x108] sm:$0xff]  ;;  %2329 = vmatpush.bf16.msrb.mxu3 %v3898_v35  ;;  %2501 = vmatpush.bf16.msrb.mxu1 %v3920_v54 }
  0x9d   : > { %5593 = vst [vmem:[#allocation34_spill] sm:$0xff] %v4548_v56  ;;  %v785_v24 = vrot.slane %v784_v49, 4  ;;  %v789_v58 = vrot.slane %v787_v30, 5  ;;  %v4570_v60 = vpack.c.bf16 %v554_v18, %v554_v18  ;;  %v1288_v1 = vunpack.c.l.b16 %v4492_v8  ;;  %2418 = vmatpush.bf16.msrb.mxu0 %v3906_v59 }
  0x9e   : > { %5594 = vst [vmem:[#allocation35_spill] sm:$0xff] %v4558_v32  ;;  %v4572_v53 = vpack.c.bf16 %v555_v33, %v555_v33  ;;  %v972_v4 = vsel %vm4229_vm2, %v967_v44, %v4537_v36  ;;  %v982_v29 = vsel %vm4229_vm2, %v977_v10, %v981_v42  ;;  %v580_v27 = vmax.f32 %v526_v46, 0.0 }
  0x9f   : > { %5595 = vst [vmem:[#allocation36_spill] sm:$0xff] %v4560_v19  ;;  %v984_v28 = vshrl.u32 %v4558_v32, 16  ;;  %v987_v2 = vshll.u32 %v4558_v32, 16  ;;  %v993_v26 = vshll.u32 %v4560_v19, 16  ;;  %v997_v49 = vshrl.u32 %v4560_v19, 16 }
  0xa0   : > { %5596 = vst [vmem:[#allocation37_spill] sm:$0xff] %v4570_v60  ;;  %v1289_v30 = vunpack.c.l.b16 %v4495_v9  ;;  %v780_v36 = vsel %vm4229_vm2, %v775_v40, %v4542_v41  ;;  %v790_v42 = vsel %vm4229_vm2, %v785_v24, %v789_v58  ;;  %v556_v18 = vmax.f32 %v502_v55, 0.0 }
  0xa1   : > { %5597 = vst [vmem:[#allocation38_spill] sm:$0xff] %v4572_v53  ;;  %v792_v44 = vshrl.u32 %v4570_v60, 16  ;;  %v795_v10 = vshll.u32 %v4570_v60, 16  ;;  %v801_v33 = vshll.u32 %v4572_v53, 16  ;;  %v805_v46 = vshrl.u32 %v4572_v53, 16 }
  0xa2   : > { %v1352_v13 = vunpack.c.l.b16 %v972_v4  ;;  %v1353_v35 = vunpack.c.l.b16 %v982_v29  ;;  %v1272_v59 = vunpack.c.l.b16 %v4504_v34  ;;  %v4601_v54 = vpack.c.bf16 %v580_v27, %v580_v27  ;;  %v527_v29 = vld [vmem:[#allocation2 + $0x1a8] sm:$0xff] }
  0xa3   : > { %v986_v8 = vrot.slane %v984_v28, 4  ;;  %v989_v41 = vrot.slane %v987_v2, 5  ;;  %v4603_v40 = vrot.slane %v993_v26, 5  ;;  %v999_v24 = vrot.slane %v997_v49, 4 }
  0xa4   : > { %5598 = vst [vmem:[#allocation39_spill] sm:$0xff] %v4601_v54  ;;  %v1273_v58 = vunpack.c.l.b16 %v4511_v47  ;;  %v1336_v55 = vunpack.c.l.b16 %v780_v36  ;;  %v794_v9 = vrot.slane %v792_v44, 4  ;;  %v797_v51 = vrot.slane %v795_v10, 5  ;;  %v503_v36 = vld [vmem:[#allocation2 + $0x80] sm:$0xff] }
  0xa5   : > { %v4608_v11 = vrot.slane %v801_v33, 5  ;;  %v807_v4 = vrot.slane %v805_v46, 4  ;;  %v4610_v27 = vpack.c.b16 %v1289_v30, %v1288_v1  ;;  %v4612_v28 = vpack.c.b16 %v1353_v35, %v1352_v13 }
  0xa6   : > { %v990_v2 = vor.u32 %v989_v41, %v986_v8  ;;  %v1000_v26 = vor.u32 %v999_v24, %v4603_v40  ;;  %v1003_v49 = vshll.u32 %v4601_v54, 16  ;;  %v581_v44 = vmax.f32 %v527_v29, 0.0  ;;  %v3919_v8 = vld [vmem:[%s5496_s1 + $0x170] sm:$0xff]  ;;  %v3897_v24 = vld [vmem:[%s5496_s1 + $0xc0] sm:$0xff]  ;;  %v3918_v29 = vld [vmem:[%s5496_s1 + $0x168] sm:$0xff] }
  0xa7   : > { %5600 = vst [vmem:[#allocation41_spill] sm:$0xff] %v4610_v27  ;;  %v582_v10 = vmax.f32 %v528_v6, 0.0  ;;  %v798_v46 = vor.u32 %v797_v51, %v794_v9  ;;  %v808_v7 = vor.u32 %v807_v4, %v4608_v11  ;;  %v557_v30 = vmax.f32 %v503_v36, 0.0  ;;  %v3889_v51 = vld [vmem:[%s5496_s1 + $0x80] sm:$0xff]  ;;  %v529_v41 = vld [vmem:[#allocation2 + $0x150] sm:$0x3]  ;;  %2502 = vmatpush.bf16.msrb.mxu1 %v3919_v8  ;;  %2330 = vmatpush.bf16.msrb.mxu3 %v3897_v24 }
  0xa8   : > { %2124 = vmatmul.bf16.gmra.mxu2 %v4546_v57  ;;  %2084 = vmatmul.bf16.gmra.mxu0 %v4550_v63  ;;  %v4606_v57 = vpack.c.bf16 %v556_v18, %v556_v18  ;;  %5601 = vst [vmem:[#allocation42_spill] sm:$0xff] %v4612_v28  ;;  %v4616_v18 = vpack.c.b16 %v1273_v58, %v1272_v59  ;;  %v991_v35 = vrot.slane %v990_v2, 4  ;;  %v1001_v59 = vrot.slane %v1000_v26, 4  ;;  %v3905_v2 = vld [vmem:[%s5496_s1 + $0x100] sm:$0xff] }
  0xa9   : > { %2213 = vmatmul.bf16.gmra.mxu3 %v4548_v56  ;;  %v1337_v56 = vunpack.c.l.b16 %v790_v42  ;;  %v504_v42 = vld [vmem:[#allocation2 + $0x140] sm:$0xff]  ;;  %v1005_v6 = vrot.slane %v1003_v49, 5  ;;  %v4631_v9 = vpack.c.bf16 %v581_v44, %v581_v44  ;;  %v799_v58 = vrot.slane %v798_v46, 4  ;;  %2241 = vmatpush.bf16.msrb.mxu2 %v3889_v51 }
  0xaa   : > { %2173 = vmatmul.bf16.gmra.mxu1 %v4554_v16  ;;  %5599 = vst [vmem:[#allocation40_spill] sm:$0xff] %v4606_v57  ;;  %v811_v1 = vshll.u32 %v4606_v57, 16  ;;  %v558_v13 = vmax.f32 %v504_v42, 0.0  ;;  %v1290_v26 = vunpack.c.l.b16 %v4558_v32  ;;  %v4646_v49 = vpack.c.bf16 %v557_v30, %v557_v30  ;;  %v505_v42 = vld [vmem:[#allocation2 + $0x20] sm:$0x3]  ;;  %2419 = vmatpush.bf16.msrb.mxu0 %v3905_v2 }
  0xab   : > { %5602 = vst [vmem:[#allocation43_spill] sm:$0xff] %v4616_v18  ;;  %v4618_v33 = vpack.c.b16 %v1337_v56, %v1336_v55  ;;  %v4633_v56 = vpack.c.bf16 %v582_v10, %v582_v10  ;;  %v809_v55 = vrot.slane %v808_v7, 4  ;;  %v1291_v7 = vunpack.c.l.b16 %v4560_v19  ;;  %2503 = vmatpush.bf16.msrb.mxu1 %v3918_v29  ;;  %v3917_v51 = vld [vmem:[%s5496_s1 + $0x160] sm:$0xff] }
  0xac   : > { %v813_v4 = vrot.slane %v811_v1, 5  ;;  %v4648_v36 = vpack.c.bf16 %v558_v13, %v558_v13  ;;  %v996_v44 = vsel %vm4229_vm2, %v991_v35, %v4603_v40  ;;  %v1006_v10 = vsel %vm4229_vm2, %v1001_v59, %v1005_v6 }
  0xad   : > { %5603 = vst [vmem:[#allocation44_spill] sm:$0xff] %v4618_v33  ;;  %v583_v46 = vmax.f32 %v529_v41, 0.0  ;;  %v1008_v1 = vshrl.u32 %v4631_v9, 16  ;;  %v1011_v8 = vshll.u32 %v4631_v9, 16  ;;  %v1017_v30 = vshll.u32 %v4633_v56, 16 }
  0xae   : > { %v1021_v13 = vshrl.u32 %v4633_v56, 16  ;;  %v1274_v40 = vunpack.c.l.b16 %v4570_v60  ;;  %v804_v35 = vsel %vm4229_vm2, %v799_v58, %v4608_v11  ;;  %v814_v59 = vsel %vm4229_vm2, %v809_v55, %v813_v4  ;;  %v3916_v55 = vld [vmem:[%s5496_s1 + $0x158] sm:$0xff] }
  0xaf   : > { %v559_v6 = vmax.f32 %v505_v42, 0.0  ;;  %v816_v41 = vshrl.u32 %v4646_v49, 16  ;;  %v819_v24 = vshll.u32 %v4646_v49, 16  ;;  %v825_v29 = vshll.u32 %v4648_v36, 16  ;;  %2504 = vmatpush.bf16.msrb.mxu1 %v3917_v51 }
  0xb0   : > { %v829_v2 = vshrl.u32 %v4648_v36, 16  ;;  %v1354_v54 = vunpack.c.l.b16 %v996_v44  ;;  %v1355_v32 = vunpack.c.l.b16 %v1006_v10  ;;  %v1010_v19 = vrot.slane %v1008_v1, 4 }
  0xb1   : > { %v1013_v11 = vrot.slane %v1011_v8, 5  ;;  %v1019_v58 = vrot.slane %v1017_v30, 5  ;;  %v1023_v57 = vrot.slane %v1021_v13, 4  ;;  %v1338_v4 = vunpack.c.l.b16 %v804_v35 }
  0xb2   : > { %v1339_v42 = vunpack.c.l.b16 %v814_v59  ;;  %v4679_v60 = vpack.c.bf16 %v559_v6, %v559_v6  ;;  %v821_v44 = vrot.slane %v819_v24, 5  ;;  %v827_v10 = vrot.slane %v825_v29, 5 }
  0xb3   : > { %v1014_v8 = vor.u32 %v1013_v11, %v1010_v19  ;;  %v1024_v30 = vor.u32 %v1023_v57, %v1019_v58  ;;  %2505 = vmatpush.bf16.msrb.mxu1 %v3916_v55  ;;  %v3928_v57 = vld [vmem:[%s5496_s1 + $0x1b8] sm:$0xff]  ;;  %v3913_v11 = vld [vmem:[%s5496_s1 + $0x140] sm:$0xff]  ;;  %v1292_v55 = vunpack.c.l.b16 %v4631_v9 }
  0xb4   : > { %v4688_v51 = vpack.c.b16 %v1339_v42, %v1338_v4  ;;  %v835_v6 = vshll.u32 %v4679_v60, 16  ;;  %2590 = vmatpush.bf16.msra.mxu2 %v3928_v57  ;;  %v1293_v4 = vunpack.c.l.b16 %v4633_v56 }
  0xb5   : > { %v1025_v19 = vrot.slane %v1024_v30, 4 }
  0xb6   : > { %5607 = vst [vmem:[#allocation48_spill] sm:$0xff] %v4688_v51 }
  0xb8   : > { %2129 = vmatmul.bf16.gmra.mxu2 %v4610_v27  ;;  %2089 = vmatmul.bf16.gmra.mxu0 %v4616_v18  ;;  %v4674_v27 = vpack.c.bf16 %v583_v46, %v583_v46  ;;  %v831_v18 = vrot.slane %v829_v2, 4  ;;  %v4683_v46 = vpack.c.b16 %v1355_v32, %v1354_v54  ;;  %v1015_v32 = vrot.slane %v1014_v8, 4 }
  0xb9   : > { %2218 = vmatmul.bf16.gmra.mxu3 %v4612_v28  ;;  %v1275_v28 = vunpack.c.l.b16 %v4572_v53  ;;  %v4681_v53 = vpack.c.b16 %v1291_v7, %v1290_v26  ;;  %v3915_v26 = vld [vmem:[%s5496_s1 + $0x150] sm:$0xff]  ;;  %v837_v7 = vrot.slane %v835_v6, 5  ;;  %v1277_v8 = vunpack.c.l.b16 %v4648_v36 }
  0xba   : > { %2178 = vmatmul.bf16.gmra.mxu1 %v4618_v33  ;;  %v818_v33 = vrot.slane %v816_v41, 4  ;;  %5605 = vst [vmem:[#allocation46_spill] sm:$0xff] %v4683_v46  ;;  %v1027_v13 = vshll.u32 %v4674_v27, 16  ;;  %v832_v59 = vor.u32 %v831_v18, %v827_v10  ;;  %v1020_v41 = vsel %vm4229_vm2, %v1015_v32, %v1019_v58 }
  0xbb   : > { %5604 = vst [vmem:[#allocation45_spill] sm:$0xff] %v4681_v53  ;;  %v4685_v1 = vpack.c.b16 %v1275_v28, %v1274_v40  ;;  %2506 = vmatpush.bf16.msrb.mxu1 %v3915_v26  ;;  %v3936_v28 = vld [vmem:[%s5496_s1 + $0x1f8] sm:$0xff]  ;;  %v3914_v40 = vld [vmem:[%s5496_s1 + $0x148] sm:$0xff]  ;;  %v1356_v42 = vunpack.c.l.b16 %v1020_v41  ;;  %v1084_v26 = vrot.slane %v4213_v21, 5  ;;  %v1091_v32 = vrot.slane %v4283_v39, 5 }
  0xbc   : > { %v822_v35 = vor.u32 %v821_v44, %v818_v33  ;;  %v1029_v54 = vrot.slane %v1027_v13, 5  ;;  %v833_v33 = vrot.slane %v832_v59, 4  ;;  %2679 = vmatpush.bf16.msra.mxu3 %v3936_v28  ;;  %v1276_v44 = vunpack.c.l.b16 %v4646_v49 }
  0xbd   : > { %5606 = vst [vmem:[#allocation47_spill] sm:$0xff] %v4685_v1  ;;  %v1087_v28 = vrot.slane %v4221_v31, 5  ;;  %v1093_v39 = vrot.slane %v1091_v32, 4 }
  0xbe   : > { %v823_v18 = vrot.slane %v822_v35, 4  ;;  %v1030_v24 = vsel %vm4229_vm2, %v1025_v19, %v1029_v54  ;;  %v838_v2 = vsel %vm4229_vm2, %v833_v33, %v837_v7  ;;  %v4725_v35 = vpack.c.b16 %v1293_v4, %v1292_v55 }
  0xbf   : > { %2507 = vmatpush.bf16.msrb.mxu1 %v3914_v40  ;;  %v1357_v58 = vunpack.c.l.b16 %v1030_v24  ;;  %v1341_v13 = vunpack.c.l.b16 %v838_v2  ;;  %v4729_v6 = vpack.c.b16 %v1277_v8, %v1276_v44  ;;  %v3530_v19 = vrot.slane %v4208_v15, 9  ;;  %v3927_v44 = vld [vmem:[%s5496_s1 + $0x1b0] sm:$0xff] }
  0xc0   : > { %v828_v29 = vsel %vm4229_vm2, %v823_v18, %v827_v10  ;;  %v3944_v10 = vld [vmem:[%s5496_s1 + $0x238] sm:$0xff]  ;;  %v1086_v54 = vrot.slane %v1084_v26, 4  ;;  %v3531_v18 = vrot.slane %v4281_v37, 9  ;;  %v1094_v33 = vrot.slane %v4292_v43, 5  ;;  %v4758_v43 = vld [vmem:[%s5498_s3] ss:$0 sm:$0xff]  ;;  %2591 = vmatpush.bf16.msra.mxu2 %v3927_v44 }
  0xc1   : > { %v1340_v30 = vunpack.c.l.b16 %v828_v29  ;;  %2768 = vmatpush.bf16.msra.mxu0 %v3944_v10  ;;  %v4727_v59 = vpack.c.b16 %v1357_v58, %v1356_v42  ;;  %5608 = vst [vmem:[#allocation49_spill] sm:$0xff] %v4729_v6  ;;  %v1085_v7 = vsel %vm4741_vm5, %v3530_v19, %v1084_v26  ;;  %v1098_v58 = vrot.slane %v4353_v61, 5  ;;  %v3935_v10 = vld [vmem:[%s5496_s1 + $0x1f0] sm:$0xff] }
  0xc2   : > { %v1088_v15 = vsel %vm4741_vm5, %v1086_v54, %v1087_v28  ;;  %v1092_v31 = vsel %vm4741_vm5, %v3531_v18, %v1091_v32  ;;  %v1095_v40 = vsel %vm4741_vm5, %v1093_v39, %v1094_v33  ;;  %v1390_v41 = vunpack.c.l.b16 %v1085_v7  ;;  %2680 = vmatpush.bf16.msra.mxu3 %v3935_v10 }
  0xc3   : > { %2508 = vmatpush.bf16.msrb.mxu1 %v3913_v11  ;;  %v4732_v57 = vpack.c.b16 %v1341_v13, %v1340_v30  ;;  %v1391_v24 = vunpack.c.l.b16 %v1088_v15  ;;  %v1392_v29 = vunpack.c.l.b16 %v1092_v31  ;;  %v1393_v2 = vunpack.c.l.b16 %v1095_v40 }
  0xc4   : > { %v3532_v61 = vrot.slane %v4345_v52, 9  ;;  %v1100_v26 = vrot.slane %v1098_v58, 4  ;;  %v3943_v52 = vld [vmem:[%s5496_s1 + $0x230] sm:$0xff]  ;;  %v3533_v44 = vrot.slane %v4402_v12, 9 }
  0xc5   : > { %5609 = vst [vmem:[#allocation50_spill] sm:$0xff] %v4732_v57  ;;  %v1422_v37 = vpack.c.b16 %v1391_v24, %v1390_v41  ;;  %v1423_v55 = vpack.c.b16 %v1393_v2, %v1392_v29  ;;  %2769 = vmatpush.bf16.msra.mxu0 %v3943_v52 }
  0xc6   : > { %v1099_v18 = vsel %vm4741_vm5, %v3532_v61, %v1098_v58 }
  0xc8   : > { %2134 = vmatmul.bf16.gmra.mxu2 %v4681_v53  ;;  %2094 = vmatmul.bf16.gmra.mxu0 %v4685_v1 }
  0xc9   : > { %2223 = vmatmul.bf16.gmra.mxu3 %v4683_v46 }
  0xca   : > { %2183 = vmatmul.bf16.gmra.mxu1 %v4688_v51 }
  0xd8   : > { %2139 = vmatmul.bf16.gmra.mxu2 %v4725_v35  ;;  %2099 = vmatmul.bf16.gmra.mxu0 %v4729_v6 }
  0xd9   : > { %2228 = vmatmul.bf16.gmra.mxu3 %v4727_v59 }
  0xda   : > { %2188 = vmatmul.bf16.gmra.mxu1 %v4732_v57 }
  0xe5   : > { %v2065_v11 = vpop.f32.mrf.mxu0 }
  0xe6   : > { %v2066_v4 = vadd.f32 %v4758_v43, %v2065_v11  ;;  %v1105_v11 = vrot.slane %v4406_v20, 5 }
  0xe7   : > { %v2154_v42 = vpop.f32.mrf.mxu1 }
  0xe8   : > { %2242 = vmatmul.bf16.vlgmr.msrb.gmra.mxu2 %v1422_v37  ;;  %v4766_v8 = vadd.f32 %v2154_v42, %v2066_v4  ;;  %2420 = vmatmul.bf16.vlgmr.msrb.gmra.mxu0 %v4369_v22  ;;  %v1107_v10 = vrot.slane %v1105_v11, 4 }
  0xe9   : > { %2331 = vmatmul.bf16.vlgmr.msrb.gmra.mxu3 %v4365_v17  ;;  %v1101_v17 = vrot.slane %v4355_v0, 5  ;;  %v1394_v0 = vunpack.c.l.b16 %v1099_v18 }
  0xea   : > { %2509 = vmatmul.bf16.vlgmr.msrb.gmra.mxu1 %v1423_v55 }
  0xeb   : > { %v2105_v30 = vpop.f32.mrf.mxu2  ;;  %v1102_v39 = vsel %vm4741_vm5, %v1100_v26, %v1101_v17  ;;  %v1106_v17 = vsel %vm4741_vm5, %v3533_v44, %v1105_v11  ;;  %v3534_v11 = vrot.slane %v4453_v50, 9 }
  0xec   : > { %v2194_v13 = vpop.f32.mrf.mxu3  ;;  %v2106_v32 = vadd.f32 %v4758_v43, %v2105_v30  ;;  %v1395_v7 = vunpack.c.l.b16 %v1102_v39  ;;  %v1108_v30 = vrot.slane %v4416_v48, 5  ;;  %v1396_v12 = vunpack.c.l.b16 %v1106_v17 }
  0xed   : > { %v2067_v54 = vpop.f32.mrf.mxu0 }
  0xee   : > { %v4775_v19 = vadd.f32 %v2194_v13, %v2106_v32  ;;  %v2068_v22 = vadd.f32 %v4758_v43, %v2067_v54  ;;  %v4790_v29 = vpack.c.b16 %v1395_v7, %v1394_v0  ;;  %v1109_v32 = vsel %vm4741_vm5, %v1107_v10, %v1108_v30 }
  0xef   : > { %v2156_v28 = vpop.f32.mrf.mxu1 }
  0xf0   : > { %v4782_v33 = vadd.f32 %v2156_v28, %v2068_v22  ;;  %v1397_v22 = vunpack.c.l.b16 %v1109_v32 }
  0xf2   : > { %v4814_v0 = vpack.c.b16 %v1397_v22, %v1396_v12 }
  0xf3   : > { %v2107_v15 = vpop.f32.mrf.mxu2 }
  0xf4   : > { %v2196_v31 = vpop.f32.mrf.mxu3  ;;  %v2108_v40 = vadd.f32 %v4758_v43, %v2107_v15 }
  0xf5   : > { %v2070_v24 = vpop.f32.mrf.mxu0 }
  0xf6   : > { %v4788_v41 = vadd.f32 %v2196_v31, %v2108_v40  ;;  %v2071_v2 = vadd.f32 %v4758_v43, %v2070_v24  ;;  %v1112_v31 = vrot.slane %v4460_v14, 5  ;;  %v3926_v40 = vld [vmem:[%s5496_s1 + $0x1a8] sm:$0xff] }
  0xf7   : > { %v2159_v37 = vpop.f32.mrf.mxu1  ;;  %2592 = vmatpush.bf16.msra.mxu2 %v3926_v40 }
  0xf8   : > { %2247 = vmatmul.bf16.gmra.mxu2 %v1423_v55  ;;  %v4795_v4 = vadd.f32 %v2159_v37, %v2071_v2  ;;  %2425 = vmatmul.bf16.gmra.mxu0 %v4426_v45  ;;  %v3934_v2 = vld [vmem:[%s5496_s1 + $0x1e8] sm:$0xff] }
  0xf9   : > { %2336 = vmatmul.bf16.gmra.mxu3 %v4424_v5 }
  0xfa   : > { %2514 = vmatmul.bf16.gmra.mxu1 %v4790_v29  ;;  %2681 = vmatpush.bf16.msra.mxu3 %v3934_v2 }
  0xfb   : > { %v2110_v42 = vpop.f32.mrf.mxu2 }
  0xfc   : > { %v2199_v58 = vpop.f32.mrf.mxu3  ;;  %v2111_v13 = vadd.f32 %v4758_v43, %v2110_v42  ;;  %v1114_v42 = vrot.slane %v1112_v31, 4 }
  0xfd   : > { %v2072_v20 = vpop.f32.mrf.mxu0 }
  0xfe   : > { %v4802_v61 = vadd.f32 %v2199_v58, %v2111_v13  ;;  %v2073_v55 = vadd.f32 %v4758_v43, %v2072_v20  ;;  %v1115_v58 = vrot.slane %v4477_v62, 5  ;;  %v3942_v62 = vld [vmem:[%s5496_s1 + $0x228] sm:$0xff] }
  0xff   : > { %v2161_v26 = vpop.f32.mrf.mxu1  ;;  %2770 = vmatpush.bf16.msra.mxu0 %v3942_v62 }
 0x100   : > { %v4809_v54 = vadd.f32 %v2161_v26, %v2073_v55  ;;  %v1113_v55 = vsel %vm4741_vm5, %v3534_v11, %v1112_v31  ;;  %v1116_v26 = vsel %vm4741_vm5, %v1114_v42, %v1115_v58  ;;  %v1119_v31 = vrot.slane %v4511_v47, 5 }
 0x101   : > { %v1398_v50 = vunpack.c.l.b16 %v1113_v55  ;;  %v1399_v32 = vunpack.c.l.b16 %v1116_v26  ;;  %v1122_v42 = vrot.slane %v4540_v3, 5 }
 0x102   : > { %v1121_v11 = vrot.slane %v1119_v31, 4 }
 0x103   : > { %v2112_v28 = vpop.f32.mrf.mxu2 }
 0x104   : > { %v2201_v48 = vpop.f32.mrf.mxu3  ;;  %v2113_v18 = vadd.f32 %v4758_v43, %v2112_v28  ;;  %v1123_v55 = vsel %vm4741_vm5, %v1121_v11, %v1122_v42  ;;  %v5617_v11 = vld [vmem:[#allocation44_spill] sm:$0xff]  ;;  %v3933_v42 = vld [vmem:[%s5496_s1 + $0x1e0] sm:$0xff] }
 0x105   : > { %v2075_v52 = vpop.f32.mrf.mxu0  ;;  %v1401_v62 = vunpack.c.l.b16 %v1123_v55  ;;  %v5619_v55 = vld [vmem:[#allocation40_spill] sm:$0xff]  ;;  %2682 = vmatpush.bf16.msra.mxu3 %v3933_v42 }
 0x106   : > { %v4812_v39 = vadd.f32 %v2201_v48, %v2113_v18  ;;  %v2076_v7 = vadd.f32 %v4758_v43, %v2075_v52  ;;  %v4848_v52 = vpack.c.b16 %v1399_v32, %v1398_v50 }
 0x107   : > { %v2164_v15 = vpop.f32.mrf.mxu1 }
 0x108   : > { %2252 = vmatmul.bf16.gmra.mxu2 %v4790_v29  ;;  %v4823_v24 = vadd.f32 %v2164_v15, %v2076_v7  ;;  %2430 = vmatmul.bf16.gmra.mxu0 %v4490_v25 }
 0x109   : > { %2341 = vmatmul.bf16.gmra.mxu3 %v4487_v23 }
 0x10a   : > { %2519 = vmatmul.bf16.gmra.mxu1 %v4814_v0 }
 0x10b   : > { %v2115_v14 = vpop.f32.mrf.mxu2 }
 0x10c   : > { %v2204_v37 = vpop.f32.mrf.mxu3  ;;  %v2116_v44 = vadd.f32 %v4758_v43, %v2115_v14 }
 0x10d   : > { %v2077_v30 = vpop.f32.mrf.mxu0 }
 0x10e   : > { %v4833_v10 = vadd.f32 %v2204_v37, %v2116_v44  ;;  %v2078_v13 = vadd.f32 %v4758_v43, %v2077_v30  ;;  %v3535_v37 = vrot.slane %v4504_v34, 9 }
 0x10f   : > { %v2166_v20 = vpop.f32.mrf.mxu1 }
 0x110   : > { %v4840_v17 = vadd.f32 %v2166_v20, %v2078_v13  ;;  %v1120_v20 = vsel %vm4741_vm5, %v3535_v37, %v1119_v31 }
 0x111   : > { %v1400_v34 = vunpack.c.l.b16 %v1120_v20 }
 0x113   : > { %v2117_v12 = vpop.f32.mrf.mxu2 }
 0x114   : > { %v2206_v22 = vpop.f32.mrf.mxu3  ;;  %v2118_v28 = vadd.f32 %v4758_v43, %v2117_v12 }
 0x115   : > { %v2080_v18 = vpop.f32.mrf.mxu0 }
 0x116   : > { %v4846_v48 = vadd.f32 %v2206_v22, %v2118_v28  ;;  %v2081_v7 = vadd.f32 %v4758_v43, %v2080_v18  ;;  %v4873_v28 = vpack.c.b16 %v1401_v62, %v1400_v34  ;;  %v1129_v34 = vrot.slane %v5619_v55, 5 }
 0x117   : > { %v2169_v15 = vpop.f32.mrf.mxu1 }
 0x118   : > { %2257 = vmatmul.bf16.gmra.mxu2 %v4814_v0  ;;  %v4854_v40 = vadd.f32 %v2169_v15, %v2081_v7  ;;  %2435 = vmatmul.bf16.gmra.mxu0 %v4554_v16  ;;  %5614 = vst [vmem:[#allocation53_spill] sm:$0xff] %v4873_v28  ;;  %v5615_v15 = vld [vmem:[#allocation38_spill] sm:$0xff] }
 0x119   : > { %2346 = vmatmul.bf16.gmra.mxu3 %v4550_v63  ;;  %v1126_v31 = vrot.slane %v5615_v15, 5 }
 0x11a   : > { %2524 = vmatmul.bf16.gmra.mxu1 %v4848_v52 }
 0x11b   : > { %v2120_v2 = vpop.f32.mrf.mxu2  ;;  %v1128_v20 = vrot.slane %v1126_v31, 4 }
 0x11c   : > { %v2209_v14 = vpop.f32.mrf.mxu3  ;;  %v2121_v58 = vadd.f32 %v4758_v43, %v2120_v2  ;;  %v5616_v2 = vld [vmem:[#allocation43_spill] sm:$0xff] }
 0x11d   : > { %v2082_v44 = vpop.f32.mrf.mxu0 }
 0x11e   : > { %v4861_v47 = vadd.f32 %v2209_v14, %v2121_v58  ;;  %v2083_v30 = vadd.f32 %v4758_v43, %v2082_v44  ;;  %v3925_v14 = vld [vmem:[%s5496_s1 + $0x1a0] sm:$0xff] }
 0x11f   : > { %v2171_v13 = vpop.f32.mrf.mxu1  ;;  %2593 = vmatpush.bf16.msra.mxu2 %v3925_v14  ;;  %v3941_v14 = vld [vmem:[%s5496_s1 + $0x220] sm:$0xff] }
 0x120   : > { %5612 = vst [vmem:[#allocation51_spill] sm:$0xff] %v4861_v47  ;;  %v4868_v26 = vadd.f32 %v2171_v13, %v2083_v30  ;;  %v5618_v30 = vld [vmem:[#allocation37_spill] sm:$0xff]  ;;  %2771 = vmatpush.bf16.msra.mxu0 %v3941_v14  ;;  %v5640_v47 = vld [vmem:[#allocation16_spill] sm:$0xff] }
 0x121   : > { %v3536_v13 = vrot.slane %v5618_v30, 9 }
 0x123   : > { %v2122_v50 = vpop.f32.mrf.mxu2 }
 0x124   : > { %v2211_v3 = vpop.f32.mrf.mxu3  ;;  %v2123_v32 = vadd.f32 %v4758_v43, %v2122_v50 }
 0x125   : > { %v2085_v22 = vpop.f32.mrf.mxu0 }
 0x126   : > { %v4871_v12 = vadd.f32 %v2211_v3, %v2123_v32  ;;  %v2086_v18 = vadd.f32 %v4758_v43, %v2085_v22 }
 0x127   : > { %v2174_v7 = vpop.f32.mrf.mxu1 }
 0x128   : > { %5613 = vst [vmem:[#allocation52_spill] sm:$0xff] %v4871_v12  ;;  %2262 = vmatmul.bf16.gmra.mxu2 %v4848_v52  ;;  %v4882_v37 = vadd.f32 %v2174_v7, %v2086_v18  ;;  %2440 = vmatmul.bf16.gmra.mxu0 %v5617_v11  ;;  %v1127_v18 = vsel %vm4741_vm5, %v3536_v13, %v1126_v31 }
 0x129   : > { %2351 = vmatmul.bf16.gmra.mxu3 %v5616_v2  ;;  %v1130_v7 = vsel %vm4741_vm5, %v1128_v20, %v1129_v34  ;;  %v1402_v42 = vunpack.c.l.b16 %v1127_v18  ;;  %v1133_v34 = vrot.slane %v4648_v36, 5 }
 0x12a   : > { %2529 = vmatmul.bf16.gmra.mxu1 %v4873_v28 }
 0x12b   : > { %v2125_v58 = vpop.f32.mrf.mxu2  ;;  %v1135_v14 = vrot.slane %v1133_v34, 4 }
 0x12c   : > { %v2214_v44 = vpop.f32.mrf.mxu3  ;;  %v2126_v62 = vadd.f32 %v4758_v43, %v2125_v58  ;;  %v1403_v58 = vunpack.c.l.b16 %v1130_v7  ;;  %v3537_v7 = vrot.slane %v4646_v49, 9 }
 0x12d   : > { %v2087_v3 = vpop.f32.mrf.mxu0 }
 0x12e   : > { %v4892_v50 = vadd.f32 %v2214_v44, %v2126_v62  ;;  %v2088_v32 = vadd.f32 %v4758_v43, %v2087_v3  ;;  %v4907_v31 = vpack.c.b16 %v1403_v58, %v1402_v42  ;;  %v1136_v42 = vrot.slane %v4679_v60, 5 }
 0x12f   : > { %v2176_v22 = vpop.f32.mrf.mxu1 }
 0x130   : > { %5620 = vst [vmem:[#allocation38_spill] sm:$0xff] %v4892_v50  ;;  %v4899_v15 = vadd.f32 %v2176_v22, %v2088_v32 }
 0x131   : > { %5622 = vst [vmem:[#allocation44_spill] sm:$0xff] %v4907_v31 }
 0x133   : > { %v2127_v44 = vpop.f32.mrf.mxu2 }
 0x134   : > { %v2216_v30 = vpop.f32.mrf.mxu3  ;;  %v2128_v55 = vadd.f32 %v4758_v43, %v2127_v44 }
 0x135   : > { %v2090_v3 = vpop.f32.mrf.mxu0 }
 0x136   : > { %v4905_v62 = vadd.f32 %v2216_v30, %v2128_v55  ;;  %v2091_v13 = vadd.f32 %v4758_v43, %v2090_v3  ;;  %v1134_v3 = vsel %vm4741_vm5, %v3537_v7, %v1133_v34  ;;  %v5626_v34 = vld [vmem:[#allocation8_spill] sm:$0xff] }
 0x137   : > { %v2179_v20 = vpop.f32.mrf.mxu1  ;;  %v1404_v49 = vunpack.c.l.b16 %v1134_v3  ;;  %v1140_v7 = vrot.slane %v5626_v34, 5 }
 0x138   : > { %5621 = vst [vmem:[#allocation43_spill] sm:$0xff] %v4905_v62  ;;  %2267 = vmatmul.bf16.gmra.mxu2 %v4873_v28  ;;  %v4913_v32 = vadd.f32 %v2179_v20, %v2091_v13  ;;  %2445 = vmatmul.bf16.gmra.mxu0 %v4688_v51  ;;  %v1137_v13 = vsel %vm4741_vm5, %v1135_v14, %v1136_v42  ;;  %v3924_v14 = vld [vmem:[%s5496_s1 + $0x198] sm:$0xff] }
 0x139   : > { %2356 = vmatmul.bf16.gmra.mxu3 %v4685_v1  ;;  %v1405_v62 = vunpack.c.l.b16 %v1137_v13  ;;  %2594 = vmatpush.bf16.msra.mxu2 %v3924_v14  ;;  %v1142_v13 = vrot.slane %v1140_v7, 4  ;;  %v5653_v28 = vld [vmem:[#allocation26_spill] sm:$0xff] }
 0x13a   : > { %2534 = vmatmul.bf16.gmra.mxu1 %v4907_v31 }
 0x13b   : > { %v2130_v22 = vpop.f32.mrf.mxu2 }
 0x13c   : > { %v2219_v18 = vpop.f32.mrf.mxu3  ;;  %v2131_v58 = vadd.f32 %v4758_v43, %v2130_v22 }
 0x13d   : > { %v2092_v44 = vpop.f32.mrf.mxu0 }
 0x13e   : > { %v4920_v36 = vadd.f32 %v2219_v18, %v2131_v58  ;;  %v2093_v30 = vadd.f32 %v4758_v43, %v2092_v44 }
 0x13f   : > { %v2181_v55 = vpop.f32.mrf.mxu1 }
 0x140   : > { %5623 = vst [vmem:[#allocation37_spill] sm:$0xff] %v4920_v36  ;;  %v4927_v20 = vadd.f32 %v2181_v55, %v2093_v30  ;;  %v4932_v36 = vpack.c.b16 %v1405_v62, %v1404_v49  ;;  %v5627_v55 = vld [vmem:[#allocation7_spill] sm:$0xff]  ;;  %v5628_v49 = vld [vmem:[#allocation9_spill] sm:$0xff] }
 0x141   : > { %v3538_v3 = vrot.slane %v5627_v55, 9 }
 0x142   : > { %5625 = vst [vmem:[#allocation54_spill] sm:$0xff] %v4932_v36 }
 0x143   : > { %v2132_v50 = vpop.f32.mrf.mxu2 }
 0x144   : > { %v2221_v60 = vpop.f32.mrf.mxu3  ;;  %v2133_v22 = vadd.f32 %v4758_v43, %v2132_v50  ;;  %v3932_v50 = vld [vmem:[%s5496_s1 + $0x1d8] sm:$0xff] }
 0x145   : > { %v2095_v58 = vpop.f32.mrf.mxu0  ;;  %2683 = vmatpush.bf16.msra.mxu3 %v3932_v50  ;;  %v3940_v50 = vld [vmem:[%s5496_s1 + $0x218] sm:$0xff] }
 0x146   : > { %v4930_v18 = vadd.f32 %v2221_v60, %v2133_v22  ;;  %v2096_v44 = vadd.f32 %v4758_v43, %v2095_v58  ;;  %v1143_v60 = vrot.slane %v5628_v49, 5  ;;  %2772 = vmatpush.bf16.msra.mxu0 %v3940_v50 }
 0x147   : > { %v2184_v51 = vpop.f32.mrf.mxu1 }
 0x148   : > { %5624 = vst [vmem:[#allocation40_spill] sm:$0xff] %v4930_v18  ;;  %2272 = vmatmul.bf16.gmra.mxu2 %v4907_v31  ;;  %v4941_v42 = vadd.f32 %v2184_v51, %v2096_v44  ;;  %2450 = vmatmul.bf16.gmra.mxu0 %v4732_v57  ;;  %v1141_v18 = vsel %vm4741_vm5, %v3538_v3, %v1140_v7 }
 0x149   : > { %2361 = vmatmul.bf16.gmra.mxu3 %v4729_v6  ;;  %v1144_v14 = vsel %vm4741_vm5, %v1142_v13, %v1143_v60  ;;  %v1406_v55 = vunpack.c.l.b16 %v1141_v18  ;;  %v5632_v60 = vld [vmem:[#allocation11_spill] sm:$0xff] }
 0x14a   : > { %2539 = vmatmul.bf16.gmra.mxu1 %v4932_v36  ;;  %v1407_v6 = vunpack.c.l.b16 %v1144_v14  ;;  %v1147_v18 = vrot.slane %v5632_v60, 5  ;;  %v5634_v14 = vld [vmem:[#allocation14_spill] sm:$0xff] }
 0x14b   : > { %v2135_v62 = vpop.f32.mrf.mxu2 }
 0x14c   : > { %v2224_v30 = vpop.f32.mrf.mxu3  ;;  %v2136_v51 = vadd.f32 %v4758_v43, %v2135_v62  ;;  %v4966_v7 = vpack.c.b16 %v1407_v6, %v1406_v55  ;;  %v1149_v55 = vrot.slane %v1147_v18, 4 }
 0x14d   : > { %v2097_v58 = vpop.f32.mrf.mxu0 }
 0x14e   : > { %v4951_v22 = vadd.f32 %v2224_v30, %v2136_v51  ;;  %v2098_v44 = vadd.f32 %v4758_v43, %v2097_v58  ;;  %5631 = vst [vmem:[#allocation9_spill] sm:$0xff] %v4966_v7 }
 0x14f   : > { %v2186_v34 = vpop.f32.mrf.mxu1 }
 0x150   : > { %5629 = vst [vmem:[#allocation8_spill] sm:$0xff] %v4951_v22  ;;  %v4958_v57 = vadd.f32 %v2186_v34, %v2098_v44  ;;  %v5633_v44 = vld [vmem:[#allocation13_spill] sm:$0xff] }
 0x153   : > { %v2137_v62 = vpop.f32.mrf.mxu2 }
 0x154   : > { %v2226_v30 = vpop.f32.mrf.mxu3  ;;  %v2138_v49 = vadd.f32 %v4758_v43, %v2137_v62 }
 0x155   : > { %v2100_v58 = vpop.f32.mrf.mxu0 }
 0x156   : > { %v4964_v51 = vadd.f32 %v2226_v30, %v2138_v49  ;;  %v2101_v3 = vadd.f32 %v4758_v43, %v2100_v58  ;;  %v5635_v30 = vld [vmem:[#allocation10_spill] sm:$0xff]  ;;  %v5636_v49 = vld [vmem:[#allocation12_spill] sm:$0xff] }
 0x157   : > { %v2189_v13 = vpop.f32.mrf.mxu1  ;;  %v3539_v6 = vrot.slane %v5635_v30, 9  ;;  %v1150_v58 = vrot.slane %v5636_v49, 5 }
 0x158   : > { %5630 = vst [vmem:[#allocation7_spill] sm:$0xff] %v4964_v51  ;;  %2277 = vmatmul.bf16.gmra.mxu2 %v4932_v36  ;;  %v4972_v34 = vadd.f32 %v2189_v13, %v2101_v3  ;;  %2455 = vmatmul.bf16.gmra.mxu0 %v5634_v14  ;;  %v3952_v3 = vld [vmem:[%s5497_s2 + $0x38] sm:$0xff] }
 0x159   : > { %2366 = vmatmul.bf16.gmra.mxu3 %v5633_v44  ;;  %v1148_v44 = vsel %vm4741_vm5, %v3539_v6, %v1147_v18  ;;  %v1151_v30 = vsel %vm4741_vm5, %v1149_v55, %v1150_v58  ;;  %2971 = vmatpush.bf16.msra.mxu1 %v3952_v3  ;;  %v1154_v18 = vrot.slane %v5640_v47, 5  ;;  %v5641_v6 = vld [vmem:[#allocation18_spill] sm:$0xff]  ;;  %v5643_v47 = vld [vmem:[#allocation15_spill] sm:$0xff]  ;;  %v5644_v3 = vld [vmem:[#allocation17_spill] sm:$0xff] }
 0x15a   : > { %2544 = vmatmul.bf16.gmra.mxu1 %v4966_v7  ;;  %v3540_v58 = vrot.slane %v5643_v47, 9 }
 0x15b   : > { %v2140_v50 = vpop.f32.mrf.mxu2 }
 0x15c   : > { %v2229_v62 = vpop.f32.mrf.mxu3  ;;  %v2141_v51 = vadd.f32 %v4758_v43, %v2140_v50  ;;  %v1408_v50 = vunpack.c.l.b16 %v1148_v44  ;;  %v3923_v44 = vld [vmem:[%s5496_s1 + $0x190] sm:$0xff] }
 0x15d   : > { %v2102_v22 = vpop.f32.mrf.mxu0  ;;  %2595 = vmatpush.bf16.msra.mxu2 %v3923_v44  ;;  %v1155_v44 = vsel %vm4741_vm5, %v3540_v58, %v1154_v18 }
 0x15e   : > { %v4979_v60 = vadd.f32 %v2229_v62, %v2141_v51  ;;  %v2103_v13 = vadd.f32 %v4758_v43, %v2102_v22  ;;  %v1409_v51 = vunpack.c.l.b16 %v1151_v30 }
 0x15f   : > { %v2191_v14 = vpop.f32.mrf.mxu1 }
 0x160   : > { %5637 = vst [vmem:[#allocation11_spill] sm:$0xff] %v4979_v60  ;;  %v4989_v49 = vadd.f32 %v2191_v14, %v2103_v13  ;;  %v4994_v22 = vpack.c.b16 %v1409_v51, %v1408_v50  ;;  %v5642_v14 = vld [vmem:[#allocation19_spill] sm:$0xff]  ;;  %v1157_v13 = vrot.slane %v5644_v3, 5  ;;  %v3939_v3 = vld [vmem:[%s5496_s1 + $0x210] sm:$0xff] }
 0x161   : > { %2773 = vmatpush.bf16.msra.mxu0 %v3939_v3 }
 0x162   : > { %5639 = vst [vmem:[#allocation12_spill] sm:$0xff] %v4994_v22 }
 0x163   : > { %v2142_v62 = vpop.f32.mrf.mxu2 }
 0x164   : > { %v2231_v60 = vpop.f32.mrf.mxu3  ;;  %v2143_v36 = vadd.f32 %v4758_v43, %v2142_v62  ;;  %v3931_v43 = vld [vmem:[%s5496_s1 + $0x1d0] sm:$0xff] }
 0x165   : > { %v2421_v1 = vpop.f32.mrf.mxu0  ;;  %2684 = vmatpush.bf16.msra.mxu3 %v3931_v43 }
 0x166   : > { %v4992_v31 = vadd.f32 %v2231_v60, %v2143_v36  ;;  %v1156_v60 = vrot.slane %v1154_v18, 4 }
 0x167   : > { %v2510_v12 = vpop.f32.mrf.mxu1 }
 0x168   : > { %5638 = vst [vmem:[#allocation10_spill] sm:$0xff] %v4992_v31  ;;  %2282 = vmatmul.bf16.gmra.mxu2 %v4966_v7  ;;  %2460 = vmatmul.bf16.gmra.mxu0 %v5642_v14  ;;  %v1158_v31 = vsel %vm4741_vm5, %v1156_v60, %v1157_v13  ;;  %v1410_v7 = vunpack.c.l.b16 %v1155_v44  ;;  %v5646_v60 = vld [vmem:[#allocation21_spill] sm:$0xff]  ;;  %v5650_v44 = vld [vmem:[#allocation20_spill] sm:$0xff] }
 0x169   : > { %2371 = vmatmul.bf16.gmra.mxu3 %v5641_v6  ;;  %v1411_v47 = vunpack.c.l.b16 %v1158_v31  ;;  %v3541_v3 = vrot.slane %v5650_v44, 9 }
 0x16a   : > { %2549 = vmatmul.bf16.gmra.mxu1 %v4994_v22 }
 0x16b   : > { %v2243_v36 = vpop.f32.mrf.mxu2  ;;  %v5020_v18 = vpack.c.b16 %v1411_v47, %v1410_v7  ;;  %v5651_v47 = vld [vmem:[#allocation22_spill] sm:$0xff] }
 0x16c   : > { %v2332_v55 = vpop.f32.mrf.mxu3  ;;  %v2244_v30 = vadd.f32 %v2243_v36, %v4766_v8 }
 0x16d   : > { %v2423_v51 = vpop.f32.mrf.mxu0 }
 0x16e   : > { %v2333_v50 = vadd.f32 %v2332_v55, %v2244_v30 }
 0x16f   : > { %v2512_v62 = vpop.f32.mrf.mxu1 }
 0x170   : > { %v2422_v14 = vadd.f32 %v2421_v1, %v2333_v50  ;;  %v1161_v1 = vrot.slane %v5646_v60, 5 }
 0x172   : > { %v5014_v6 = vadd.f32 %v2510_v12, %v2422_v14  ;;  %v5647_v12 = vld [vmem:[#allocation23_spill] sm:$0xff]  ;;  %v5648_v14 = vld [vmem:[#allocation24_spill] sm:$0xff]  ;;  %v1163_v7 = vrot.slane %v1161_v1, 4 }
 0x173   : > { %v2245_v8 = vpop.f32.mrf.mxu2 }
 0x174   : > { %5645 = vst [vmem:[#allocation16_spill] sm:$0xff] %v5014_v6  ;;  %v2334_v43 = vpop.f32.mrf.mxu3  ;;  %v2246_v36 = vadd.f32 %v2245_v8, %v4782_v33  ;;  %v1164_v8 = vrot.slane %v5651_v47, 5 }
 0x175   : > { %v2426_v30 = vpop.f32.mrf.mxu0 }
 0x176   : > { %v2335_v55 = vadd.f32 %v2334_v43, %v2246_v36 }
 0x177   : > { %v2515_v58 = vpop.f32.mrf.mxu1 }
 0x178   : > { %2287 = vmatmul.bf16.gmra.mxu2 %v4994_v22  ;;  %v2424_v31 = vadd.f32 %v2423_v51, %v2335_v55  ;;  %2465 = vmatmul.bf16.gmra.mxu0 %v5648_v14  ;;  %v3951_v51 = vld [vmem:[%s5497_s2 + $0x30] sm:$0xff] }
 0x179   : > { %2376 = vmatmul.bf16.gmra.mxu3 %v5647_v12  ;;  %2972 = vmatpush.bf16.msra.mxu1 %v3951_v51  ;;  %v5658_v51 = vld [vmem:[#allocation27_spill] sm:$0xff] }
 0x17a   : > { %v5026_v13 = vadd.f32 %v2512_v62, %v2424_v31  ;;  %2554 = vmatmul.bf16.gmra.mxu1 %v5020_v18  ;;  %v1162_v62 = vsel %vm4741_vm5, %v3541_v3, %v1161_v1  ;;  %v1165_v31 = vsel %vm4741_vm5, %v1163_v7, %v1164_v8  ;;  %v1168_v1 = vrot.slane %v5653_v28, 5  ;;  %v5654_v3 = vld [vmem:[#allocation28_spill] sm:$0xff]  ;;  %v5657_v8 = vld [vmem:[#allocation25_spill] sm:$0xff] }
 0x17b   : > { %v2248_v33 = vpop.f32.mrf.mxu2  ;;  %v1412_v47 = vunpack.c.l.b16 %v1162_v62  ;;  %v1413_v6 = vunpack.c.l.b16 %v1165_v31  ;;  %v1171_v62 = vrot.slane %v5658_v51, 5  ;;  %v3938_v51 = vld [vmem:[%s5496_s1 + $0x208] sm:$0xff] }
 0x17c   : > { %5649 = vst [vmem:[#allocation15_spill] sm:$0xff] %v5026_v13  ;;  %v2337_v50 = vpop.f32.mrf.mxu3  ;;  %v2249_v43 = vadd.f32 %v2248_v33, %v4795_v4  ;;  %2774 = vmatpush.bf16.msra.mxu0 %v3938_v51 }
 0x17d   : > { %v2428_v60 = vpop.f32.mrf.mxu0  ;;  %v5042_v12 = vpack.c.b16 %v1413_v6, %v1412_v47 }
 0x17e   : > { %v2338_v36 = vadd.f32 %v2337_v50, %v2249_v43 }
 0x17f   : > { %v2517_v55 = vpop.f32.mrf.mxu1 }
 0x180   : > { %v2427_v13 = vadd.f32 %v2426_v30, %v2338_v36  ;;  %v3542_v36 = vrot.slane %v5657_v8, 9 }
 0x182   : > { %v5039_v44 = vadd.f32 %v2515_v58, %v2427_v13  ;;  %v3922_v58 = vld [vmem:[%s5496_s1 + $0x188] sm:$0xff]  ;;  %v5655_v13 = vld [vmem:[#allocation29_spill] sm:$0xff] }
 0x183   : > { %v2250_v4 = vpop.f32.mrf.mxu2  ;;  %2596 = vmatpush.bf16.msra.mxu2 %v3922_v58 }
 0x184   : > { %5652 = vst [vmem:[#allocation17_spill] sm:$0xff] %v5039_v44  ;;  %v2339_v33 = vpop.f32.mrf.mxu3  ;;  %v2251_v50 = vadd.f32 %v2250_v4, %v4809_v54  ;;  %v3930_v54 = vld [vmem:[%s5496_s1 + $0x1c8] sm:$0xff] }
 0x185   : > { %v2431_v14 = vpop.f32.mrf.mxu0  ;;  %2685 = vmatpush.bf16.msra.mxu3 %v3930_v54  ;;  %v5668_v44 = vld [vmem:[#allocation36_spill] sm:$0xff] }
 0x186   : > { %v2340_v43 = vadd.f32 %v2339_v33, %v2251_v50  ;;  %v1169_v33 = vsel %vm4741_vm5, %v3542_v36, %v1168_v1 }
 0x187   : > { %v2520_v22 = vpop.f32.mrf.mxu1  ;;  %v1414_v58 = vunpack.c.l.b16 %v1169_v33 }
 0x188   : > { %2292 = vmatmul.bf16.gmra.mxu2 %v5020_v18  ;;  %v2429_v30 = vadd.f32 %v2428_v60, %v2340_v43  ;;  %2470 = vmatmul.bf16.gmra.mxu0 %v5655_v13  ;;  %v1170_v60 = vrot.slane %v1168_v1, 4 }
 0x189   : > { %2381 = vmatmul.bf16.gmra.mxu3 %v5654_v3 }
 0x18a   : > { %v5051_v7 = vadd.f32 %v2517_v55, %v2429_v30  ;;  %2559 = vmatmul.bf16.gmra.mxu1 %v5042_v12  ;;  %v1172_v50 = vsel %vm4741_vm5, %v1170_v60, %v1171_v62  ;;  %v5660_v60 = vld [vmem:[#allocation31_spill] sm:$0xff] }
 0x18b   : > { %v2253_v28 = vpop.f32.mrf.mxu2  ;;  %v1415_v8 = vunpack.c.l.b16 %v1172_v50 }
 0x18c   : > { %5656 = vst [vmem:[#allocation21_spill] sm:$0xff] %v5051_v7  ;;  %v2342_v6 = vpop.f32.mrf.mxu3  ;;  %v2254_v31 = vadd.f32 %v2253_v28, %v4823_v24 }
 0x18d   : > { %v2433_v55 = vpop.f32.mrf.mxu0  ;;  %v5070_v1 = vpack.c.b16 %v1415_v8, %v1414_v58  ;;  %v5665_v8 = vld [vmem:[#allocation32_spill] sm:$0xff] }
 0x18e   : > { %v2343_v47 = vadd.f32 %v2342_v6, %v2254_v31 }
 0x18f   : > { %v2522_v4 = vpop.f32.mrf.mxu1 }
 0x190   : > { %v2432_v43 = vadd.f32 %v2431_v14, %v2343_v47  ;;  %v1175_v14 = vrot.slane %v5660_v60, 5  ;;  %v5662_v47 = vld [vmem:[#allocation34_spill] sm:$0xff] }
 0x192   : > { %v5064_v30 = vadd.f32 %v2520_v22, %v2432_v43  ;;  %v5661_v22 = vld [vmem:[#allocation33_spill] sm:$0xff]  ;;  %v5664_v43 = vld [vmem:[#allocation30_spill] sm:$0xff]  ;;  %v1177_v58 = vrot.slane %v1175_v14, 4 }
 0x193   : > { %v2255_v24 = vpop.f32.mrf.mxu2  ;;  %v3543_v51 = vrot.slane %v5664_v43, 9 }
 0x194   : > { %5659 = vst [vmem:[#allocation20_spill] sm:$0xff] %v5064_v30  ;;  %v2344_v54 = vpop.f32.mrf.mxu3  ;;  %v2256_v28 = vadd.f32 %v2255_v24, %v4840_v17  ;;  %v1178_v24 = vrot.slane %v5665_v8, 5 }
 0x195   : > { %v2436_v31 = vpop.f32.mrf.mxu0 }
 0x196   : > { %v2345_v6 = vadd.f32 %v2344_v54, %v2256_v28 }
 0x197   : > { %v2525_v36 = vpop.f32.mrf.mxu1 }
 0x198   : > { %2297 = vmatmul.bf16.gmra.mxu2 %v5042_v12  ;;  %v2434_v62 = vadd.f32 %v2433_v55, %v2345_v6  ;;  %2475 = vmatmul.bf16.gmra.mxu0 %v5662_v47  ;;  %v3950_v55 = vld [vmem:[%s5497_s2 + $0x28] sm:$0xff] }
 0x199   : > { %2386 = vmatmul.bf16.gmra.mxu3 %v5661_v22  ;;  %2973 = vmatpush.bf16.msra.mxu1 %v3950_v55  ;;  %v5673_v55 = vld [vmem:[#allocation39_spill] sm:$0xff] }
 0x19a   : > { %v5076_v33 = vadd.f32 %v2522_v4, %v2434_v62  ;;  %2564 = vmatmul.bf16.gmra.mxu1 %v5070_v1  ;;  %v1176_v4 = vsel %vm4741_vm5, %v3543_v51, %v1175_v14  ;;  %v1179_v62 = vsel %vm4741_vm5, %v1177_v58, %v1178_v24  ;;  %v1182_v14 = vrot.slane %v5668_v44, 5  ;;  %v5669_v51 = vld [vmem:[#allocation41_spill] sm:$0xff]  ;;  %v5672_v24 = vld [vmem:[#allocation35_spill] sm:$0xff] }
 0x19b   : > { %v2258_v17 = vpop.f32.mrf.mxu2  ;;  %v1416_v8 = vunpack.c.l.b16 %v1176_v4  ;;  %v1417_v30 = vunpack.c.l.b16 %v1179_v62  ;;  %v1185_v4 = vrot.slane %v5673_v55, 5 }
 0x19c   : > { %5663 = vst [vmem:[#allocation22_spill] sm:$0xff] %v5076_v33  ;;  %v2347_v50 = vpop.f32.mrf.mxu3  ;;  %v2259_v54 = vadd.f32 %v2258_v17, %v4854_v40 }
 0x19d   : > { %v2438_v60 = vpop.f32.mrf.mxu0  ;;  %v5092_v22 = vpack.c.b16 %v1417_v30, %v1416_v8 }
 0x19e   : > { %v2348_v28 = vadd.f32 %v2347_v50, %v2259_v54 }
 0x19f   : > { %v2527_v6 = vpop.f32.mrf.mxu1  ;;  %5667 = vst [vmem:[#allocation28_spill] sm:$0xff] %v5092_v22 }
 0x1a0   : > { %v2437_v33 = vadd.f32 %v2436_v31, %v2348_v28  ;;  %v3544_v28 = vrot.slane %v5672_v24, 9 }
 0x1a2   : > { %v5089_v43 = vadd.f32 %v2525_v36, %v2437_v33  ;;  %v3921_v36 = vld [vmem:[%s5496_s1 + $0x180] sm:$0xff]  ;;  %v5670_v33 = vld [vmem:[#allocation42_spill] sm:$0xff] }
 0x1a3   : > { %v2260_v40 = vpop.f32.mrf.mxu2  ;;  %2597 = vmatpush.bf16.msra.mxu2 %v3921_v36 }
 0x1a4   : > { %5666 = vst [vmem:[#allocation26_spill] sm:$0xff] %v5089_v43  ;;  %v2349_v17 = vpop.f32.mrf.mxu3  ;;  %v2261_v50 = vadd.f32 %v2260_v40, %v4868_v26  ;;  %v3929_v26 = vld [vmem:[%s5496_s1 + $0x1c0] sm:$0xff] }
 0x1a5   : > { %v2441_v47 = vpop.f32.mrf.mxu0  ;;  %2686 = vmatpush.bf16.msra.mxu3 %v3929_v26  ;;  %v530_v26 = vld [vmem:[#allocation2 + $0x78] sm:$0xff] }
 0x1a6   : > { %v2350_v54 = vadd.f32 %v2349_v17, %v2261_v50  ;;  %v1183_v17 = vsel %vm4741_vm5, %v3544_v28, %v1182_v14 }
 0x1a7   : > { %v2530_v7 = vpop.f32.mrf.mxu1  ;;  %v1418_v36 = vunpack.c.l.b16 %v1183_v17 }
 0x1a8   : > { %2302 = vmatmul.bf16.gmra.mxu2 %v5070_v1  ;;  %v2439_v31 = vadd.f32 %v2438_v60, %v2350_v54  ;;  %2480 = vmatmul.bf16.gmra.mxu0 %v5670_v33  ;;  %v1184_v60 = vrot.slane %v1182_v14, 4  ;;  %v584_v14 = vmax.f32 %v530_v26, 0.0 }
 0x1a9   : > { %2391 = vmatmul.bf16.gmra.mxu3 %v5669_v51 }
 0x1aa   : > { %v5101_v58 = vadd.f32 %v2527_v6, %v2439_v31  ;;  %2569 = vmatmul.bf16.gmra.mxu1 %v5092_v22  ;;  %v1186_v50 = vsel %vm4741_vm5, %v1184_v60, %v1185_v4  ;;  %v5130_v17 = vpack.c.bf16 %v584_v14, %v584_v14 }
 0x1ab   : > { %v2263_v44 = vpop.f32.mrf.mxu2  ;;  %v1419_v24 = vunpack.c.l.b16 %v1186_v50  ;;  %v3545_v50 = vrot.slane %v4631_v9, 9 }
 0x1ac   : > { %5671 = vst [vmem:[#allocation29_spill] sm:$0xff] %v5101_v58  ;;  %v2352_v30 = vpop.f32.mrf.mxu3  ;;  %v2264_v62 = vadd.f32 %v2263_v44, %v4882_v37  ;;  %v3937_v37 = vld [vmem:[%s5496_s1 + $0x200] sm:$0xff]  ;;  %v531_v44 = vld [vmem:[#allocation2 + $0xf0] sm:$0xff] }
 0x1ad   : > { %v2443_v6 = vpop.f32.mrf.mxu0  ;;  %2775 = vmatpush.bf16.msra.mxu0 %v3937_v37  ;;  %v585_v28 = vmax.f32 %v531_v44, 0.0  ;;  %v1198_v44 = vshll.u32 %v5130_v17, 16 }
 0x1ae   : > { %v2353_v8 = vadd.f32 %v2352_v30, %v2264_v62 }
 0x1af   : > { %v5110_v40 = vpop.f32.mrf.mxu1 }
 0x1b0   : > { %5674 = vst [vmem:[#allocation25_spill] sm:$0xff] %v5110_v40  ;;  %v2442_v54 = vadd.f32 %v2441_v47, %v2353_v8  ;;  %v5122_v47 = vpack.c.b16 %v1419_v24, %v1418_v36  ;;  %v532_v36 = vld [vmem:[#allocation2 + $0x10] sm:$0x3] }
 0x1b2   : > { %v5116_v31 = vadd.f32 %v2530_v7, %v2442_v54  ;;  %v1189_v7 = vrot.slane %v4633_v56, 5  ;;  %v1192_v56 = vrot.slane %v4674_v27, 5 }
 0x1b3   : > { %v2265_v30 = vpop.f32.mrf.mxu2 }
 0x1b4   : > { %5675 = vst [vmem:[#allocation27_spill] sm:$0xff] %v5116_v31  ;;  %v2354_v55 = vpop.f32.mrf.mxu3  ;;  %v2266_v62 = vadd.f32 %v2265_v30, %v4899_v15  ;;  %v5132_v15 = vpack.c.bf16 %v585_v28, %v585_v28  ;;  %v1191_v54 = vrot.slane %v1189_v7, 4  ;;  %v1190_v9 = vsel %vm4741_vm5, %v3545_v50, %v1189_v7 }
 0x1b5   : > { %v2446_v60 = vpop.f32.mrf.mxu0  ;;  %v1200_v7 = vrot.slane %v1198_v44, 5 }
 0x1b6   : > { %v2355_v40 = vadd.f32 %v2354_v55, %v2266_v62  ;;  %v1204_v30 = vshll.u32 %v5132_v15, 16  ;;  %v1193_v27 = vsel %vm4741_vm5, %v1191_v54, %v1192_v56  ;;  %v1208_v14 = vshrl.u32 %v5132_v15, 16 }
 0x1b7   : > { %v2535_v4 = vpop.f32.mrf.mxu1 }
 0x1b8   : > { %2307 = vmatmul.bf16.gmra.mxu2 %v5092_v22  ;;  %v5127_v8 = vadd.f32 %v2443_v6, %v2355_v40  ;;  %2485 = vmatmul.bf16.gmra.mxu0 %v4683_v46  ;;  %v586_v6 = vmax.f32 %v532_v36, 0.0  ;;  %v1195_v40 = vshrl.u32 %v5130_v17, 16  ;;  %v1206_v50 = vrot.slane %v1204_v30, 5 }
 0x1b9   : > { %2396 = vmatmul.bf16.gmra.mxu3 %v4681_v53  ;;  %v1210_v46 = vrot.slane %v1208_v14, 4 }
 0x1ba   : > { %5676 = vst [vmem:[#allocation31_spill] sm:$0xff] %v5127_v8  ;;  %2574 = vmatmul.bf16.gmra.mxu1 %v5122_v47  ;;  %v1421_v8 = vunpack.c.l.b16 %v1193_v27 }
 0x1bb   : > { %v2268_v24 = vpop.f32.mrf.mxu2 }
 0x1bc   : > { %v2357_v37 = vpop.f32.mrf.mxu3  ;;  %v2269_v26 = vadd.f32 %v2268_v24, %v4913_v32  ;;  %v3949_v32 = vld [vmem:[%s5497_s2 + $0x20] sm:$0xff]  ;;  %v1420_v24 = vunpack.c.l.b16 %v1190_v9 }
 0x1bd   : > { %v2448_v62 = vpop.f32.mrf.mxu0  ;;  %2974 = vmatpush.bf16.msra.mxu1 %v3949_v32 }
 0x1be   : > { %v2358_v55 = vadd.f32 %v2357_v37, %v2269_v26  ;;  %v640_v37 = vpack.c.bf16 %v586_v6, %v586_v6  ;;  %v1197_v26 = vrot.slane %v1195_v40, 4  ;;  %v5154_v33 = vpack.c.b16 %v1421_v8, %v1420_v24 }
 0x1bf   : > { %v5149_v28 = vpop.f32.mrf.mxu1  ;;  %v1223_v6 = vrot.slane %v5132_v15, 5 }
 0x1c0   : > { %v2447_v36 = vadd.f32 %v2446_v60, %v2358_v55  ;;  %v1214_v58 = vshll.u32 %v640_v37, 16  ;;  %v1201_v60 = vor.u32 %v1200_v7, %v1197_v26  ;;  %v1211_v55 = vor.u32 %v1210_v46, %v1206_v50 }
 0x1c1   : > { %v3546_v46 = vrot.slane %v5130_v17, 9  ;;  %v1225_v30 = vrot.slane %v1223_v6, 4  ;;  %v1226_v27 = vrot.slane %v640_v37, 5  ;;  %v1454_v37 = vunpack.c.l.b16 %v5130_v17 }
 0x1c2   : > { %v5151_v31 = vadd.f32 %v2535_v4, %v2447_v36  ;;  %v1216_v40 = vrot.slane %v1214_v58, 5 }
 0x1c3   : > { %v2270_v54 = vpop.f32.mrf.mxu2  ;;  %v1224_v58 = vsel %vm4741_vm5, %v3546_v46, %v1223_v6  ;;  %v1227_v26 = vsel %vm4741_vm5, %v1225_v30, %v1226_v27 }
 0x1c4   : > { %v2359_v56 = vpop.f32.mrf.mxu3  ;;  %v2271_v53 = vadd.f32 %v2270_v54, %v4927_v20  ;;  %v1202_v20 = vrot.slane %v1201_v60, 4 }
 0x1c5   : > { %v2451_v22 = vpop.f32.mrf.mxu0 }
 0x1c6   : > { %v2360_v43 = vadd.f32 %v2359_v56, %v2271_v53  ;;  %v1212_v53 = vrot.slane %v1211_v55, 4  ;;  %v1463_v55 = vunpack.c.l.b16 %v1227_v26 }
 0x1c7   : > { %v2540_v9 = vpop.f32.mrf.mxu1 }
 0x1c8   : > { %2312 = vmatmul.bf16.gmra.mxu2 %v5122_v47  ;;  %v5159_v4 = vadd.f32 %v2448_v62, %v2360_v43  ;;  %2490 = vmatmul.bf16.gmra.mxu0 %v4727_v59  ;;  %v1207_v43 = vsel %vm4229_vm2, %v1202_v20, %v1206_v50  ;;  %v1217_v62 = vsel %vm4229_vm2, %v1212_v53, %v1216_v40  ;;  %v1462_v50 = vunpack.c.l.b16 %v1224_v58 }
 0x1c9   : > { %2401 = vmatmul.bf16.gmra.mxu3 %v4725_v35  ;;  %v1458_v54 = vunpack.c.l.b16 %v1207_v43  ;;  %v1459_v56 = vunpack.c.l.b16 %v1217_v62 }
 0x1ca   : > { %2579 = vmatmul.bf16.gmra.mxu1 %v5154_v33  ;;  %v5184_v46 = vpack.c.b16 %v1463_v55, %v1462_v50 }
 0x1cb   : > { %v2273_v8 = vpop.f32.mrf.mxu2  ;;  %v5182_v6 = vpack.c.b16 %v1459_v56, %v1458_v54 }
 0x1cc   : > { %v2362_v44 = vpop.f32.mrf.mxu3  ;;  %v2274_v14 = vadd.f32 %v2273_v8, %v4941_v42  ;;  %v1455_v42 = vunpack.c.l.b16 %v5132_v15 }
 0x1cd   : > { %v2453_v36 = vpop.f32.mrf.mxu0 }
 0x1ce   : > { %v2363_v32 = vadd.f32 %v2362_v44, %v2274_v14  ;;  %v5180_v8 = vpack.c.b16 %v1455_v42, %v1454_v37 }
 0x1cf   : > { %v5169_v24 = vpop.f32.mrf.mxu1 }
 0x1d0   : > { %v2452_v7 = vadd.f32 %v2451_v22, %v2363_v32  ;;  %v3948_v32 = vld [vmem:[%s5497_s2 + $0x18] sm:$0xff] }
 0x1d1   : > { %2975 = vmatpush.bf16.msra.mxu1 %v3948_v32 }
 0x1d2   : > { %v5177_v60 = vadd.f32 %v2540_v9, %v2452_v7 }
 0x1d3   : > { %v2275_v20 = vpop.f32.mrf.mxu2 }
 0x1d4   : > { %v2364_v53 = vpop.f32.mrf.mxu3  ;;  %v2276_v40 = vadd.f32 %v2275_v20, %v4958_v57 }
 0x1d5   : > { %v2456_v22 = vpop.f32.mrf.mxu0 }
 0x1d6   : > { %v2365_v44 = vadd.f32 %v2364_v53, %v2276_v40 }
 0x1d7   : > { %v2545_v17 = vpop.f32.mrf.mxu1 }
 0x1d8   : > { %2317 = vmatmul.bf16.gmra.mxu2 %v5154_v33  ;;  %v5188_v15 = vadd.f32 %v2453_v36, %v2365_v44  ;;  %2495 = vmatmul.bf16.gmra.mxu0 %v5182_v6 }
 0x1d9   : > { %2406 = vmatmul.bf16.gmra.mxu3 %v5180_v8 }
 0x1da   : > { %2584 = vmatmul.bf16.gmra.mxu1 %v5184_v46  ;;  %v2543_v38 = vadd.f32 %v5169_v24, %v5188_v15 }
 0x1db   : > { %v2278_v57 = vpop.f32.mrf.mxu2 }
 0x1dc   : > { %v2367_v9 = vpop.f32.mrf.mxu3  ;;  %v2279_v30 = vadd.f32 %v2278_v57, %v4972_v34 }
 0x1dd   : > { %v2458_v14 = vpop.f32.mrf.mxu0 }
 0x1de   : > { %v2368_v27 = vadd.f32 %v2367_v9, %v2279_v30 }
 0x1df   : > { %v5196_v43 = vpop.f32.mrf.mxu1 }
 0x1e0   : > { %v2457_v62 = vadd.f32 %v2456_v22, %v2368_v27 }
 0x1e2   : > { %v5198_v36 = vadd.f32 %v2545_v17, %v2457_v62 }
 0x1e3   : > { %v2280_v58 = vpop.f32.mrf.mxu2 }
 0x1e4   : > { %v2369_v26 = vpop.f32.mrf.mxu3  ;;  %v2281_v7 = vadd.f32 %v2280_v58, %v4989_v49 }
 0x1e5   : > { %v2461_v42 = vpop.f32.mrf.mxu0 }
 0x1e6   : > { %v2370_v37 = vadd.f32 %v2369_v26, %v2281_v7 }
 0x1e7   : > { %v2550_v54 = vpop.f32.mrf.mxu1 }
 0x1e8   : > { %2598 = vmatmul.bf16.vlgmr.msra.gmra.mxu2 %v4424_v5  ;;  %v5203_v34 = vadd.f32 %v2458_v14, %v2370_v37  ;;  %2776 = vmatmul.bf16.vlgmr.msra.gmra.mxu0 %v4790_v29 }
 0x1e9   : > { %2687 = vmatmul.bf16.vlgmr.msra.gmra.mxu3 %v4426_v45 }
 0x1eb   : > { %v2283_v56 = vpop.f32.mrf.mxu2 }
 0x1ec   : > { %v2372_v50 = vpop.f32.mrf.mxu3  ;;  %v2284_v55 = vadd.f32 %v2283_v56, %v4775_v19 }
 0x1ed   : > { %v2463_v53 = vpop.f32.mrf.mxu0 }
 0x1ee   : > { %v2373_v20 = vadd.f32 %v2372_v50, %v2284_v55 }
 0x1ef   : > { %v5207_v40 = vpop.f32.mrf.mxu1 }
 0x1f0   : > { %v2462_v49 = vadd.f32 %v2461_v42, %v2373_v20 }
 0x1f2   : > { %v5209_v44 = vadd.f32 %v2550_v54, %v2462_v49 }
 0x1f3   : > { %v2285_v22 = vpop.f32.mrf.mxu2 }
 0x1f4   : > { %v2374_v17 = vpop.f32.mrf.mxu3  ;;  %v2286_v5 = vadd.f32 %v2285_v22, %v4788_v41  ;;  %v3947_v41 = vld [vmem:[%s5497_s2 + $0x10] sm:$0xff] }
 0x1f5   : > { %v2466_v57 = vpop.f32.mrf.mxu0  ;;  %2976 = vmatpush.bf16.msra.mxu1 %v3947_v41 }
 0x1f6   : > { %v2375_v45 = vadd.f32 %v2374_v17, %v2286_v5 }
 0x1f7   : > { %v2555_v9 = vpop.f32.mrf.mxu1 }
 0x1f8   : > { %2603 = vmatmul.bf16.gmra.mxu2 %v4487_v23  ;;  %v5214_v29 = vadd.f32 %v2463_v53, %v2375_v45  ;;  %2781 = vmatmul.bf16.gmra.mxu0 %v4814_v0 }
 0x1f9   : > { %2692 = vmatmul.bf16.gmra.mxu3 %v4490_v25 }
 0x1fb   : > { %v2288_v19 = vpop.f32.mrf.mxu2 }
 0x1fc   : > { %v2377_v30 = vpop.f32.mrf.mxu3  ;;  %v2289_v27 = vadd.f32 %v2288_v19, %v4802_v61  ;;  %v5678_v19 = vld [vmem:[#allocation51_spill] sm:$0xff] }
 0x1fd   : > { %v2468_v32 = vpop.f32.mrf.mxu0 }
 0x1fe   : > { %v2378_v14 = vadd.f32 %v2377_v30, %v2289_v27 }
 0x1ff   : > { %v5221_v62 = vpop.f32.mrf.mxu1 }
 0x200   : > { %v2467_v58 = vadd.f32 %v2466_v57, %v2378_v14 }
 0x202   : > { %v5223_v23 = vadd.f32 %v2555_v9, %v2467_v58 }
 0x203   : > { %v2290_v25 = vpop.f32.mrf.mxu2 }
 0x204   : > { %v2379_v26 = vpop.f32.mrf.mxu3  ;;  %v2291_v0 = vadd.f32 %v2290_v25, %v4812_v39  ;;  %v5679_v25 = vld [vmem:[#allocation52_spill] sm:$0xff] }
 0x205   : > { %v2471_v37 = vpop.f32.mrf.mxu0 }
 0x206   : > { %v2380_v7 = vadd.f32 %v2379_v26, %v2291_v0 }
 0x207   : > { %v2560_v42 = vpop.f32.mrf.mxu1 }
 0x208   : > { %2608 = vmatmul.bf16.gmra.mxu2 %v4550_v63  ;;  %v5228_v61 = vadd.f32 %v2468_v32, %v2380_v7  ;;  %2786 = vmatmul.bf16.gmra.mxu0 %v4848_v52 }
 0x209   : > { %2697 = vmatmul.bf16.gmra.mxu3 %v4554_v16 }
 0x20b   : > { %v2293_v54 = vpop.f32.mrf.mxu2 }
 0x20c   : > { %v2382_v56 = vpop.f32.mrf.mxu3  ;;  %v2294_v50 = vadd.f32 %v2293_v54, %v4833_v10  ;;  %v5677_v10 = vld [vmem:[#allocation53_spill] sm:$0xff]  ;;  %v5681_v54 = vld [vmem:[#allocation48_spill] sm:$0xff] }
 0x20d   : > { %v2473_v20 = vpop.f32.mrf.mxu0 }
 0x20e   : > { %v2383_v55 = vadd.f32 %v2382_v56, %v2294_v50  ;;  %v5682_v50 = vld [vmem:[#allocation44_spill] sm:$0xff] }
 0x20f   : > { %v5232_v53 = vpop.f32.mrf.mxu1 }
 0x210   : > { %v2472_v39 = vadd.f32 %v2471_v37, %v2383_v55 }
 0x212   : > { %v5234_v49 = vadd.f32 %v2560_v42, %v2472_v39  ;;  %v5680_v42 = vld [vmem:[#allocation47_spill] sm:$0xff]  ;;  %v5683_v39 = vld [vmem:[#allocation38_spill] sm:$0xff] }
 0x213   : > { %v2295_v22 = vpop.f32.mrf.mxu2 }
 0x214   : > { %v2384_v17 = vpop.f32.mrf.mxu3  ;;  %v2296_v63 = vadd.f32 %v2295_v22, %v4846_v48  ;;  %v3946_v48 = vld [vmem:[%s5497_s2 + $0x8] sm:$0xff] }
 0x215   : > { %v2476_v5 = vpop.f32.mrf.mxu0  ;;  %2977 = vmatpush.bf16.msra.mxu1 %v3946_v48  ;;  %v5685_v48 = vld [vmem:[#allocation49_spill] sm:$0xff] }
 0x216   : > { %v2385_v16 = vadd.f32 %v2384_v17, %v2296_v63 }
 0x217   : > { %v2565_v45 = vpop.f32.mrf.mxu1 }
 0x218   : > { %2613 = vmatmul.bf16.gmra.mxu2 %v5616_v2  ;;  %v5239_v52 = vadd.f32 %v2473_v20, %v2385_v16  ;;  %2791 = vmatmul.bf16.gmra.mxu0 %v5677_v10 }
 0x219   : > { %2702 = vmatmul.bf16.gmra.mxu3 %v5617_v11 }
 0x21b   : > { %v2298_v57 = vpop.f32.mrf.mxu2 }
 0x21c   : > { %v2387_v9 = vpop.f32.mrf.mxu3  ;;  %v2299_v30 = vadd.f32 %v2298_v57, %v5678_v19 }
 0x21d   : > { %v2478_v14 = vpop.f32.mrf.mxu0 }
 0x21e   : > { %v2388_v27 = vadd.f32 %v2387_v9, %v2299_v30  ;;  %v5684_v9 = vld [vmem:[#allocation43_spill] sm:$0xff] }
 0x21f   : > { %v5246_v32 = vpop.f32.mrf.mxu1 }
 0x220   : > { %v2477_v41 = vadd.f32 %v2476_v5, %v2388_v27 }
 0x222   : > { %v5248_v2 = vadd.f32 %v2565_v45, %v2477_v41  ;;  %v5686_v41 = vld [vmem:[#allocation50_spill] sm:$0xff] }
 0x223   : > { %v2300_v11 = vpop.f32.mrf.mxu2 }
 0x224   : > { %v2389_v58 = vpop.f32.mrf.mxu3  ;;  %v2301_v26 = vadd.f32 %v2300_v11, %v5679_v25 }
 0x225   : > { %v2481_v7 = vpop.f32.mrf.mxu0 }
 0x226   : > { %v2390_v0 = vadd.f32 %v2389_v58, %v2301_v26  ;;  %v5687_v58 = vld [vmem:[#allocation54_spill] sm:$0xff] }
 0x227   : > { %v2570_v37 = vpop.f32.mrf.mxu1 }
 0x228   : > { %2618 = vmatmul.bf16.gmra.mxu2 %v5680_v42  ;;  %v5253_v56 = vadd.f32 %v2478_v14, %v2390_v0  ;;  %2796 = vmatmul.bf16.gmra.mxu0 %v5682_v50  ;;  %v5688_v0 = vld [vmem:[#allocation37_spill] sm:$0xff] }
 0x229   : > { %2707 = vmatmul.bf16.gmra.mxu3 %v5681_v54  ;;  %v3945_v54 = vld [vmem:[%s5497_s2] sm:$0xff] }
 0x22a   : > { %2978 = vmatpush.bf16.msra.mxu1 %v3945_v54 }
 0x22b   : > { %v2303_v55 = vpop.f32.mrf.mxu2 }
 0x22c   : > { %v2392_v20 = vpop.f32.mrf.mxu3  ;;  %v2304_v22 = vadd.f32 %v2303_v55, %v5683_v39 }
 0x22d   : > { %v2483_v63 = vpop.f32.mrf.mxu0 }
 0x22e   : > { %v2393_v17 = vadd.f32 %v2392_v20, %v2304_v22 }
 0x22f   : > { %v5257_v16 = vpop.f32.mrf.mxu1 }
 0x230   : > { %v2482_v5 = vadd.f32 %v2481_v7, %v2393_v17  ;;  %v5689_v17 = vld [vmem:[#allocation40_spill] sm:$0xff] }
 0x232   : > { %v5259_v45 = vadd.f32 %v2570_v37, %v2482_v5 }
 0x233   : > { %v2305_v10 = vpop.f32.mrf.mxu2 }
 0x234   : > { %v2394_v57 = vpop.f32.mrf.mxu3  ;;  %v2306_v19 = vadd.f32 %v2305_v10, %v5684_v9  ;;  %v5691_v9 = vld [vmem:[#allocation14_spill] sm:$0xff] }
 0x235   : > { %v2486_v27 = vpop.f32.mrf.mxu0 }
 0x236   : > { %v2395_v30 = vadd.f32 %v2394_v57, %v2306_v19  ;;  %v5690_v57 = vld [vmem:[#allocation13_spill] sm:$0xff] }
 0x237   : > { %v2575_v14 = vpop.f32.mrf.mxu1 }
 0x238   : > { %2623 = vmatmul.bf16.gmra.mxu2 %v5685_v48  ;;  %v5264_v11 = vadd.f32 %v2483_v63, %v2395_v30  ;;  %2801 = vmatmul.bf16.gmra.mxu0 %v5687_v58  ;;  %v5692_v30 = vld [vmem:[#allocation9_spill] sm:$0xff]  ;;  %v5693_v58 = vld [vmem:[#allocation8_spill] sm:$0xff] }
 0x239   : > { %2712 = vmatmul.bf16.gmra.mxu3 %v5686_v41 }
 0x23b   : > { %v2308_v25 = vpop.f32.mrf.mxu2 }
 0x23c   : > { %v2397_v26 = vpop.f32.mrf.mxu3  ;;  %v2309_v7 = vadd.f32 %v2308_v25, %v5688_v0 }
 0x23d   : > { %v2488_v42 = vpop.f32.mrf.mxu0 }
 0x23e   : > { %v2398_v37 = vadd.f32 %v2397_v26, %v2309_v7 }
 0x23f   : > { %v5271_v55 = vpop.f32.mrf.mxu1 }
 0x240   : > { %v2487_v50 = vadd.f32 %v2486_v27, %v2398_v37 }
 0x242   : > { %v5273_v20 = vadd.f32 %v2575_v14, %v2487_v50  ;;  %v5694_v50 = vld [vmem:[#allocation7_spill] sm:$0xff] }
 0x243   : > { %v2310_v39 = vpop.f32.mrf.mxu2 }
 0x244   : > { %v2399_v22 = vpop.f32.mrf.mxu3  ;;  %v2311_v63 = vadd.f32 %v2310_v39, %v5689_v17 }
 0x245   : > { %v2491_v10 = vpop.f32.mrf.mxu0 }
 0x246   : > { %v2400_v5 = vadd.f32 %v2399_v22, %v2311_v63  ;;  %v5695_v63 = vld [vmem:[#allocation18_spill] sm:$0xff] }
 0x247   : > { %v2580_v27 = vpop.f32.mrf.mxu1 }
 0x248   : > { %2628 = vmatmul.bf16.gmra.mxu2 %v5690_v57  ;;  %v5278_v19 = vadd.f32 %v2488_v42, %v2400_v5  ;;  %2806 = vmatmul.bf16.gmra.mxu0 %v5692_v30  ;;  %v5696_v5 = vld [vmem:[#allocation19_spill] sm:$0xff] }
 0x249   : > { %2717 = vmatmul.bf16.gmra.mxu3 %v5691_v9  ;;  %v5697_v9 = vld [vmem:[#allocation12_spill] sm:$0xff] }
 0x24b   : > { %v2313_v48 = vpop.f32.mrf.mxu2 }
 0x24c   : > { %v2402_v41 = vpop.f32.mrf.mxu3  ;;  %v2314_v14 = vadd.f32 %v2313_v48, %v5693_v58 }
 0x24d   : > { %v2493_v26 = vpop.f32.mrf.mxu0 }
 0x24e   : > { %v2403_v25 = vadd.f32 %v2402_v41, %v2314_v14 }
 0x24f   : > { %v5285_v22 = vpop.f32.mrf.mxu1 }
 0x250   : > { %v2492_v0 = vadd.f32 %v2491_v10, %v2403_v25 }
 0x252   : > { %v5282_v7 = vadd.f32 %v2580_v27, %v2492_v0  ;;  %v5698_v27 = vld [vmem:[#allocation11_spill] sm:$0xff] }
 0x253   : > { %v2315_v37 = vpop.f32.mrf.mxu2 }
 0x254   : > { %v2404_v54 = vpop.f32.mrf.mxu3  ;;  %v2316_v39 = vadd.f32 %v2315_v37, %v5694_v50  ;;  %v5700_v50 = vld [vmem:[#allocation10_spill] sm:$0xff] }
 0x255   : > { %v2496_v17 = vpop.f32.mrf.mxu0 }
 0x256   : > { %v2405_v42 = vadd.f32 %v2404_v54, %v2316_v39 }
 0x257   : > { %v2585_v14 = vpop.f32.mrf.mxu1 }
 0x258   : > { %2633 = vmatmul.bf16.gmra.mxu2 %v5695_v63  ;;  %v5289_v57 = vadd.f32 %v2493_v26, %v2405_v42  ;;  %2811 = vmatmul.bf16.gmra.mxu0 %v5697_v9  ;;  %v5701_v26 = vld [vmem:[#allocation23_spill] sm:$0xff]  ;;  %v5702_v42 = vld [vmem:[#allocation24_spill] sm:$0xff] }
 0x259   : > { %2722 = vmatmul.bf16.gmra.mxu3 %v5696_v5 }
 0x25b   : > { %v2318_v30 = vpop.f32.mrf.mxu2 }
 0x25c   : > { %v2407_v10 = vpop.f32.mrf.mxu3  ;;  %v2319_v48 = vadd.f32 %v2318_v30, %v5698_v27  ;;  %v5703_v27 = vld [vmem:[#allocation16_spill] sm:$0xff] }
 0x25d   : > { %v2498_v58 = vpop.f32.mrf.mxu0 }
 0x25e   : > { %v2408_v41 = vadd.f32 %v2407_v10, %v2319_v48 }
 0x260   : > { %v2497_v25 = vadd.f32 %v2496_v17, %v2408_v41 }
 0x262   : > { %v5293_v0 = vadd.f32 %v2585_v14, %v2497_v25 }
 0x263   : > { %v2320_v37 = vpop.f32.mrf.mxu2 }
 0x264   : > { %5699 = vst [vmem:[#allocation30_spill] sm:$0xff] %v5293_v0  ;;  %v2409_v54 = vpop.f32.mrf.mxu3  ;;  %v2321_v39 = vadd.f32 %v2320_v37, %v5700_v50  ;;  %v5704_v0 = vld [vmem:[#allocation15_spill] sm:$0xff] }
 0x265   : > { %v2777_v5 = vpop.f32.mrf.mxu0 }
 0x266   : > { %v2410_v63 = vadd.f32 %v2409_v54, %v2321_v39 }
 0x268   : > { %2638 = vmatmul.bf16.gmra.mxu2 %v5701_v26  ;;  %v5298_v9 = vadd.f32 %v2498_v58, %v2410_v63  ;;  %2816 = vmatmul.bf16.gmra.mxu0 %v5020_v18 }
 0x269   : > { %2727 = vmatmul.bf16.gmra.mxu3 %v5702_v42 }
 0x26b   : > { %v2599_v30 = vpop.f32.mrf.mxu2 }
 0x26c   : > { %v2688_v10 = vpop.f32.mrf.mxu3  ;;  %v2600_v17 = vadd.f32 %v2599_v30, %v5703_v27 }
 0x26d   : > { %v2779_v48 = vpop.f32.mrf.mxu0 }
 0x26e   : > { %v2689_v41 = vadd.f32 %v2688_v10, %v2600_v17  ;;  %v5705_v10 = vld [vmem:[#allocation17_spill] sm:$0xff] }
 0x270   : > { %v2778_v54 = vadd.f32 %v2777_v5, %v2689_v41 }
 0x272   : > { %v2857_v18 = vmax.f32 %v2778_v54, 0.0 }
 0x273   : > { %v2601_v14 = vpop.f32.mrf.mxu2 }
 0x274   : > { %v2690_v25 = vpop.f32.mrf.mxu3  ;;  %v2602_v37 = vadd.f32 %v2601_v14, %v5704_v0  ;;  %v5706_v14 = vld [vmem:[#allocation21_spill] sm:$0xff] }
 0x275   : > { %v2782_v39 = vpop.f32.mrf.mxu0 }
 0x276   : > { %v2691_v50 = vadd.f32 %v2690_v25, %v2602_v37 }
 0x278   : > { %v2780_v26 = vadd.f32 %v2779_v48, %v2691_v50  ;;  %2643 = vmatmul.bf16.gmra.mxu2 %v5654_v3  ;;  %2821 = vmatmul.bf16.gmra.mxu0 %v5042_v12  ;;  %v5707_v50 = vld [vmem:[#allocation33_spill] sm:$0xff]  ;;  %v5708_v12 = vld [vmem:[#allocation34_spill] sm:$0xff] }
 0x279   : > { %2732 = vmatmul.bf16.gmra.mxu3 %v5655_v13 }
 0x27a   : > { %v2858_v58 = vmax.f32 %v2780_v26, 0.0 }
 0x27b   : > { %v2604_v63 = vpop.f32.mrf.mxu2 }
 0x27c   : > { %v2693_v42 = vpop.f32.mrf.mxu3  ;;  %v2889_v30 = vpack.c.bf16 %v2858_v58, %v2857_v18  ;;  %v2605_v27 = vadd.f32 %v2604_v63, %v5705_v10 }
 0x27d   : > { %v2784_v17 = vpop.f32.mrf.mxu0 }
 0x27e   : > { %2979 = vmatmul.bf16.vlgmr.msra.gmra.mxu1 %v2889_v30  ;;  %v2694_v0 = vadd.f32 %v2693_v42, %v2605_v27  ;;  %v5709_v42 = vld [vmem:[#allocation20_spill] sm:$0xff] }
 0x280   : > { %v2783_v25 = vadd.f32 %v2782_v39, %v2694_v0 }
 0x282   : > { %v2859_v54 = vmax.f32 %v2783_v25, 0.0  ;;  %v5712_v25 = vld [vmem:[#allocation28_spill] sm:$0xff] }
 0x283   : > { %v2606_v5 = vpop.f32.mrf.mxu2 }
 0x284   : > { %v2695_v41 = vpop.f32.mrf.mxu3  ;;  %v2607_v48 = vadd.f32 %v2606_v5, %v5706_v14  ;;  %v5710_v5 = vld [vmem:[#allocation22_spill] sm:$0xff] }
 0x285   : > { %v2787_v37 = vpop.f32.mrf.mxu0 }
 0x286   : > { %v2696_v3 = vadd.f32 %v2695_v41, %v2607_v48 }
 0x288   : > { %v2785_v13 = vadd.f32 %v2784_v17, %v2696_v3  ;;  %2648 = vmatmul.bf16.gmra.mxu2 %v5707_v50  ;;  %2826 = vmatmul.bf16.gmra.mxu0 %v5070_v1  ;;  %v5711_v1 = vld [vmem:[#allocation42_spill] sm:$0xff] }
 0x289   : > { %2737 = vmatmul.bf16.gmra.mxu3 %v5708_v12 }
 0x28a   : > { %v2860_v26 = vmax.f32 %v2785_v13, 0.0 }
 0x28b   : > { %v2609_v18 = vpop.f32.mrf.mxu2 }
 0x28c   : > { %v2698_v58 = vpop.f32.mrf.mxu3  ;;  %v2890_v63 = vpack.c.bf16 %v2860_v26, %v2859_v54  ;;  %v2610_v30 = vadd.f32 %v2609_v18, %v5709_v42  ;;  %v5713_v18 = vld [vmem:[#allocation26_spill] sm:$0xff] }
 0x28d   : > { %v2789_v10 = vpop.f32.mrf.mxu0 }
 0x28e   : > { %2984 = vmatmul.bf16.gmra.mxu1 %v2890_v63  ;;  %v2699_v27 = vadd.f32 %v2698_v58, %v2610_v30 }
 0x290   : > { %v2788_v41 = vadd.f32 %v2787_v37, %v2699_v27  ;;  %v5714_v27 = vld [vmem:[#allocation29_spill] sm:$0xff] }
 0x292   : > { %v2861_v13 = vmax.f32 %v2788_v41, 0.0  ;;  %v5716_v41 = vld [vmem:[#allocation46_spill] sm:$0xff] }
 0x293   : > { %v2611_v39 = vpop.f32.mrf.mxu2 }
 0x294   : > { %v2700_v0 = vpop.f32.mrf.mxu3  ;;  %v2612_v17 = vadd.f32 %v2611_v39, %v5710_v5 }
 0x295   : > { %v2792_v48 = vpop.f32.mrf.mxu0 }
 0x296   : > { %v2701_v14 = vadd.f32 %v2700_v0, %v2612_v17  ;;  %v5715_v17 = vld [vmem:[#allocation45_spill] sm:$0xff] }
 0x298   : > { %v2790_v3 = vadd.f32 %v2789_v10, %v2701_v14  ;;  %2653 = vmatmul.bf16.gmra.mxu2 %v5669_v51  ;;  %2831 = vmatmul.bf16.gmra.mxu0 %v5712_v25 }
 0x299   : > { %2742 = vmatmul.bf16.gmra.mxu3 %v5711_v1 }
 0x29a   : > { %v2862_v50 = vmax.f32 %v2790_v3, 0.0 }
 0x29b   : > { %v2614_v12 = vpop.f32.mrf.mxu2 }
 0x29c   : > { %v2703_v54 = vpop.f32.mrf.mxu3  ;;  %v2891_v26 = vpack.c.bf16 %v2862_v50, %v2861_v13  ;;  %v2615_v58 = vadd.f32 %v2614_v12, %v5713_v18  ;;  %v5717_v50 = vld [vmem:[#allocation27_spill] sm:$0xff] }
 0x29d   : > { %v2794_v63 = vpop.f32.mrf.mxu0 }
 0x29e   : > { %2989 = vmatmul.bf16.gmra.mxu1 %v2891_v26  ;;  %v2704_v42 = vadd.f32 %v2703_v54, %v2615_v58  ;;  %v5718_v26 = vld [vmem:[#allocation31_spill] sm:$0xff] }
 0x2a0   : > { %v2793_v39 = vadd.f32 %v2792_v48, %v2704_v42  ;;  %v5719_v48 = vld [vmem:[#allocation25_spill] sm:$0xff]  ;;  %v534_v42 = vld [vmem:[#allocation2 + $0x178] sm:$0xff] }
 0x2a1   : > { %v2533_v18 = vadd.f32 %v5719_v48, %v5718_v26 }
 0x2a2   : > { %v2863_v14 = vmax.f32 %v2793_v39, 0.0 }
 0x2a3   : > { %v2616_v37 = vpop.f32.mrf.mxu2 }
 0x2a4   : > { %v2705_v30 = vpop.f32.mrf.mxu3  ;;  %v2617_v10 = vadd.f32 %v2616_v37, %v5714_v27 }
 0x2a5   : > { %v2797_v0 = vpop.f32.mrf.mxu0 }
 0x2a6   : > { %v2706_v51 = vadd.f32 %v2705_v30, %v2617_v10 }
 0x2a8   : > { %v2795_v5 = vadd.f32 %v2794_v63, %v2706_v51  ;;  %2658 = vmatmul.bf16.gmra.mxu2 %v5715_v17  ;;  %2836 = vmatmul.bf16.gmra.mxu0 %v5122_v47  ;;  %v533_v63 = vld [vmem:[#allocation2 + $0x100] sm:$0xff]  ;;  %v588_v47 = vmax.f32 %v534_v42, 0.0 }
 0x2a9   : > { %2747 = vmatmul.bf16.gmra.mxu3 %v5716_v41  ;;  %v587_v10 = vmax.f32 %v533_v63, 0.0 }
 0x2aa   : > { %v2864_v3 = vmax.f32 %v2795_v5, 0.0 }
 0x2ab   : > { %v2619_v1 = vpop.f32.mrf.mxu2  ;;  %v5327_v41 = vpack.c.bf16 %v587_v10, %v587_v10 }
 0x2ac   : > { %v2708_v25 = vpop.f32.mrf.mxu3  ;;  %v2892_v13 = vpack.c.bf16 %v2864_v3, %v2863_v14  ;;  %v2620_v12 = vadd.f32 %v2619_v1, %v5717_v50  ;;  %v5329_v14 = vpack.c.bf16 %v588_v47, %v588_v47  ;;  %v535_v3 = vld [vmem:[#allocation2 + $0x148] sm:$0x3] }
 0x2ad   : > { %v2799_v54 = vpop.f32.mrf.mxu0  ;;  %v1229_v26 = vshrl.u32 %v5327_v41, 16 }
 0x2ae   : > { %2994 = vmatmul.bf16.gmra.mxu1 %v2892_v13  ;;  %v2709_v58 = vadd.f32 %v2708_v25, %v2620_v12 }
 0x2b0   : > { %v2798_v39 = vadd.f32 %v2797_v0, %v2709_v58  ;;  %v589_v0 = vmax.f32 %v535_v3, 0.0  ;;  %v1231_v58 = vrot.slane %v1229_v26, 4 }
 0x2b2   : > { %v2865_v1 = vmax.f32 %v2798_v39, 0.0 }
 0x2b3   : > { %v2621_v37 = vpop.f32.mrf.mxu2 }
 0x2b4   : > { %v2710_v30 = vpop.f32.mrf.mxu3  ;;  %v2622_v27 = vadd.f32 %v2621_v37, %v2533_v18  ;;  %v643_v18 = vpack.c.bf16 %v589_v0, %v589_v0  ;;  %v3547_v0 = vrot.slane %v5327_v41, 9 }
 0x2b5   : > { %v2802_v5 = vpop.f32.mrf.mxu0 }
 0x2b6   : > { %v2711_v51 = vadd.f32 %v2710_v30, %v2622_v27  ;;  %v2538_v30 = vadd.f32 %v5149_v28, %v5159_v4  ;;  %v1248_v3 = vshll.u32 %v643_v18, 16 }
 0x2b8   : > { %v2800_v17 = vadd.f32 %v2799_v54, %v2711_v51  ;;  %2663 = vmatmul.bf16.gmra.mxu2 %v4725_v35  ;;  %2841 = vmatmul.bf16.gmra.mxu0 %v5154_v33  ;;  %v1232_v54 = vshll.u32 %v5327_v41, 16  ;;  %v1238_v35 = vshll.u32 %v5329_v14, 16 }
 0x2b9   : > { %2752 = vmatmul.bf16.gmra.mxu3 %v4727_v59  ;;  %v1242_v59 = vshrl.u32 %v5329_v14, 16 }
 0x2ba   : > { %v2866_v25 = vmax.f32 %v2800_v17, 0.0  ;;  %v1234_v63 = vrot.slane %v1232_v54, 5  ;;  %v1240_v42 = vrot.slane %v1238_v35, 5 }
 0x2bb   : > { %v2624_v13 = vpop.f32.mrf.mxu2  ;;  %v1244_v37 = vrot.slane %v1242_v59, 4 }
 0x2bc   : > { %v2713_v50 = vpop.f32.mrf.mxu3  ;;  %v2893_v12 = vpack.c.bf16 %v2866_v25, %v2865_v1  ;;  %v2625_v33 = vadd.f32 %v2624_v13, %v5151_v31  ;;  %v1235_v51 = vor.u32 %v1234_v63, %v1231_v58  ;;  %v1257_v13 = vrot.slane %v5329_v14, 5 }
 0x2bd   : > { %v2804_v48 = vpop.f32.mrf.mxu0  ;;  %v1245_v17 = vor.u32 %v1244_v37, %v1240_v42 }
 0x2be   : > { %2999 = vmatmul.bf16.gmra.mxu1 %v2893_v12  ;;  %v2714_v27 = vadd.f32 %v2713_v50, %v2625_v33  ;;  %v1236_v28 = vrot.slane %v1235_v51, 4  ;;  %v1250_v50 = vrot.slane %v1248_v3, 5  ;;  %v1259_v35 = vrot.slane %v1257_v13, 4 }
 0x2bf   : > { %v1246_v4 = vrot.slane %v1245_v17, 4  ;;  %v1258_v63 = vsel %vm4741_vm5, %v3547_v0, %v1257_v13 }
 0x2c0   : > { %v2803_v1 = vadd.f32 %v2802_v5, %v2714_v27  ;;  %v1260_v5 = vrot.slane %v643_v18, 5  ;;  %v1466_v18 = vunpack.c.l.b16 %v5327_v41 }
 0x2c2   : > { %v2867_v26 = vmax.f32 %v2803_v1, 0.0  ;;  %v1261_v37 = vsel %vm4741_vm5, %v1259_v35, %v1260_v5 }
 0x2c3   : > { %v2626_v10 = vpop.f32.mrf.mxu2 }
 0x2c4   : > { %v2715_v47 = vpop.f32.mrf.mxu3  ;;  %v2627_v39 = vadd.f32 %v2626_v10, %v2538_v30  ;;  %v1467_v30 = vunpack.c.l.b16 %v5329_v14 }
 0x2c5   : > { %v2807_v31 = vpop.f32.mrf.mxu0 }
 0x2c6   : > { %v2716_v25 = vadd.f32 %v2715_v47, %v2627_v39  ;;  %v1475_v47 = vunpack.c.l.b16 %v1261_v37  ;;  %v1468_v3 = vpack.c.b16 %v1467_v30, %v1466_v18 }
 0x2c8   : > { %v2805_v12 = vadd.f32 %v2804_v48, %v2716_v25  ;;  %2668 = vmatmul.bf16.gmra.mxu2 %v5180_v8  ;;  %2846 = vmatmul.bf16.gmra.mxu0 %v5184_v46  ;;  %v1241_v48 = vsel %vm4229_vm2, %v1236_v28, %v1240_v42  ;;  %v1251_v8 = vsel %vm4229_vm2, %v1246_v4, %v1250_v50  ;;  %v1474_v42 = vunpack.c.l.b16 %v1258_v63 }
 0x2c9   : > { %2757 = vmatmul.bf16.gmra.mxu3 %v5182_v6  ;;  %v1470_v27 = vunpack.c.l.b16 %v1241_v48  ;;  %v1471_v10 = vunpack.c.l.b16 %v1251_v8 }
 0x2ca   : > { %v2868_v54 = vmax.f32 %v2805_v12, 0.0  ;;  %v1476_v25 = vpack.c.b16 %v1475_v47, %v1474_v42 }
 0x2cb   : > { %v2629_v59 = vpop.f32.mrf.mxu2  ;;  %v1472_v1 = vpack.c.b16 %v1471_v10, %v1470_v27  ;;  %v5362_v10 = vpop.f32.mrf.mxu1 }
 0x2cc   : > { %v2718_v33 = vpop.f32.mrf.mxu3  ;;  %v2894_v58 = vpack.c.bf16 %v2868_v54, %v2867_v26  ;;  %v2630_v6 = vadd.f32 %v2629_v59, %v5177_v60  ;;  %v2548_v26 = vadd.f32 %v5196_v43, %v5203_v34  ;;  %v2553_v43 = vadd.f32 %v5207_v40, %v5214_v29 }
 0x2cd   : > { %v2809_v46 = vpop.f32.mrf.mxu0 }
 0x2ce   : > { %3004 = vmatmul.bf16.gmra.mxu1 %v2894_v58  ;;  %v2719_v60 = vadd.f32 %v2718_v33, %v2630_v6 }
 0x2d0   : > { %v2808_v21 = vadd.f32 %v2807_v31, %v2719_v60 }
 0x2d2   : > { %v2869_v14 = vmax.f32 %v2808_v21, 0.0 }
 0x2d3   : > { %v2631_v39 = vpop.f32.mrf.mxu2 }
 0x2d4   : > { %v2720_v51 = vpop.f32.mrf.mxu3  ;;  %v2632_v17 = vadd.f32 %v2631_v39, %v2543_v38 }
 0x2d5   : > { %v2812_v12 = vpop.f32.mrf.mxu0 }
 0x2d6   : > { %v2721_v13 = vadd.f32 %v2720_v51, %v2632_v17  ;;  %v3995_v51 = vld [vmem:[#allocation2 + $0x18] sm:$0xff] }
 0x2d7   : > { %v3109_v17 = vrot.slane %v3995_v51, 1 }
 0x2d8   : > { %v2810_v41 = vadd.f32 %v2809_v46, %v2721_v13  ;;  %2673 = vmatmul.bf16.gmra.mxu2 %v1468_v3  ;;  %2851 = vmatmul.bf16.gmra.mxu0 %v1476_v25  ;;  %v3996_v3 = vld [vmem:[#allocation2 + $0x68] sm:$0xff] }
 0x2d9   : > { %2762 = vmatmul.bf16.gmra.mxu3 %v1472_v1  ;;  %v3110_v1 = vrot.slane %v3996_v3, 1 }
 0x2da   : > { %v2870_v28 = vmax.f32 %v2810_v41, 0.0 }
 0x2db   : > { %v2634_v4 = vpop.f32.mrf.mxu2 }
 0x2dc   : > { %v2723_v50 = vpop.f32.mrf.mxu3  ;;  %v2895_v0 = vpack.c.bf16 %v2870_v28, %v2869_v14  ;;  %v2635_v24 = vadd.f32 %v2634_v4, %v5198_v36 }
 0x2dd   : > { %v2814_v15 = vpop.f32.mrf.mxu0 }
 0x2de   : > { %3009 = vmatmul.bf16.gmra.mxu1 %v2895_v0  ;;  %v2724_v54 = vadd.f32 %v2723_v50, %v2635_v24  ;;  %v3997_v0 = vld [vmem:[#allocation2 + $0x160] sm:$0x3] }
 0x2df   : > { %v3112_v24 = vrot.slane %v3997_v0, 1  ;;  %v4002_v0 = vld [vmem:[#allocation2 + $0x118] sm:$0xff] }
 0x2e0   : > { %v2813_v59 = vadd.f32 %v2812_v12, %v2724_v54  ;;  %v3111_v12 = vsel %vm3108_vm6, %v3109_v17, %v3110_v1  ;;  %v2563_v17 = vadd.f32 %v5232_v53, %v5239_v52 }
 0x2e2   : > { %v2871_v8 = vmax.f32 %v2813_v59, 0.0  ;;  %v3113_v59 = vsel %vm3108_vm6, %v3110_v1, %v3112_v24  ;;  %v3120_v24 = vrot.slane %v4002_v0, 1 }
 0x2e3   : > { %v2636_v31 = vpop.f32.mrf.mxu2 }
 0x2e4   : > { %v2725_v35 = vpop.f32.mrf.mxu3  ;;  %v2637_v5 = vadd.f32 %v2636_v31, %v2548_v26 }
 0x2e5   : > { %v2817_v58 = vpop.f32.mrf.mxu0 }
 0x2e6   : > { %v2726_v33 = vadd.f32 %v2725_v35, %v2637_v5 }
 0x2e8   : > { %v2815_v48 = vadd.f32 %v2814_v15, %v2726_v33  ;;  %v2558_v15 = vadd.f32 %v5221_v62, %v5228_v61 }
 0x2ea   : > { %v2872_v6 = vmax.f32 %v2815_v48, 0.0 }
 0x2eb   : > { %v2639_v46 = vpop.f32.mrf.mxu2 }
 0x2ec   : > { %v2728_v63 = vpop.f32.mrf.mxu3  ;;  %v2896_v37 = vpack.c.bf16 %v2872_v6, %v2871_v8  ;;  %v2640_v36 = vadd.f32 %v2639_v46, %v5209_v44  ;;  %v5367_v44 = vld [vmem:[%s5498_s3 + $0x1] ss:$0 sm:$0xff]  ;;  %v3998_v46 = vld [vmem:[#allocation2 + $0xd0] sm:$0xff] }
 0x2ed   : > { %v2819_v18 = vpop.f32.mrf.mxu0 }
 0x2ee   : > { %3014 = vmatmul.bf16.gmra.mxu1 %v2896_v37  ;;  %v2729_v34 = vadd.f32 %v2728_v63, %v2640_v36  ;;  %v3114_v63 = vrot.slane %v3998_v46, 1  ;;  %v3999_v37 = vld [vmem:[#allocation2 + $0x28] sm:$0xff] }
 0x2ef   : > { %v3115_v36 = vrot.slane %v3999_v37, 1 }
 0x2f0   : > { %v2818_v47 = vadd.f32 %v2817_v58, %v2729_v34 }
 0x2f2   : > { %v2873_v40 = vmax.f32 %v2818_v47, 0.0 }
 0x2f3   : > { %v2641_v30 = vpop.f32.mrf.mxu2 }
 0x2f4   : > { %v2730_v27 = vpop.f32.mrf.mxu3  ;;  %v2642_v42 = vadd.f32 %v2641_v30, %v2553_v43  ;;  %v3116_v30 = vsel %vm3108_vm6, %v3114_v63, %v3115_v36 }
 0x2f5   : > { %v2822_v60 = vpop.f32.mrf.mxu0 }
 0x2f6   : > { %v2731_v38 = vadd.f32 %v2730_v27, %v2642_v42 }
 0x2f8   : > { %v2820_v39 = vadd.f32 %v2819_v18, %v2731_v38 }
 0x2fa   : > { %v2874_v29 = vmax.f32 %v2820_v39, 0.0  ;;  %v4000_v39 = vld [vmem:[#allocation2 + $0x128] sm:$0x3] }
 0x2fb   : > { %v2644_v25 = vpop.f32.mrf.mxu2  ;;  %v2980_v13 = vpop.f32.mrf.mxu1  ;;  %v3117_v51 = vrot.slane %v4000_v39, 1 }
 0x2fc   : > { %v2733_v21 = vpop.f32.mrf.mxu3  ;;  %v2897_v41 = vpack.c.bf16 %v2874_v29, %v2873_v40  ;;  %v2981_v14 = vadd.f32 %v5367_v44, %v2980_v13  ;;  %v2645_v28 = vadd.f32 %v2644_v25, %v5223_v23 }
 0x2fd   : > { %v2824_v4 = vpop.f32.mrf.mxu0 }
 0x2fe   : > { %3019 = vmatmul.bf16.gmra.mxu1 %v2897_v41  ;;  %v3221_v50 = vadd.f32 %v3111_v12, %v2981_v14  ;;  %v2734_v26 = vadd.f32 %v2733_v21, %v2645_v28  ;;  %v3118_v21 = vsel %vm3108_vm6, %v3115_v36, %v3117_v51 }
 0x300   : > { %3253 = vst [vmem:[%s4123_s26] sm:$0xff] %v3221_v50  ;;  %v2823_v23 = vadd.f32 %v2822_v60, %v2734_v26 }
 0x302   : > { %v2875_v62 = vmax.f32 %v2823_v23, 0.0 }
 0x303   : > { %v2646_v54 = vpop.f32.mrf.mxu2  ;;  %v2982_v5 = vpop.f32.mrf.mxu1 }
 0x304   : > { %v2735_v31 = vpop.f32.mrf.mxu3  ;;  %v2647_v35 = vadd.f32 %v2646_v54, %v2558_v15  ;;  %v2983_v33 = vadd.f32 %v5367_v44, %v2982_v5 }
 0x305   : > { %v2827_v48 = vpop.f32.mrf.mxu0 }
 0x306   : > { %v2736_v58 = vadd.f32 %v2735_v31, %v2647_v35  ;;  %v3222_v8 = vadd.f32 %v3113_v59, %v2983_v33 }
 0x308   : > { %v2825_v6 = vadd.f32 %v2824_v4, %v2736_v58  ;;  %3254 = vst [vmem:[%s4123_s26 + $0x8] sm:$0xff] %v3222_v8  ;;  %v4001_v4 = vld [vmem:[#allocation2 + $0x60] sm:$0xff]  ;;  %v4003_v58 = vld [vmem:[#allocation2 + $0x168] sm:$0x3]  ;;  %v2568_v8 = vadd.f32 %v5246_v32, %v5253_v56 }
 0x309   : > { %v3119_v50 = vrot.slane %v4001_v4, 1 }
 0x30a   : > { %v2876_v61 = vmax.f32 %v2825_v6, 0.0 }
 0x30b   : > { %v2649_v18 = vpop.f32.mrf.mxu2  ;;  %v2985_v34 = vpop.f32.mrf.mxu1  ;;  %v3121_v31 = vsel %vm3108_vm6, %v3119_v50, %v3120_v24 }
 0x30c   : > { %v2738_v43 = vpop.f32.mrf.mxu3  ;;  %v2898_v27 = vpack.c.bf16 %v2876_v61, %v2875_v62  ;;  %v2986_v42 = vadd.f32 %v5367_v44, %v2985_v34  ;;  %v2650_v47 = vadd.f32 %v2649_v18, %v5234_v49 }
 0x30d   : > { %v2829_v38 = vpop.f32.mrf.mxu0 }
 0x30e   : > { %3024 = vmatmul.bf16.gmra.mxu1 %v2898_v27  ;;  %v3223_v60 = vadd.f32 %v3116_v30, %v2986_v42  ;;  %v2739_v3 = vadd.f32 %v2738_v43, %v2650_v47  ;;  %v4004_v27 = vld [vmem:[#allocation2 + $0x188] sm:$0xff]  ;;  %v4005_v47 = vld [vmem:[#allocation2 + $0x198] sm:$0xff] }
 0x30f   : > { %v3124_v42 = vrot.slane %v4004_v27, 1 }
 0x310   : > { %3255 = vst [vmem:[%s4123_s26 + $0x10] sm:$0xff] %v3223_v60  ;;  %v2828_v49 = vadd.f32 %v2827_v48, %v2739_v3  ;;  %v3122_v48 = vrot.slane %v4003_v58, 1 }
 0x312   : > { %v2877_v53 = vmax.f32 %v2828_v49, 0.0  ;;  %v3123_v62 = vsel %vm3108_vm6, %v3120_v24, %v3122_v48  ;;  %v2573_v49 = vadd.f32 %v5257_v16, %v5264_v11 }
 0x313   : > { %v2651_v1 = vpop.f32.mrf.mxu2  ;;  %v2987_v25 = vpop.f32.mrf.mxu1 }
 0x314   : > { %v2740_v40 = vpop.f32.mrf.mxu3  ;;  %v2652_v29 = vadd.f32 %v2651_v1, %v2563_v17  ;;  %v2988_v13 = vadd.f32 %v5367_v44, %v2987_v25 }
 0x315   : > { %v2832_v41 = vpop.f32.mrf.mxu0 }
 0x316   : > { %v2741_v12 = vadd.f32 %v2740_v40, %v2652_v29  ;;  %v3224_v14 = vadd.f32 %v3118_v21, %v2988_v13  ;;  %v4006_v21 = vld [vmem:[#allocation2 + $0xa0] sm:$0x3] }
 0x317   : > { %v3127_v13 = vrot.slane %v4006_v21, 1 }
 0x318   : > { %v2830_v28 = vadd.f32 %v2829_v38, %v2741_v12  ;;  %3256 = vst [vmem:[%s4123_s26 + $0x18] sm:$0xff] %v3224_v14  ;;  %v3125_v38 = vrot.slane %v4005_v47, 1 }
 0x31a   : > { %v2878_v52 = vmax.f32 %v2830_v28, 0.0  ;;  %v3126_v17 = vsel %vm3108_vm6, %v3124_v42, %v3125_v38  ;;  %v3128_v50 = vsel %vm3108_vm6, %v3125_v38, %v3127_v13  ;;  %v4012_v13 = vld [vmem:[#allocation2 + $0x170] sm:$0x3] }
 0x31b   : > { %v2654_v15 = vpop.f32.mrf.mxu2  ;;  %v2990_v54 = vpop.f32.mrf.mxu1 }
 0x31c   : > { %v2743_v26 = vpop.f32.mrf.mxu3  ;;  %v2899_v35 = vpack.c.bf16 %v2878_v52, %v2877_v53  ;;  %v2991_v5 = vadd.f32 %v5367_v44, %v2990_v54  ;;  %v2655_v59 = vadd.f32 %v2654_v15, %v5248_v2 }
 0x31d   : > { %v2834_v33 = vpop.f32.mrf.mxu0 }
 0x31e   : > { %3029 = vmatmul.bf16.gmra.mxu1 %v2899_v35  ;;  %v3225_v23 = vadd.f32 %v3121_v31, %v2991_v5  ;;  %v2744_v6 = vadd.f32 %v2743_v26, %v2655_v59  ;;  %v4007_v26 = vld [vmem:[#allocation2 + $0xd8] sm:$0xff]  ;;  %v4008_v31 = vld [vmem:[#allocation2 + $0x1a0] sm:$0xff] }
 0x31f   : > { %v3129_v54 = vrot.slane %v4007_v26, 1  ;;  %v3130_v35 = vrot.slane %v4008_v31, 1  ;;  %v4013_v26 = vld [vmem:[#allocation2 + $0x80] sm:$0xff] }
 0x320   : > { %3257 = vst [vmem:[%s4123_s26 + $0x20] sm:$0xff] %v3225_v23  ;;  %v2833_v2 = vadd.f32 %v2832_v41, %v2744_v6  ;;  %v4014_v31 = vld [vmem:[#allocation2 + $0x140] sm:$0xff] }
 0x321   : > { %v3131_v23 = vsel %vm3108_vm6, %v3129_v54, %v3130_v35  ;;  %v3139_v54 = vrot.slane %v4013_v26, 1 }
 0x322   : > { %v2879_v32 = vmax.f32 %v2833_v2, 0.0 }
 0x323   : > { %v2656_v46 = vpop.f32.mrf.mxu2  ;;  %v2992_v36 = vpop.f32.mrf.mxu1 }
 0x324   : > { %v2745_v63 = vpop.f32.mrf.mxu3  ;;  %v2657_v37 = vadd.f32 %v2656_v46, %v2568_v8  ;;  %v2993_v61 = vadd.f32 %v5367_v44, %v2992_v36  ;;  %v2578_v36 = vadd.f32 %v5271_v55, %v5278_v19 }
 0x325   : > { %v2837_v43 = vpop.f32.mrf.mxu0 }
 0x326   : > { %v2746_v18 = vadd.f32 %v2745_v63, %v2657_v37  ;;  %v3226_v34 = vadd.f32 %v3123_v62, %v2993_v61  ;;  %v4009_v63 = vld [vmem:[#allocation2 + $0x48] sm:$0x3] }
 0x327   : > { %v3132_v37 = vrot.slane %v4009_v63, 1 }
 0x328   : > { %v2835_v30 = vadd.f32 %v2834_v33, %v2746_v18  ;;  %3258 = vst [vmem:[%s4123_s26 + $0x28] sm:$0xff] %v3226_v34 }
 0x329   : > { %v3133_v34 = vsel %vm3108_vm6, %v3130_v35, %v3132_v37  ;;  %v3140_v35 = vrot.slane %v4014_v31, 1  ;;  %v2588_v37 = vadd.f32 %v5362_v10, %v5298_v9 }
 0x32a   : > { %v2880_v56 = vmax.f32 %v2835_v30, 0.0 }
 0x32b   : > { %v2659_v60 = vpop.f32.mrf.mxu2  ;;  %v2995_v51 = vpop.f32.mrf.mxu1 }
 0x32c   : > { %v2748_v39 = vpop.f32.mrf.mxu3  ;;  %v2900_v3 = vpack.c.bf16 %v2880_v56, %v2879_v32  ;;  %v2996_v1 = vadd.f32 %v5367_v44, %v2995_v51  ;;  %v2660_v40 = vadd.f32 %v2659_v60, %v5259_v45  ;;  %v4010_v32 = vld [vmem:[#allocation2 + $0x88] sm:$0xff]  ;;  %v4011_v60 = vld [vmem:[#allocation2 + $0x180] sm:$0xff] }
 0x32d   : > { %v2839_v29 = vpop.f32.mrf.mxu0  ;;  %v3134_v56 = vrot.slane %v4010_v32, 1  ;;  %v3135_v55 = vrot.slane %v4011_v60, 1 }
 0x32e   : > { %3034 = vmatmul.bf16.gmra.mxu1 %v2900_v3  ;;  %v3227_v25 = vadd.f32 %v3126_v17, %v2996_v1  ;;  %v2749_v12 = vadd.f32 %v2748_v39, %v2660_v40 }
 0x32f   : > { %v3136_v1 = vsel %vm3108_vm6, %v3134_v56, %v3135_v55  ;;  %v4017_v56 = vld [vmem:[#allocation2 + $0x40] sm:$0xff] }
 0x330   : > { %3259 = vst [vmem:[%s4123_s26 + $0x30] sm:$0xff] %v3227_v25  ;;  %v2838_v45 = vadd.f32 %v2837_v43, %v2749_v12  ;;  %v2583_v12 = vadd.f32 %v5285_v22, %v5289_v57  ;;  %v3145_v9 = vrot.slane %v4017_v56, 1 }
 0x332   : > { %v2881_v16 = vmax.f32 %v2838_v45, 0.0 }
 0x333   : > { %v2661_v41 = vpop.f32.mrf.mxu2  ;;  %v2997_v4 = vpop.f32.mrf.mxu1 }
 0x334   : > { %v2750_v14 = vpop.f32.mrf.mxu3  ;;  %v2662_v28 = vadd.f32 %v2661_v41, %v2573_v49  ;;  %v2998_v0 = vadd.f32 %v5367_v44, %v2997_v4  ;;  %v3137_v49 = vrot.slane %v4012_v13, 1  ;;  %v4019_v13 = vld [vmem:[#allocation2 + $0x58] sm:$0xff] }
 0x335   : > { %v2842_v53 = vpop.f32.mrf.mxu0 }
 0x336   : > { %v2751_v24 = vadd.f32 %v2750_v14, %v2662_v28  ;;  %v3228_v52 = vadd.f32 %v3128_v50, %v2998_v0  ;;  %v3138_v45 = vsel %vm3108_vm6, %v3135_v55, %v3137_v49  ;;  %v3149_v49 = vrot.slane %v4019_v13, 1 }
 0x338   : > { %v2840_v15 = vadd.f32 %v2839_v29, %v2751_v24  ;;  %3260 = vst [vmem:[%s4123_s26 + $0x38] sm:$0xff] %v3228_v52 }
 0x33a   : > { %v2882_v11 = vmax.f32 %v2840_v15, 0.0 }
 0x33b   : > { %v2664_v5 = vpop.f32.mrf.mxu2  ;;  %v3000_v33 = vpop.f32.mrf.mxu1 }
 0x33c   : > { %v2753_v59 = vpop.f32.mrf.mxu3  ;;  %v2901_v58 = vpack.c.bf16 %v2882_v11, %v2881_v16  ;;  %v3001_v48 = vadd.f32 %v5367_v44, %v3000_v33  ;;  %v2665_v8 = vadd.f32 %v2664_v5, %v5273_v20 }
 0x33d   : > { %v2844_v6 = vpop.f32.mrf.mxu0 }
 0x33e   : > { %3039 = vmatmul.bf16.gmra.mxu1 %v2901_v58  ;;  %v3229_v46 = vadd.f32 %v3131_v23, %v3001_v48  ;;  %v2754_v62 = vadd.f32 %v2753_v59, %v2665_v8  ;;  %v3141_v59 = vsel %vm3108_vm6, %v3139_v54, %v3140_v35  ;;  %v5720_v48 = vld [vmem:[#allocation30_spill] sm:$0xff] }
 0x33f   : > { %v4023_v54 = vld [vmem:[#allocation2 + $0xb8] sm:$0xff] }
 0x340   : > { %3261 = vst [vmem:[%s4123_s26 + $0x40] sm:$0xff] %v3229_v46  ;;  %v2843_v20 = vadd.f32 %v2842_v53, %v2754_v62  ;;  %v4015_v46 = vld [vmem:[#allocation2 + $0x20] sm:$0x3]  ;;  %v3155_v31 = vrot.slane %v4023_v54, 1 }
 0x341   : > { %v3142_v63 = vrot.slane %v4015_v46, 1 }
 0x342   : > { %v2883_v19 = vmax.f32 %v2843_v20, 0.0 }
 0x343   : > { %v2666_v61 = vpop.f32.mrf.mxu2  ;;  %v3002_v43 = vpop.f32.mrf.mxu1 }
 0x344   : > { %v2755_v2 = vpop.f32.mrf.mxu3  ;;  %v2667_v18 = vadd.f32 %v2666_v61, %v2578_v36  ;;  %v3003_v30 = vadd.f32 %v5367_v44, %v3002_v43 }
 0x345   : > { %v2847_v38 = vpop.f32.mrf.mxu0 }
 0x346   : > { %v2756_v27 = vadd.f32 %v2755_v2, %v2667_v18  ;;  %v3230_v42 = vadd.f32 %v3133_v34, %v3003_v30  ;;  %v3143_v18 = vsel %vm3108_vm6, %v3140_v35, %v3142_v63 }
 0x348   : > { %v2845_v47 = vadd.f32 %v2844_v6, %v2756_v27  ;;  %3262 = vst [vmem:[%s4123_s26 + $0x48] sm:$0xff] %v3230_v42 }
 0x34a   : > { %v2884_v39 = vmax.f32 %v2845_v47, 0.0 }
 0x34b   : > { %v2669_v51 = vpop.f32.mrf.mxu2  ;;  %v3005_v3 = vpop.f32.mrf.mxu1 }
 0x34c   : > { %v2758_v17 = vpop.f32.mrf.mxu3  ;;  %v2902_v40 = vpack.c.bf16 %v2884_v39, %v2883_v19  ;;  %v3006_v29 = vadd.f32 %v5367_v44, %v3005_v3  ;;  %v2670_v25 = vadd.f32 %v2669_v51, %v5282_v7  ;;  %v4018_v3 = vld [vmem:[#allocation2 + $0x8] sm:$0x3] }
 0x34d   : > { %v2849_v14 = vpop.f32.mrf.mxu0 }
 0x34e   : > { %3044 = vmatmul.bf16.gmra.mxu1 %v2902_v40  ;;  %v3231_v21 = vadd.f32 %v3136_v1, %v3006_v29  ;;  %v2759_v41 = vadd.f32 %v2758_v17, %v2670_v25  ;;  %v3147_v1 = vrot.slane %v4018_v3, 1 }
 0x350   : > { %3263 = vst [vmem:[%s4123_s26 + $0x50] sm:$0xff] %v3231_v21  ;;  %v2848_v7 = vadd.f32 %v2847_v38, %v2759_v41  ;;  %v4016_v38 = vld [vmem:[#allocation2 + $0x130] sm:$0xff]  ;;  %v3148_v29 = vsel %vm3108_vm6, %v3145_v9, %v3147_v1  ;;  %v4032_v1 = vld [vmem:[#allocation2] sm:$0xff] }
 0x351   : > { %v3144_v32 = vrot.slane %v4016_v38, 1 }
 0x352   : > { %v2885_v22 = vmax.f32 %v2848_v7, 0.0 }
 0x353   : > { %v2671_v28 = vpop.f32.mrf.mxu2  ;;  %v3007_v0 = vpop.f32.mrf.mxu1  ;;  %v3146_v19 = vsel %vm3108_vm6, %v3144_v32, %v3145_v9 }
 0x354   : > { %v2760_v4 = vpop.f32.mrf.mxu3  ;;  %v2672_v50 = vadd.f32 %v2671_v28, %v2583_v12  ;;  %v3008_v24 = vadd.f32 %v5367_v44, %v3007_v0  ;;  %v4020_v12 = vld [vmem:[#allocation2 + $0xb0] sm:$0xff] }
 0x355   : > { %v2852_v23 = vpop.f32.mrf.mxu0  ;;  %v3150_v41 = vrot.slane %v4020_v12, 1  ;;  %v4021_v0 = vld [vmem:[#allocation2 + $0x90] sm:$0x3] }
 0x356   : > { %v2761_v53 = vadd.f32 %v2760_v4, %v2672_v50  ;;  %v3232_v52 = vadd.f32 %v3138_v45, %v3008_v24  ;;  %v3152_v45 = vrot.slane %v4021_v0, 1 }
 0x357   : > { %v3151_v28 = vsel %vm3108_vm6, %v3149_v49, %v3150_v41  ;;  %v4033_v49 = vld [vmem:[#allocation2 + $0x30] sm:$0x3] }
 0x358   : > { %v2850_v15 = vadd.f32 %v2849_v14, %v2761_v53  ;;  %3264 = vst [vmem:[%s4123_s26 + $0x58] sm:$0xff] %v3232_v52  ;;  %v3153_v7 = vsel %vm3108_vm6, %v3150_v41, %v3152_v45  ;;  %v3172_v12 = vrot.slane %v4033_v49, 1  ;;  %v4035_v45 = vld [vmem:[#allocation2 + $0x110] sm:$0xff] }
 0x35a   : > { %v2886_v57 = vmax.f32 %v2850_v15, 0.0  ;;  %v4022_v15 = vld [vmem:[#allocation2 + $0x190] sm:$0xff] }
 0x35b   : > { %v2674_v16 = vpop.f32.mrf.mxu2  ;;  %v3010_v5 = vpop.f32.mrf.mxu1  ;;  %v3154_v26 = vrot.slane %v4022_v15, 1 }
 0x35c   : > { %v2763_v11 = vpop.f32.mrf.mxu3  ;;  %v2903_v33 = vpack.c.bf16 %v2886_v57, %v2885_v22  ;;  %v3011_v58 = vadd.f32 %v5367_v44, %v3010_v5  ;;  %v2675_v8 = vadd.f32 %v2674_v16, %v5720_v48  ;;  %v4025_v48 = vld [vmem:[#allocation2 + $0xe0] sm:$0xff] }
 0x35d   : > { %v2854_v27 = vpop.f32.mrf.mxu0  ;;  %v3156_v22 = vsel %vm3108_vm6, %v3154_v26, %v3155_v31  ;;  %v4036_v26 = vld [vmem:[#allocation2 + $0xc8] sm:$0x3] }
 0x35e   : > { %3049 = vmatmul.bf16.gmra.mxu1 %v2903_v33  ;;  %v3233_v6 = vadd.f32 %v3141_v59, %v3011_v58  ;;  %v2764_v36 = vadd.f32 %v2763_v11, %v2675_v8  ;;  %v4024_v11 = vld [vmem:[#allocation2 + $0xa8] sm:$0x3]  ;;  %v3159_v8 = vrot.slane %v4025_v48, 1  ;;  %v3177_v54 = vrot.slane %v4036_v26, 1 }
 0x35f   : > { %v3157_v5 = vrot.slane %v4024_v11, 1 }
 0x360   : > { %3265 = vst [vmem:[%s4123_s26 + $0x60] sm:$0xff] %v3233_v6  ;;  %v2853_v30 = vadd.f32 %v2852_v23, %v2764_v36  ;;  %v4026_v6 = vld [vmem:[#allocation2 + $0x158] sm:$0xff] }
 0x361   : > { %v3158_v33 = vsel %vm3108_vm6, %v3155_v31, %v3157_v5  ;;  %v3160_v46 = vrot.slane %v4026_v6, 1  ;;  %v4038_v5 = vld [vmem:[#allocation2 + $0x70] sm:$0xff] }
 0x362   : > { %v2887_v10 = vmax.f32 %v2853_v30, 0.0 }
 0x363   : > { %v2676_v62 = vpop.f32.mrf.mxu2  ;;  %v3012_v2 = vpop.f32.mrf.mxu1 }
 0x364   : > { %v2677_v61 = vadd.f32 %v2676_v62, %v2588_v37  ;;  %v2765_v43 = vpop.f32.mrf.mxu3  ;;  %v3013_v34 = vadd.f32 %v5367_v44, %v3012_v2  ;;  %v3161_v37 = vsel %vm3108_vm6, %v3159_v8, %v3160_v46  ;;  %v4039_v8 = vld [vmem:[#allocation2 + $0x150] sm:$0x3] }
 0x365   : > { %v3182_v6 = vrot.slane %v4039_v8, 1 }
 0x366   : > { %v2766_v20 = vadd.f32 %v2765_v43, %v2677_v61  ;;  %v3234_v42 = vadd.f32 %v3143_v18, %v3013_v34  ;;  %v4027_v61 = vld [vmem:[#allocation2 + $0x98] sm:$0x3] }
 0x367   : > { %v3162_v2 = vrot.slane %v4027_v61, 1 }
 0x368   : > { %v2855_v47 = vadd.f32 %v2854_v27, %v2766_v20  ;;  %3266 = vst [vmem:[%s4123_s26 + $0x68] sm:$0xff] %v3234_v42  ;;  %v4028_v20 = vld [vmem:[#allocation2 + $0xc0] sm:$0xff]  ;;  %v4029_v42 = vld [vmem:[#allocation2 + $0xf8] sm:$0xff] }
 0x369   : > { %v3163_v43 = vsel %vm3108_vm6, %v3160_v46, %v3162_v2  ;;  %v3164_v27 = vrot.slane %v4028_v20, 1  ;;  %v4041_v2 = vld [vmem:[#allocation2 + $0xf0] sm:$0xff] }
 0x36a   : > { %v2888_v60 = vmax.f32 %v2855_v47, 0.0  ;;  %v3165_v47 = vrot.slane %v4029_v42, 1 }
 0x36b   : > { %v3015_v55 = vpop.f32.mrf.mxu1 }
 0x36c   : > { %v2904_v39 = vpack.c.bf16 %v2888_v60, %v2887_v10  ;;  %v3016_v51 = vadd.f32 %v5367_v44, %v3015_v55  ;;  %v3166_v32 = vsel %vm3108_vm6, %v3164_v27, %v3165_v47  ;;  %v4030_v10 = vld [vmem:[#allocation2 + $0x50] sm:$0x3] }
 0x36d   : > { %v3167_v60 = vrot.slane %v4030_v10, 1  ;;  %v4042_v27 = vld [vmem:[#allocation2 + $0x10] sm:$0x3] }
 0x36e   : > { %3054 = vmatmul.bf16.gmra.mxu1 %v2904_v39  ;;  %v3235_v17 = vadd.f32 %v3146_v19, %v3016_v51  ;;  %v3187_v42 = vrot.slane %v4042_v27, 1 }
 0x36f   : > { %v3168_v19 = vsel %vm3108_vm6, %v3165_v47, %v3167_v60 }
 0x370   : > { %3267 = vst [vmem:[%s4123_s26 + $0x70] sm:$0xff] %v3235_v17  ;;  %v4031_v17 = vld [vmem:[#allocation2 + $0x38] sm:$0xff] }
 0x371   : > { %v3169_v3 = vrot.slane %v4031_v17, 1 }
 0x373   : > { %v3017_v40 = vpop.f32.mrf.mxu1 }
 0x374   : > { %v3018_v25 = vadd.f32 %v5367_v44, %v3017_v40  ;;  %v3170_v40 = vrot.slane %v4032_v1, 1 }
 0x376   : > { %v3236_v21 = vadd.f32 %v3148_v29, %v3018_v25  ;;  %v3171_v25 = vsel %vm3108_vm6, %v3169_v3, %v3170_v40 }
 0x378   : > { %3268 = vst [vmem:[%s4123_s26 + $0x78] sm:$0xff] %v3236_v21 }
 0x37b   : > { %v3020_v14 = vpop.f32.mrf.mxu1 }
 0x37c   : > { %v3021_v4 = vadd.f32 %v5367_v44, %v3020_v14  ;;  %v3173_v14 = vsel %vm3108_vm6, %v3170_v40, %v3172_v12 }
 0x37e   : > { %v3237_v50 = vadd.f32 %v3151_v28, %v3021_v4 }
 0x380   : > { %3269 = vst [vmem:[%s4123_s26 + $0x80] sm:$0xff] %v3237_v50  ;;  %v4034_v50 = vld [vmem:[#allocation2 + $0xe8] sm:$0xff] }
 0x381   : > { %v3174_v0 = vrot.slane %v4034_v50, 1 }
 0x383   : > { %v3022_v24 = vpop.f32.mrf.mxu1 }
 0x384   : > { %v3023_v53 = vadd.f32 %v5367_v44, %v3022_v24  ;;  %v3175_v24 = vrot.slane %v4035_v45, 1 }
 0x386   : > { %v3238_v52 = vadd.f32 %v3153_v7, %v3023_v53  ;;  %v3176_v53 = vsel %vm3108_vm6, %v3174_v0, %v3175_v24 }
 0x388   : > { %3270 = vst [vmem:[%s4123_s26 + $0x88] sm:$0xff] %v3238_v52 }
 0x38b   : > { %v3025_v35 = vpop.f32.mrf.mxu1 }
 0x38c   : > { %v3026_v57 = vadd.f32 %v5367_v44, %v3025_v35  ;;  %v3178_v35 = vsel %vm3108_vm6, %v3175_v24, %v3177_v54 }
 0x38e   : > { %v3239_v16 = vadd.f32 %v3156_v22, %v3026_v57 }
 0x390   : > { %3271 = vst [vmem:[%s4123_s26 + $0x90] sm:$0xff] %v3239_v16  ;;  %v4037_v16 = vld [vmem:[#allocation2 + $0x1a8] sm:$0xff] }
 0x391   : > { %v3179_v11 = vrot.slane %v4037_v16, 1 }
 0x393   : > { %v3027_v59 = vpop.f32.mrf.mxu1 }
 0x394   : > { %v3028_v23 = vadd.f32 %v5367_v44, %v3027_v59  ;;  %v3180_v59 = vrot.slane %v4038_v5, 1 }
 0x396   : > { %v3240_v58 = vadd.f32 %v3158_v33, %v3028_v23  ;;  %v3181_v23 = vsel %vm3108_vm6, %v3179_v11, %v3180_v59 }
 0x398   : > { %3272 = vst [vmem:[%s4123_s26 + $0x98] sm:$0xff] %v3240_v58 }
 0x39b   : > { %v3030_v63 = vpop.f32.mrf.mxu1 }
 0x39c   : > { %v3031_v36 = vadd.f32 %v5367_v44, %v3030_v63  ;;  %v3183_v63 = vsel %vm3108_vm6, %v3180_v59, %v3182_v6 }
 0x39e   : > { %v3241_v62 = vadd.f32 %v3161_v37, %v3031_v36 }
 0x3a0   : > { %3273 = vst [vmem:[%s4123_s26 + $0xa0] sm:$0xff] %v3241_v62  ;;  %v4040_v62 = vld [vmem:[#allocation2 + $0x78] sm:$0xff] }
 0x3a1   : > { %v3184_v61 = vrot.slane %v4040_v62, 1 }
 0x3a3   : > { %v3032_v18 = vpop.f32.mrf.mxu1 }
 0x3a4   : > { %v3033_v34 = vadd.f32 %v5367_v44, %v3032_v18  ;;  %v3185_v18 = vrot.slane %v4041_v2, 1 }
 0x3a6   : > { %v3242_v30 = vadd.f32 %v3163_v43, %v3033_v34  ;;  %v3186_v34 = vsel %vm3108_vm6, %v3184_v61, %v3185_v18 }
 0x3a8   : > { %3274 = vst [vmem:[%s4123_s26 + $0xa8] sm:$0xff] %v3242_v30 }
 0x3ab   : > { %v3035_v38 = vpop.f32.mrf.mxu1 }
 0x3ac   : > { %v3036_v56 = vadd.f32 %v5367_v44, %v3035_v38  ;;  %v3188_v38 = vsel %vm3108_vm6, %v3185_v18, %v3187_v42 }
 0x3ae   : > { %v3243_v9 = vadd.f32 %v3166_v32, %v3036_v56 }
 0x3b0   : > { %3275 = vst [vmem:[%s4123_s26 + $0xb0] sm:$0xff] %v3243_v9 }
 0x3b3   : > { %v3037_v55 = vpop.f32.mrf.mxu1 }
 0x3b4   : > { %v3038_v39 = vadd.f32 %v5367_v44, %v3037_v55 }
 0x3b6   : > { %v3244_v51 = vadd.f32 %v3168_v19, %v3038_v39 }
 0x3b8   : > { %3276 = vst [vmem:[%s4123_s26 + $0xb8] sm:$0xff] %v3244_v51 }
 0x3bb   : > { %v3040_v29 = vpop.f32.mrf.mxu1 }
 0x3bc   : > { %v3041_v21 = vadd.f32 %v5367_v44, %v3040_v29 }
 0x3be   : > { %v3245_v13 = vadd.f32 %v3171_v25, %v3041_v21 }
 0x3c0   : > { %3277 = vst [vmem:[%s4123_s26 + $0xc0] sm:$0xff] %v3245_v13 }
 0x3c3   : > { %v3042_v41 = vpop.f32.mrf.mxu1 }
 0x3c4   : > { %v3043_v28 = vadd.f32 %v5367_v44, %v3042_v41 }
 0x3c6   : > { %v3246_v4 = vadd.f32 %v3173_v14, %v3043_v28 }
 0x3c8   : > { %3278 = vst [vmem:[%s4123_s26 + $0xc8] sm:$0xff] %v3246_v4 }
 0x3cb   : > { %v3045_v7 = vpop.f32.mrf.mxu1 }
 0x3cc   : > { %v3046_v52 = vadd.f32 %v5367_v44, %v3045_v7 }
 0x3ce   : > { %v3247_v15 = vadd.f32 %v3176_v53, %v3046_v52 }
 0x3d0   : > { %3279 = vst [vmem:[%s4123_s26 + $0xd0] sm:$0xff] %v3247_v15 }
 0x3d3   : > { %v3047_v31 = vpop.f32.mrf.mxu1 }
 0x3d4   : > { %v3048_v22 = vadd.f32 %v5367_v44, %v3047_v31 }
 0x3d6   : > { %v3248_v57 = vadd.f32 %v3178_v35, %v3048_v22 }
 0x3d8   : > { %3280 = vst [vmem:[%s4123_s26 + $0xd8] sm:$0xff] %v3248_v57 }
 0x3db   : > { %v3050_v33 = vpop.f32.mrf.mxu1 }
 0x3dc   : > { %v3051_v58 = vadd.f32 %v5367_v44, %v3050_v33 }
 0x3de   : > { %v3249_v48 = vadd.f32 %v3181_v23, %v3051_v58 }
 0x3e0   : > { %3281 = vst [vmem:[%s4123_s26 + $0xe0] sm:$0xff] %v3249_v48 }
 0x3e3   : > { %v3052_v46 = vpop.f32.mrf.mxu1 }
 0x3e4   : > { %v3053_v37 = vadd.f32 %v5367_v44, %v3052_v46 }
 0x3e6   : > { %v3250_v36 = vadd.f32 %v3183_v63, %v3053_v37 }
 0x3e8   : > { %3282 = vst [vmem:[%s4123_s26 + $0xe8] sm:$0xff] %v3250_v36 }
 0x3eb   : > { %v3055_v43 = vpop.f32.mrf.mxu1 }
 0x3ec   : > { %v3056_v30 = vadd.f32 %v5367_v44, %v3055_v43 }
 0x3ee   : > { %v3251_v20 = vadd.f32 %v3186_v34, %v3056_v30 }
 0x3f0   : > { %3283 = vst [vmem:[%s4123_s26 + $0xf0] sm:$0xff] %v3251_v20 }
 0x3f3   : > { %v3057_v47 = vpop.f32.mrf.mxu1 }
 0x3f4   : > { %v3058_v32 = vadd.f32 %v5367_v44, %v3057_v47 }
 0x3f6   : > { %v3252_v56 = vadd.f32 %v3188_v38, %v3058_v32 }
 0x3f8   : > { %3284 = vst [vmem:[%s4123_s26 + $0xf8] sm:$0xff] %v3252_v56 }
 0x3f9 PF: > { %s14_s17 = sadd.s32 1, %s4067_s17   ;;  %s5721_s15 = smov %s4063_s16 }
 0x3fa   : > { %p11_p5 = scmp.ge.s32.totalorder %s14_s17, 4   ;;  %s5722_s16 = smov %s5724_s18 }
 0x3fc   :  { %13 = sbr.rel (!%p11_p5) target bundleno = 2 (0x2), region = 138 }
 0x401   :  { %3315 = vsyncmov [#allocation3] }
 0x404   :  { %s3316_s11 = vpop.sfrf %3315 }
 0x405   :  { %p3870_p6 = scmp.ne.s32.totalorder %s3316_s11, 0 }
 0x407   :  { %3320 = shalt.err (%p3870_p6)  }
 0x408   :  { %3322 = vsyncmov [#allocation3 + $0x1] }
 0x40b   :  { %s3323_s12 = vpop.sfrf %3322 }
 0x40c   :  { %p3871_p7 = scmp.ne.s32.totalorder %s3323_s12, 0 }
 0x40e   :  { %3327 = shalt.err (%p3871_p7)  }

</bundles_post_ra>
